<compile_context>
chip_gen: v7x
topology: tpu7x:2x2x1
jax: 0.10.0
libtpu: 0.0.40
codegen_flags: <defaults>
</compile_context>

<pallas_src>
import math

import jax
import jax.numpy as jnp
from jax.experimental import pallas as pl
from jax.experimental.pallas import tpu as pltpu

NEG_SLOPE = 0.01  # nn.LeakyReLU default negative_slope


def _leaky(x):
    return jnp.where(x > 0, x, NEG_SLOPE * x)


# ----------------------------------------------------------------------------------
# Fused kernel: FOV conv + FC, self encoder, both attentions, final MLP
# ----------------------------------------------------------------------------------
def _core_kernel(x36_ref, s_ref, nb_ref, nbm_ref, it_ref, itm_ref,
                 wc_ref, bc_ref, wfcr_ref, bfc_ref,
                 ws1_ref, bs1_ref, ws2_ref, bs2_ref,
                 w1s_ref, w1g_ref,
                 wpii_ref, bpii_ref, wqn_ref, bqn_ref, wkn_ref, bkn_ref, wvn_ref, bvn_ref, won_ref,
                 wpir_ref, bpir_ref, wqr_ref, bqr_ref, wkr_ref, bkr_ref, wvr_ref, bvr_ref, wor_ref,
                 wsq_ref, bm1_ref, wm2_ref, bm2_ref,
                 out_ref):
    f32 = jnp.float32
    bf16 = jnp.bfloat16

    def mac(x, w):
        # (bt, K) @ (K, F) with tiny K: VPU broadcast-fma instead of a degenerate MXU matmul.
        acc = x[:, 0:1] * w[0]
        for j in range(1, w.shape[0]):
            acc = acc + x[:, j:j + 1] * w[j]
        return acc

    s = s_ref[...]                                            # (bt, 2)

    # ---- FOV encoder: Conv2d(4,8,k3,s2,p1)+LeakyReLU (VPU) then Linear(512,192)+LeakyReLU (MXU)
    x36 = x36_ref[...]                                        # (bt, 36, 64): 36 taps, 64 positions
    wc = wc_ref[...]                                          # (36, 8)
    conv = x36[:, 0:1, :] * wc[0, :, None]                    # (bt, 8, 64)  channel-major
    for t in range(1, 36):
        conv = conv + x36[:, t:t + 1, :] * wc[t, :, None]
    a_chw = _leaky(conv + bc_ref[...][:, :, None])            # (bt, 8, 64)
    a_bf = a_chw.astype(bf16)
    # 512->192 FC as 8 lane-dense (bt,64)@(64,192) dots -> no in-kernel reshape needed.
    gp = jnp.dot(a_bf[:, 0, :], wfcr_ref[0], preferred_element_type=f32)
    for co in range(1, 8):
        gp = gp + jnp.dot(a_bf[:, co, :], wfcr_ref[co], preferred_element_type=f32)
    grid_v = _leaky(gp + bfc_ref[...])                        # (bt, 192)

    # ---- self encoder: Linear(2,16)+LeakyReLU, Linear(16,8)+LeakyReLU  (all VPU)
    h16 = _leaky(mac(s, ws1_ref[...]) + bs1_ref[...])
    self_v = _leaky(mac(h16, ws2_ref[...]) + bs2_ref[...])    # (bt, 8)

    scale = 1.0 / math.sqrt(64.0)

    def attention(kv, mask, wpq_ref, bpq_ref, wq_ref, bq_ref, wk_ref, bk_ref, wv_ref, bv_ref):
        # kv: (bt, N, 3); mask: (bt, N) with 1 = valid.  Single-head scaled-dot-product attention.
        qr = mac(s, wpq_ref[...]) + bpq_ref[...]              # (bt, 3)   project_*_q
        qp = mac(qr, wq_ref[...]) + bq_ref[...]               # (bt, 64)  w_q(q)
        wk = wk_ref[...]
        wv = wv_ref[...]
        k = (kv[:, :, 0:1] * wk[0] + kv[:, :, 1:2] * wk[1]
             + kv[:, :, 2:3] * wk[2]) + bk_ref[...]           # (bt, N, 64)
        v = (kv[:, :, 0:1] * wv[0] + kv[:, :, 1:2] * wv[1]
             + kv[:, :, 2:3] * wv[2]) + bv_ref[...]           # (bt, N, 64)
        scores = jnp.sum(qp[:, None, :] * k, axis=-1) * scale  # (bt, N)
        scores = jnp.where(mask > 0.0, scores, -1e9)
        m = jnp.max(scores, axis=-1, keepdims=True)
        e = jnp.exp(scores - m)
        attn = e * pl.reciprocal(jnp.sum(e, axis=-1, keepdims=True), approx=True)
        return jnp.sum(attn[:, :, None] * v, axis=1)          # (bt, 64)  (before output fc)

    o_n = attention(nb_ref[...], nbm_ref[...], wpii_ref, bpii_ref, wqn_ref, bqn_ref,
                    wkn_ref, bkn_ref, wvn_ref, bvn_ref)
    o_r = attention(it_ref[...], itm_ref[...], wpir_ref, bpir_ref, wqr_ref, bqr_ref,
                    wkr_ref, bkr_ref, wvr_ref, bvr_ref)

    # ---- final MLP: Linear(456,64)+LeakyReLU, Linear(64,192)+LeakyReLU.
    # concat order [self_v | grid_v | ally | self_a | enemy | self_e] realized as partial matmuls;
    # the attention output fcs and the projected-query ("self feats") paths are pre-folded into
    # won_ref / wor_ref / wsq_ref / bm1_ref (no nonlinearity in between, done at init time).
    h = (mac(self_v, w1s_ref[...])
         + jnp.dot(grid_v.astype(bf16), w1g_ref[...], preferred_element_type=f32)
         + jnp.dot(o_n.astype(bf16), won_ref[...], preferred_element_type=f32)
         + jnp.dot(o_r.astype(bf16), wor_ref[...], preferred_element_type=f32)
         + mac(s, wsq_ref[...])
         + bm1_ref[...])
    h = _leaky(h)
    out_ref[...] = _leaky(jnp.dot(h.astype(bf16), wm2_ref[...], preferred_element_type=f32)
                          + bm2_ref[...])


def _w_spec(a):
    zeros = (0,) * a.ndim
    return pl.BlockSpec(a.shape, lambda i, z=zeros: z)   # whole array, resident across the grid


def _core_pallas(data, weights, bt):
    x36, s, nb, nbm, it, itm = data
    Bp = s.shape[0]
    NB = nb.shape[1]
    NI = it.shape[1]
    in_specs = [
        pl.BlockSpec((bt, 36, 64), lambda i: (i, 0, 0)),
        pl.BlockSpec((bt, 2), lambda i: (i, 0)),
        pl.BlockSpec((bt, NB, 3), lambda i: (i, 0, 0)),
        pl.BlockSpec((bt, NB), lambda i: (i, 0)),
        pl.BlockSpec((bt, NI, 3), lambda i: (i, 0, 0)),
        pl.BlockSpec((bt, NI), lambda i: (i, 0)),
    ] + [_w_spec(w) for w in weights]
    return pl.pallas_call(
        _core_kernel,
        out_shape=jax.ShapeDtypeStruct((Bp, 192), jnp.float32),
        grid=(Bp // bt,),
        in_specs=in_specs,
        out_specs=pl.BlockSpec((bt, 192), lambda i: (i, 0)),
        compiler_params=pltpu.CompilerParams(
            dimension_semantics=("parallel",)),
    )(*data, *weights)


# ----------------------------------------------------------------------------------
# Parameters: raw init + one-time algebraic folding
# ----------------------------------------------------------------------------------
def _dense_init(key, fan_in, fan_out):
    kw, kb = jax.random.split(key)
    lim = 1.0 / math.sqrt(fan_in)
    w = jax.random.uniform(kw, (fan_in, fan_out), jnp.float32, -lim, lim)
    b = jax.random.uniform(kb, (1, fan_out), jnp.float32, -lim, lim)
    return w, b


def init_params(key):
    ks = jax.random.split(key, 16)
    p = {}
    # TODO(synk): FOV_AUX_encoder definition is not in the reference snippet; implemented as
    #             Conv2d(4,8,k=3,s=2,p=1)+LeakyReLU -> flatten(512, NCHW order) -> Linear(512,192)
    #             +LeakyReLU with synthetic weights, producing the required 192-dim feature.
    p['conv_w'], p['conv_b'] = _dense_init(ks[0], 4 * 9, 8)      # rows ordered (c, kh, kw)
    p['fov_fc'] = _dense_init(ks[1], 8 * 8 * 8, 192)
    p['self1'] = _dense_init(ks[2], 2, 16)
    p['self2'] = _dense_init(ks[3], 16, 8)
    p['proj_ii'] = _dense_init(ks[4], 2, 3)
    p['proj_ir'] = _dense_init(ks[5], 2, 3)
    # TODO(synk): Multi_Head_Attention(1,3,64,64,64) definition is not in the snippet; implemented
    #             as single-head scaled-dot-product attention (w_q/w_k/w_v: 3->64, output fc 64->64)
    #             returning (attended feats, projected-query feats, attn) as implied by the forward.
    p['nb_q'] = _dense_init(ks[6], 3, 64)
    p['nb_k'] = _dense_init(ks[7], 3, 64)
    p['nb_v'] = _dense_init(ks[8], 3, 64)
    p['nb_o'] = _dense_init(ks[9], 64, 64)
    p['rb_q'] = _dense_init(ks[10], 3, 64)
    p['rb_k'] = _dense_init(ks[11], 3, 64)
    p['rb_v'] = _dense_init(ks[12], 3, 64)
    p['rb_o'] = _dense_init(ks[13], 64, 64)
    p['mlp1'] = _dense_init(ks[14], 192 + 8 + 2 * 64 + 2 * 64, 64)
    p['mlp2'] = _dense_init(ks[15], 64, 192)
    return p


def fold_params(p):
    """One-time folding of activation-free weight chains + bf16 cast of the big matmul weights."""
    w1, b1 = p['mlp1']                       # (456, 64), (1, 64)
    sl_self, sl_grid = w1[0:8], w1[8:200]
    sl_ally, sl_sa = w1[200:264], w1[264:328]
    sl_enemy, sl_se = w1[328:392], w1[392:456]

    wpii, bpii = p['proj_ii']
    wqn, bqn = p['nb_q']
    wpir, bpir = p['proj_ir']
    wqr, bqr = p['rb_q']
    won, bon = p['nb_o']
    wor, bor = p['rb_o']

    # self_feats contribution: qp = (s @ wp + bp) @ wq + bq feeds its w1 slice with no nonlinearity.
    w_sa = wpii @ wqn @ sl_sa
    b_sa = (bpii @ wqn + bqn) @ sl_sa
    w_se = wpir @ wqr @ sl_se
    b_se = (bpir @ wqr + bqr) @ sl_se

    bf16 = jnp.bfloat16
    return dict(
        wc=p['conv_w'], bc=p['conv_b'],
        wfcr=p['fov_fc'][0].reshape(8, 64, 192).astype(bf16),   # channel-major flatten (co, pos)
        bfc=p['fov_fc'][1],
        ws1=p['self1'][0], bs1=p['self1'][1],
        ws2=p['self2'][0], bs2=p['self2'][1],
        w1_self=sl_self,
        w1_grid=sl_grid.astype(bf16),
        wpii=wpii, bpii=bpii, wqn=wqn, bqn=bqn,
        wkn=p['nb_k'][0], bkn=p['nb_k'][1], wvn=p['nb_v'][0], bvn=p['nb_v'][1],
        won_fold=(won @ sl_ally).astype(bf16),                  # output fc folded into mlp1 slice
        wpir=wpir, bpir=bpir, wqr=wqr, bqr=bqr,
        wkr=p['rb_k'][0], bkr=p['rb_k'][1], wvr=p['rb_v'][0], bvr=p['rb_v'][1],
        wor_fold=(wor @ sl_enemy).astype(bf16),
        w_selfq=w_sa + w_se,                                    # both self-feats paths, K=2
        bm1_eff=b1 + bon @ sl_ally + bor @ sl_enemy + b_sa + b_se,
        wm2=p['mlp2'][0].astype(bf16), bm2=p['mlp2'][1],
    )


# ----------------------------------------------------------------------------------
# Forward wrapper
# ----------------------------------------------------------------------------------
def inter_critic_core(fp, self_info, grid_map, neighbor_info, neighbor_mask,
                      inter_info, inter_mask):
    B = self_info.shape[0]
    # im2col as a single XLA op: (B,4,16,16) -> (B, 36, 8, 8) patches (tap-major) -> (B, 36, 64)
    x36 = jax.lax.conv_general_dilated_patches(
        grid_map.astype(jnp.float32), filter_shape=(3, 3),
        window_strides=(2, 2), padding=((1, 1), (1, 1))).reshape(B, 36, 64)

    data = [x36,
            self_info.astype(jnp.float32),
            neighbor_info.astype(jnp.float32),
            neighbor_mask.astype(jnp.float32),
            inter_info.astype(jnp.float32),
            inter_mask.astype(jnp.float32)]

    # Batch tiling: whole batch for small B; 256-row tiles (parallel grid -> both v7x cores,
    # MXU sees >=256-row matmuls, VMEM bounded) for large B.
    bt = B if B <= 256 else 256
    pad = (-B) % bt
    if pad:
        data = [jnp.pad(d, ((0, pad),) + ((0, 0),) * (d.ndim - 1)) for d in data]

    weights = (fp['wc'], fp['bc'], fp['wfcr'], fp['bfc'],
               fp['ws1'], fp['bs1'], fp['ws2'], fp['bs2'],
               fp['w1_self'], fp['w1_grid'],
               fp['wpii'], fp['bpii'], fp['wqn'], fp['bqn'],
               fp['wkn'], fp['bkn'], fp['wvn'], fp['bvn'], fp['won_fold'],
               fp['wpir'], fp['bpir'], fp['wqr'], fp['bqr'],
               fp['wkr'], fp['bkr'], fp['wvr'], fp['bvr'], fp['wor_fold'],
               fp['w_selfq'], fp['bm1_eff'], fp['wm2'], fp['bm2'])

    out = _core_pallas(data, weights, bt)
    return out[:B]


if __name__ == "__main__":
    key = jax.random.PRNGKey(0)
    kp, k1, k2, k3, k4 = jax.random.split(key, 5)
    params = init_params(kp)
    fparams = fold_params(params)

    B, NB, NI = 2, 5, 6
    self_info = jax.random.normal(k1, (B, 2), jnp.float32)
    grid_map = jax.random.normal(k2, (B, 4, 16, 16), jnp.float32)          # NCHW
    neighbor_info = jax.random.normal(k3, (B, NB, 3), jnp.float32)
    inter_info = jax.random.normal(k4, (B, NI, 3), jnp.float32)
    neighbor_mask = jnp.array([[1, 1, 1, 0, 0], [1, 1, 1, 1, 1]], jnp.float32)
    inter_mask = jnp.array([[1, 1, 0, 0, 0, 0], [1, 1, 1, 1, 0, 0]], jnp.float32)

    forward = jax.jit(inter_critic_core)
    out = forward(fparams, self_info, grid_map, neighbor_info,
                  neighbor_mask, inter_info, inter_mask)
    out = jax.block_until_ready(out)
    assert out.shape == (B, 192) and out.dtype == jnp.float32
    print("KERNEL_OK")
</pallas_src>

<mosaic_0001>
module attributes {stable_mosaic.version = 11 : i64} {
  func.func @_core_kernel(%arg0: i32, %arg1: memref<2x36x64xf32, #tpu.memory_space<vmem>>, %arg2: memref<2x2xf32, #tpu.memory_space<vmem>>, %arg3: memref<2x5x3xf32, #tpu.memory_space<vmem>>, %arg4: memref<2x5xf32, #tpu.memory_space<vmem>>, %arg5: memref<2x6x3xf32, #tpu.memory_space<vmem>>, %arg6: memref<2x6xf32, #tpu.memory_space<vmem>>, %arg7: memref<36x8xf32, #tpu.memory_space<vmem>>, %arg8: memref<1x8xf32, #tpu.memory_space<vmem>>, %arg9: memref<8x64x192xbf16, #tpu.memory_space<vmem>>, %arg10: memref<1x192xf32, #tpu.memory_space<vmem>>, %arg11: memref<2x16xf32, #tpu.memory_space<vmem>>, %arg12: memref<1x16xf32, #tpu.memory_space<vmem>>, %arg13: memref<16x8xf32, #tpu.memory_space<vmem>>, %arg14: memref<1x8xf32, #tpu.memory_space<vmem>>, %arg15: memref<8x64xf32, #tpu.memory_space<vmem>>, %arg16: memref<192x64xbf16, #tpu.memory_space<vmem>>, %arg17: memref<2x3xf32, #tpu.memory_space<vmem>>, %arg18: memref<1x3xf32, #tpu.memory_space<vmem>>, %arg19: memref<3x64xf32, #tpu.memory_space<vmem>>, %arg20: memref<1x64xf32, #tpu.memory_space<vmem>>, %arg21: memref<3x64xf32, #tpu.memory_space<vmem>>, %arg22: memref<1x64xf32, #tpu.memory_space<vmem>>, %arg23: memref<3x64xf32, #tpu.memory_space<vmem>>, %arg24: memref<1x64xf32, #tpu.memory_space<vmem>>, %arg25: memref<64x64xbf16, #tpu.memory_space<vmem>>, %arg26: memref<2x3xf32, #tpu.memory_space<vmem>>, %arg27: memref<1x3xf32, #tpu.memory_space<vmem>>, %arg28: memref<3x64xf32, #tpu.memory_space<vmem>>, %arg29: memref<1x64xf32, #tpu.memory_space<vmem>>, %arg30: memref<3x64xf32, #tpu.memory_space<vmem>>, %arg31: memref<1x64xf32, #tpu.memory_space<vmem>>, %arg32: memref<3x64xf32, #tpu.memory_space<vmem>>, %arg33: memref<1x64xf32, #tpu.memory_space<vmem>>, %arg34: memref<64x64xbf16, #tpu.memory_space<vmem>>, %arg35: memref<2x64xf32, #tpu.memory_space<vmem>>, %arg36: memref<1x64xf32, #tpu.memory_space<vmem>>, %arg37: memref<64x192xbf16, #tpu.memory_space<vmem>>, %arg38: memref<1x192xf32, #tpu.memory_space<vmem>>, %arg39: memref<2x192xf32, #tpu.memory_space<vmem>>) attributes {dimension_semantics = [#tpu.dimension_semantics<parallel>], iteration_bounds = array<i64: 1>, scalar_prefetch = 0 : i64, scratch_operands = 0 : i64, tpu.core_type = #tpu.core_type<tc>, window_params = [{transform_indices = @transform_0, window_bounds = array<i64: 2, 36, 64>}, {transform_indices = @transform_1, window_bounds = array<i64: 2, 2>}, {transform_indices = @transform_2, window_bounds = array<i64: 2, 5, 3>}, {transform_indices = @transform_3, window_bounds = array<i64: 2, 5>}, {transform_indices = @transform_4, window_bounds = array<i64: 2, 6, 3>}, {transform_indices = @transform_5, window_bounds = array<i64: 2, 6>}, {pipeline_mode = #tpu.pipeline_mode<synchronous>, transform_indices = @transform_6, window_bounds = array<i64: 36, 8>}, {pipeline_mode = #tpu.pipeline_mode<synchronous>, transform_indices = @transform_7, window_bounds = array<i64: 1, 8>}, {pipeline_mode = #tpu.pipeline_mode<synchronous>, transform_indices = @transform_8, window_bounds = array<i64: 8, 64, 192>}, {pipeline_mode = #tpu.pipeline_mode<synchronous>, transform_indices = @transform_9, window_bounds = array<i64: 1, 192>}, {pipeline_mode = #tpu.pipeline_mode<synchronous>, transform_indices = @transform_10, window_bounds = array<i64: 2, 16>}, {pipeline_mode = #tpu.pipeline_mode<synchronous>, transform_indices = @transform_11, window_bounds = array<i64: 1, 16>}, {pipeline_mode = #tpu.pipeline_mode<synchronous>, transform_indices = @transform_12, window_bounds = array<i64: 16, 8>}, {pipeline_mode = #tpu.pipeline_mode<synchronous>, transform_indices = @transform_13, window_bounds = array<i64: 1, 8>}, {pipeline_mode = #tpu.pipeline_mode<synchronous>, transform_indices = @transform_14, window_bounds = array<i64: 8, 64>}, {pipeline_mode = #tpu.pipeline_mode<synchronous>, transform_indices = @transform_15, window_bounds = array<i64: 192, 64>}, {pipeline_mode = #tpu.pipeline_mode<synchronous>, transform_indices = @transform_16, window_bounds = array<i64: 2, 3>}, {pipeline_mode = #tpu.pipeline_mode<synchronous>, transform_indices = @transform_17, window_bounds = array<i64: 1, 3>}, {pipeline_mode = #tpu.pipeline_mode<synchronous>, transform_indices = @transform_18, window_bounds = array<i64: 3, 64>}, {pipeline_mode = #tpu.pipeline_mode<synchronous>, transform_indices = @transform_19, window_bounds = array<i64: 1, 64>}, {pipeline_mode = #tpu.pipeline_mode<synchronous>, transform_indices = @transform_20, window_bounds = array<i64: 3, 64>}, {pipeline_mode = #tpu.pipeline_mode<synchronous>, transform_indices = @transform_21, window_bounds = array<i64: 1, 64>}, {pipeline_mode = #tpu.pipeline_mode<synchronous>, transform_indices = @transform_22, window_bounds = array<i64: 3, 64>}, {pipeline_mode = #tpu.pipeline_mode<synchronous>, transform_indices = @transform_23, window_bounds = array<i64: 1, 64>}, {pipeline_mode = #tpu.pipeline_mode<synchronous>, transform_indices = @transform_24, window_bounds = array<i64: 64, 64>}, {pipeline_mode = #tpu.pipeline_mode<synchronous>, transform_indices = @transform_25, window_bounds = array<i64: 2, 3>}, {pipeline_mode = #tpu.pipeline_mode<synchronous>, transform_indices = @transform_26, window_bounds = array<i64: 1, 3>}, {pipeline_mode = #tpu.pipeline_mode<synchronous>, transform_indices = @transform_27, window_bounds = array<i64: 3, 64>}, {pipeline_mode = #tpu.pipeline_mode<synchronous>, transform_indices = @transform_28, window_bounds = array<i64: 1, 64>}, {pipeline_mode = #tpu.pipeline_mode<synchronous>, transform_indices = @transform_29, window_bounds = array<i64: 3, 64>}, {pipeline_mode = #tpu.pipeline_mode<synchronous>, transform_indices = @transform_30, window_bounds = array<i64: 1, 64>}, {pipeline_mode = #tpu.pipeline_mode<synchronous>, transform_indices = @transform_31, window_bounds = array<i64: 3, 64>}, {pipeline_mode = #tpu.pipeline_mode<synchronous>, transform_indices = @transform_32, window_bounds = array<i64: 1, 64>}, {pipeline_mode = #tpu.pipeline_mode<synchronous>, transform_indices = @transform_33, window_bounds = array<i64: 64, 64>}, {pipeline_mode = #tpu.pipeline_mode<synchronous>, transform_indices = @transform_34, window_bounds = array<i64: 2, 64>}, {pipeline_mode = #tpu.pipeline_mode<synchronous>, transform_indices = @transform_35, window_bounds = array<i64: 1, 64>}, {pipeline_mode = #tpu.pipeline_mode<synchronous>, transform_indices = @transform_36, window_bounds = array<i64: 64, 192>}, {pipeline_mode = #tpu.pipeline_mode<synchronous>, transform_indices = @transform_37, window_bounds = array<i64: 1, 192>}, {transform_indices = @transform_38, window_bounds = array<i64: 2, 192>}]} {
    %c0 = arith.constant 0 : index
    %c0_0 = arith.constant 0 : index
    %0 = vector.load %arg2[%c0, %c0_0] : memref<2x2xf32, #tpu.memory_space<vmem>>, vector<2x2xf32>
    %c0_1 = arith.constant 0 : index
    %c0_2 = arith.constant 0 : index
    %c0_3 = arith.constant 0 : index
    %1 = vector.load %arg1[%c0_1, %c0_2, %c0_3] : memref<2x36x64xf32, #tpu.memory_space<vmem>>, vector<2x36x64xf32>
    %c0_4 = arith.constant 0 : index
    %c0_5 = arith.constant 0 : index
    %2 = vector.load %arg7[%c0_4, %c0_5] : memref<36x8xf32, #tpu.memory_space<vmem>>, vector<36x8xf32>
    %3 = vector.extract_strided_slice %1 {offsets = [0, 0, 0], sizes = [2, 1, 64], strides = [1, 1, 1]} : vector<2x36x64xf32> to vector<2x1x64xf32>
    %4 = vector.extract_strided_slice %2 {offsets = [0, 0], sizes = [1, 8], strides = [1, 1]} : vector<36x8xf32> to vector<1x8xf32>
    %5 = vector.shape_cast %4 : vector<1x8xf32> to vector<8xf32>
    %6 = vector.shape_cast %5 : vector<8xf32> to vector<8x1xf32>
    %7 = vector.shape_cast %6 : vector<8x1xf32> to vector<1x8x1xf32>
    %8 = vector.broadcast %3 : vector<2x1x64xf32> to vector<2x8x64xf32>
    %9 = vector.broadcast %7 : vector<1x8x1xf32> to vector<2x8x64xf32>
    %10 = arith.mulf %8, %9 : vector<2x8x64xf32>
    %11 = vector.extract_strided_slice %1 {offsets = [0, 1, 0], sizes = [2, 1, 64], strides = [1, 1, 1]} : vector<2x36x64xf32> to vector<2x1x64xf32>
    %12 = vector.extract_strided_slice %2 {offsets = [1, 0], sizes = [1, 8], strides = [1, 1]} : vector<36x8xf32> to vector<1x8xf32>
    %13 = vector.shape_cast %12 : vector<1x8xf32> to vector<8xf32>
    %14 = vector.shape_cast %13 : vector<8xf32> to vector<8x1xf32>
    %15 = vector.shape_cast %14 : vector<8x1xf32> to vector<1x8x1xf32>
    %16 = vector.broadcast %11 : vector<2x1x64xf32> to vector<2x8x64xf32>
    %17 = vector.broadcast %15 : vector<1x8x1xf32> to vector<2x8x64xf32>
    %18 = arith.mulf %16, %17 : vector<2x8x64xf32>
    %19 = arith.addf %10, %18 : vector<2x8x64xf32>
    %20 = vector.extract_strided_slice %1 {offsets = [0, 2, 0], sizes = [2, 1, 64], strides = [1, 1, 1]} : vector<2x36x64xf32> to vector<2x1x64xf32>
    %21 = vector.extract_strided_slice %2 {offsets = [2, 0], sizes = [1, 8], strides = [1, 1]} : vector<36x8xf32> to vector<1x8xf32>
    %22 = vector.shape_cast %21 : vector<1x8xf32> to vector<8xf32>
    %23 = vector.shape_cast %22 : vector<8xf32> to vector<8x1xf32>
    %24 = vector.shape_cast %23 : vector<8x1xf32> to vector<1x8x1xf32>
    %25 = vector.broadcast %20 : vector<2x1x64xf32> to vector<2x8x64xf32>
    %26 = vector.broadcast %24 : vector<1x8x1xf32> to vector<2x8x64xf32>
    %27 = arith.mulf %25, %26 : vector<2x8x64xf32>
    %28 = arith.addf %19, %27 : vector<2x8x64xf32>
    %29 = vector.extract_strided_slice %1 {offsets = [0, 3, 0], sizes = [2, 1, 64], strides = [1, 1, 1]} : vector<2x36x64xf32> to vector<2x1x64xf32>
    %30 = vector.extract_strided_slice %2 {offsets = [3, 0], sizes = [1, 8], strides = [1, 1]} : vector<36x8xf32> to vector<1x8xf32>
    %31 = vector.shape_cast %30 : vector<1x8xf32> to vector<8xf32>
    %32 = vector.shape_cast %31 : vector<8xf32> to vector<8x1xf32>
    %33 = vector.shape_cast %32 : vector<8x1xf32> to vector<1x8x1xf32>
    %34 = vector.broadcast %29 : vector<2x1x64xf32> to vector<2x8x64xf32>
    %35 = vector.broadcast %33 : vector<1x8x1xf32> to vector<2x8x64xf32>
    %36 = arith.mulf %34, %35 : vector<2x8x64xf32>
    %37 = arith.addf %28, %36 : vector<2x8x64xf32>
    %38 = vector.extract_strided_slice %1 {offsets = [0, 4, 0], sizes = [2, 1, 64], strides = [1, 1, 1]} : vector<2x36x64xf32> to vector<2x1x64xf32>
    %39 = vector.extract_strided_slice %2 {offsets = [4, 0], sizes = [1, 8], strides = [1, 1]} : vector<36x8xf32> to vector<1x8xf32>
    %40 = vector.shape_cast %39 : vector<1x8xf32> to vector<8xf32>
    %41 = vector.shape_cast %40 : vector<8xf32> to vector<8x1xf32>
    %42 = vector.shape_cast %41 : vector<8x1xf32> to vector<1x8x1xf32>
    %43 = vector.broadcast %38 : vector<2x1x64xf32> to vector<2x8x64xf32>
    %44 = vector.broadcast %42 : vector<1x8x1xf32> to vector<2x8x64xf32>
    %45 = arith.mulf %43, %44 : vector<2x8x64xf32>
    %46 = arith.addf %37, %45 : vector<2x8x64xf32>
    %47 = vector.extract_strided_slice %1 {offsets = [0, 5, 0], sizes = [2, 1, 64], strides = [1, 1, 1]} : vector<2x36x64xf32> to vector<2x1x64xf32>
    %48 = vector.extract_strided_slice %2 {offsets = [5, 0], sizes = [1, 8], strides = [1, 1]} : vector<36x8xf32> to vector<1x8xf32>
    %49 = vector.shape_cast %48 : vector<1x8xf32> to vector<8xf32>
    %50 = vector.shape_cast %49 : vector<8xf32> to vector<8x1xf32>
    %51 = vector.shape_cast %50 : vector<8x1xf32> to vector<1x8x1xf32>
    %52 = vector.broadcast %47 : vector<2x1x64xf32> to vector<2x8x64xf32>
    %53 = vector.broadcast %51 : vector<1x8x1xf32> to vector<2x8x64xf32>
    %54 = arith.mulf %52, %53 : vector<2x8x64xf32>
    %55 = arith.addf %46, %54 : vector<2x8x64xf32>
    %56 = vector.extract_strided_slice %1 {offsets = [0, 6, 0], sizes = [2, 1, 64], strides = [1, 1, 1]} : vector<2x36x64xf32> to vector<2x1x64xf32>
    %57 = vector.extract_strided_slice %2 {offsets = [6, 0], sizes = [1, 8], strides = [1, 1]} : vector<36x8xf32> to vector<1x8xf32>
    %58 = vector.shape_cast %57 : vector<1x8xf32> to vector<8xf32>
    %59 = vector.shape_cast %58 : vector<8xf32> to vector<8x1xf32>
    %60 = vector.shape_cast %59 : vector<8x1xf32> to vector<1x8x1xf32>
    %61 = vector.broadcast %56 : vector<2x1x64xf32> to vector<2x8x64xf32>
    %62 = vector.broadcast %60 : vector<1x8x1xf32> to vector<2x8x64xf32>
    %63 = arith.mulf %61, %62 : vector<2x8x64xf32>
    %64 = arith.addf %55, %63 : vector<2x8x64xf32>
    %65 = vector.extract_strided_slice %1 {offsets = [0, 7, 0], sizes = [2, 1, 64], strides = [1, 1, 1]} : vector<2x36x64xf32> to vector<2x1x64xf32>
    %66 = vector.extract_strided_slice %2 {offsets = [7, 0], sizes = [1, 8], strides = [1, 1]} : vector<36x8xf32> to vector<1x8xf32>
    %67 = vector.shape_cast %66 : vector<1x8xf32> to vector<8xf32>
    %68 = vector.shape_cast %67 : vector<8xf32> to vector<8x1xf32>
    %69 = vector.shape_cast %68 : vector<8x1xf32> to vector<1x8x1xf32>
    %70 = vector.broadcast %65 : vector<2x1x64xf32> to vector<2x8x64xf32>
    %71 = vector.broadcast %69 : vector<1x8x1xf32> to vector<2x8x64xf32>
    %72 = arith.mulf %70, %71 : vector<2x8x64xf32>
    %73 = arith.addf %64, %72 : vector<2x8x64xf32>
    %74 = vector.extract_strided_slice %1 {offsets = [0, 8, 0], sizes = [2, 1, 64], strides = [1, 1, 1]} : vector<2x36x64xf32> to vector<2x1x64xf32>
    %75 = vector.extract_strided_slice %2 {offsets = [8, 0], sizes = [1, 8], strides = [1, 1]} : vector<36x8xf32> to vector<1x8xf32>
    %76 = vector.shape_cast %75 : vector<1x8xf32> to vector<8xf32>
    %77 = vector.shape_cast %76 : vector<8xf32> to vector<8x1xf32>
    %78 = vector.shape_cast %77 : vector<8x1xf32> to vector<1x8x1xf32>
    %79 = vector.broadcast %74 : vector<2x1x64xf32> to vector<2x8x64xf32>
    %80 = vector.broadcast %78 : vector<1x8x1xf32> to vector<2x8x64xf32>
    %81 = arith.mulf %79, %80 : vector<2x8x64xf32>
    %82 = arith.addf %73, %81 : vector<2x8x64xf32>
    %83 = vector.extract_strided_slice %1 {offsets = [0, 9, 0], sizes = [2, 1, 64], strides = [1, 1, 1]} : vector<2x36x64xf32> to vector<2x1x64xf32>
    %84 = vector.extract_strided_slice %2 {offsets = [9, 0], sizes = [1, 8], strides = [1, 1]} : vector<36x8xf32> to vector<1x8xf32>
    %85 = vector.shape_cast %84 : vector<1x8xf32> to vector<8xf32>
    %86 = vector.shape_cast %85 : vector<8xf32> to vector<8x1xf32>
    %87 = vector.shape_cast %86 : vector<8x1xf32> to vector<1x8x1xf32>
    %88 = vector.broadcast %83 : vector<2x1x64xf32> to vector<2x8x64xf32>
    %89 = vector.broadcast %87 : vector<1x8x1xf32> to vector<2x8x64xf32>
    %90 = arith.mulf %88, %89 : vector<2x8x64xf32>
    %91 = arith.addf %82, %90 : vector<2x8x64xf32>
    %92 = vector.extract_strided_slice %1 {offsets = [0, 10, 0], sizes = [2, 1, 64], strides = [1, 1, 1]} : vector<2x36x64xf32> to vector<2x1x64xf32>
    %93 = vector.extract_strided_slice %2 {offsets = [10, 0], sizes = [1, 8], strides = [1, 1]} : vector<36x8xf32> to vector<1x8xf32>
    %94 = vector.shape_cast %93 : vector<1x8xf32> to vector<8xf32>
    %95 = vector.shape_cast %94 : vector<8xf32> to vector<8x1xf32>
    %96 = vector.shape_cast %95 : vector<8x1xf32> to vector<1x8x1xf32>
    %97 = vector.broadcast %92 : vector<2x1x64xf32> to vector<2x8x64xf32>
    %98 = vector.broadcast %96 : vector<1x8x1xf32> to vector<2x8x64xf32>
    %99 = arith.mulf %97, %98 : vector<2x8x64xf32>
    %100 = arith.addf %91, %99 : vector<2x8x64xf32>
    %101 = vector.extract_strided_slice %1 {offsets = [0, 11, 0], sizes = [2, 1, 64], strides = [1, 1, 1]} : vector<2x36x64xf32> to vector<2x1x64xf32>
    %102 = vector.extract_strided_slice %2 {offsets = [11, 0], sizes = [1, 8], strides = [1, 1]} : vector<36x8xf32> to vector<1x8xf32>
    %103 = vector.shape_cast %102 : vector<1x8xf32> to vector<8xf32>
    %104 = vector.shape_cast %103 : vector<8xf32> to vector<8x1xf32>
    %105 = vector.shape_cast %104 : vector<8x1xf32> to vector<1x8x1xf32>
    %106 = vector.broadcast %101 : vector<2x1x64xf32> to vector<2x8x64xf32>
    %107 = vector.broadcast %105 : vector<1x8x1xf32> to vector<2x8x64xf32>
    %108 = arith.mulf %106, %107 : vector<2x8x64xf32>
    %109 = arith.addf %100, %108 : vector<2x8x64xf32>
    %110 = vector.extract_strided_slice %1 {offsets = [0, 12, 0], sizes = [2, 1, 64], strides = [1, 1, 1]} : vector<2x36x64xf32> to vector<2x1x64xf32>
    %111 = vector.extract_strided_slice %2 {offsets = [12, 0], sizes = [1, 8], strides = [1, 1]} : vector<36x8xf32> to vector<1x8xf32>
    %112 = vector.shape_cast %111 : vector<1x8xf32> to vector<8xf32>
    %113 = vector.shape_cast %112 : vector<8xf32> to vector<8x1xf32>
    %114 = vector.shape_cast %113 : vector<8x1xf32> to vector<1x8x1xf32>
    %115 = vector.broadcast %110 : vector<2x1x64xf32> to vector<2x8x64xf32>
    %116 = vector.broadcast %114 : vector<1x8x1xf32> to vector<2x8x64xf32>
    %117 = arith.mulf %115, %116 : vector<2x8x64xf32>
    %118 = arith.addf %109, %117 : vector<2x8x64xf32>
    %119 = vector.extract_strided_slice %1 {offsets = [0, 13, 0], sizes = [2, 1, 64], strides = [1, 1, 1]} : vector<2x36x64xf32> to vector<2x1x64xf32>
    %120 = vector.extract_strided_slice %2 {offsets = [13, 0], sizes = [1, 8], strides = [1, 1]} : vector<36x8xf32> to vector<1x8xf32>
    %121 = vector.shape_cast %120 : vector<1x8xf32> to vector<8xf32>
    %122 = vector.shape_cast %121 : vector<8xf32> to vector<8x1xf32>
    %123 = vector.shape_cast %122 : vector<8x1xf32> to vector<1x8x1xf32>
    %124 = vector.broadcast %119 : vector<2x1x64xf32> to vector<2x8x64xf32>
    %125 = vector.broadcast %123 : vector<1x8x1xf32> to vector<2x8x64xf32>
    %126 = arith.mulf %124, %125 : vector<2x8x64xf32>
    %127 = arith.addf %118, %126 : vector<2x8x64xf32>
    %128 = vector.extract_strided_slice %1 {offsets = [0, 14, 0], sizes = [2, 1, 64], strides = [1, 1, 1]} : vector<2x36x64xf32> to vector<2x1x64xf32>
    %129 = vector.extract_strided_slice %2 {offsets = [14, 0], sizes = [1, 8], strides = [1, 1]} : vector<36x8xf32> to vector<1x8xf32>
    %130 = vector.shape_cast %129 : vector<1x8xf32> to vector<8xf32>
    %131 = vector.shape_cast %130 : vector<8xf32> to vector<8x1xf32>
    %132 = vector.shape_cast %131 : vector<8x1xf32> to vector<1x8x1xf32>
    %133 = vector.broadcast %128 : vector<2x1x64xf32> to vector<2x8x64xf32>
    %134 = vector.broadcast %132 : vector<1x8x1xf32> to vector<2x8x64xf32>
    %135 = arith.mulf %133, %134 : vector<2x8x64xf32>
    %136 = arith.addf %127, %135 : vector<2x8x64xf32>
    %137 = vector.extract_strided_slice %1 {offsets = [0, 15, 0], sizes = [2, 1, 64], strides = [1, 1, 1]} : vector<2x36x64xf32> to vector<2x1x64xf32>
    %138 = vector.extract_strided_slice %2 {offsets = [15, 0], sizes = [1, 8], strides = [1, 1]} : vector<36x8xf32> to vector<1x8xf32>
    %139 = vector.shape_cast %138 : vector<1x8xf32> to vector<8xf32>
    %140 = vector.shape_cast %139 : vector<8xf32> to vector<8x1xf32>
    %141 = vector.shape_cast %140 : vector<8x1xf32> to vector<1x8x1xf32>
    %142 = vector.broadcast %137 : vector<2x1x64xf32> to vector<2x8x64xf32>
    %143 = vector.broadcast %141 : vector<1x8x1xf32> to vector<2x8x64xf32>
    %144 = arith.mulf %142, %143 : vector<2x8x64xf32>
    %145 = arith.addf %136, %144 : vector<2x8x64xf32>
    %146 = vector.extract_strided_slice %1 {offsets = [0, 16, 0], sizes = [2, 1, 64], strides = [1, 1, 1]} : vector<2x36x64xf32> to vector<2x1x64xf32>
    %147 = vector.extract_strided_slice %2 {offsets = [16, 0], sizes = [1, 8], strides = [1, 1]} : vector<36x8xf32> to vector<1x8xf32>
    %148 = vector.shape_cast %147 : vector<1x8xf32> to vector<8xf32>
    %149 = vector.shape_cast %148 : vector<8xf32> to vector<8x1xf32>
    %150 = vector.shape_cast %149 : vector<8x1xf32> to vector<1x8x1xf32>
    %151 = vector.broadcast %146 : vector<2x1x64xf32> to vector<2x8x64xf32>
    %152 = vector.broadcast %150 : vector<1x8x1xf32> to vector<2x8x64xf32>
    %153 = arith.mulf %151, %152 : vector<2x8x64xf32>
    %154 = arith.addf %145, %153 : vector<2x8x64xf32>
    %155 = vector.extract_strided_slice %1 {offsets = [0, 17, 0], sizes = [2, 1, 64], strides = [1, 1, 1]} : vector<2x36x64xf32> to vector<2x1x64xf32>
    %156 = vector.extract_strided_slice %2 {offsets = [17, 0], sizes = [1, 8], strides = [1, 1]} : vector<36x8xf32> to vector<1x8xf32>
    %157 = vector.shape_cast %156 : vector<1x8xf32> to vector<8xf32>
    %158 = vector.shape_cast %157 : vector<8xf32> to vector<8x1xf32>
    %159 = vector.shape_cast %158 : vector<8x1xf32> to vector<1x8x1xf32>
    %160 = vector.broadcast %155 : vector<2x1x64xf32> to vector<2x8x64xf32>
    %161 = vector.broadcast %159 : vector<1x8x1xf32> to vector<2x8x64xf32>
    %162 = arith.mulf %160, %161 : vector<2x8x64xf32>
    %163 = arith.addf %154, %162 : vector<2x8x64xf32>
    %164 = vector.extract_strided_slice %1 {offsets = [0, 18, 0], sizes = [2, 1, 64], strides = [1, 1, 1]} : vector<2x36x64xf32> to vector<2x1x64xf32>
    %165 = vector.extract_strided_slice %2 {offsets = [18, 0], sizes = [1, 8], strides = [1, 1]} : vector<36x8xf32> to vector<1x8xf32>
    %166 = vector.shape_cast %165 : vector<1x8xf32> to vector<8xf32>
    %167 = vector.shape_cast %166 : vector<8xf32> to vector<8x1xf32>
    %168 = vector.shape_cast %167 : vector<8x1xf32> to vector<1x8x1xf32>
    %169 = vector.broadcast %164 : vector<2x1x64xf32> to vector<2x8x64xf32>
    %170 = vector.broadcast %168 : vector<1x8x1xf32> to vector<2x8x64xf32>
    %171 = arith.mulf %169, %170 : vector<2x8x64xf32>
    %172 = arith.addf %163, %171 : vector<2x8x64xf32>
    %173 = vector.extract_strided_slice %1 {offsets = [0, 19, 0], sizes = [2, 1, 64], strides = [1, 1, 1]} : vector<2x36x64xf32> to vector<2x1x64xf32>
    %174 = vector.extract_strided_slice %2 {offsets = [19, 0], sizes = [1, 8], strides = [1, 1]} : vector<36x8xf32> to vector<1x8xf32>
    %175 = vector.shape_cast %174 : vector<1x8xf32> to vector<8xf32>
    %176 = vector.shape_cast %175 : vector<8xf32> to vector<8x1xf32>
    %177 = vector.shape_cast %176 : vector<8x1xf32> to vector<1x8x1xf32>
    %178 = vector.broadcast %173 : vector<2x1x64xf32> to vector<2x8x64xf32>
    %179 = vector.broadcast %177 : vector<1x8x1xf32> to vector<2x8x64xf32>
    %180 = arith.mulf %178, %179 : vector<2x8x64xf32>
    %181 = arith.addf %172, %180 : vector<2x8x64xf32>
    %182 = vector.extract_strided_slice %1 {offsets = [0, 20, 0], sizes = [2, 1, 64], strides = [1, 1, 1]} : vector<2x36x64xf32> to vector<2x1x64xf32>
    %183 = vector.extract_strided_slice %2 {offsets = [20, 0], sizes = [1, 8], strides = [1, 1]} : vector<36x8xf32> to vector<1x8xf32>
    %184 = vector.shape_cast %183 : vector<1x8xf32> to vector<8xf32>
    %185 = vector.shape_cast %184 : vector<8xf32> to vector<8x1xf32>
    %186 = vector.shape_cast %185 : vector<8x1xf32> to vector<1x8x1xf32>
    %187 = vector.broadcast %182 : vector<2x1x64xf32> to vector<2x8x64xf32>
    %188 = vector.broadcast %186 : vector<1x8x1xf32> to vector<2x8x64xf32>
    %189 = arith.mulf %187, %188 : vector<2x8x64xf32>
    %190 = arith.addf %181, %189 : vector<2x8x64xf32>
    %191 = vector.extract_strided_slice %1 {offsets = [0, 21, 0], sizes = [2, 1, 64], strides = [1, 1, 1]} : vector<2x36x64xf32> to vector<2x1x64xf32>
    %192 = vector.extract_strided_slice %2 {offsets = [21, 0], sizes = [1, 8], strides = [1, 1]} : vector<36x8xf32> to vector<1x8xf32>
    %193 = vector.shape_cast %192 : vector<1x8xf32> to vector<8xf32>
    %194 = vector.shape_cast %193 : vector<8xf32> to vector<8x1xf32>
    %195 = vector.shape_cast %194 : vector<8x1xf32> to vector<1x8x1xf32>
    %196 = vector.broadcast %191 : vector<2x1x64xf32> to vector<2x8x64xf32>
    %197 = vector.broadcast %195 : vector<1x8x1xf32> to vector<2x8x64xf32>
    %198 = arith.mulf %196, %197 : vector<2x8x64xf32>
    %199 = arith.addf %190, %198 : vector<2x8x64xf32>
    %200 = vector.extract_strided_slice %1 {offsets = [0, 22, 0], sizes = [2, 1, 64], strides = [1, 1, 1]} : vector<2x36x64xf32> to vector<2x1x64xf32>
    %201 = vector.extract_strided_slice %2 {offsets = [22, 0], sizes = [1, 8], strides = [1, 1]} : vector<36x8xf32> to vector<1x8xf32>
    %202 = vector.shape_cast %201 : vector<1x8xf32> to vector<8xf32>
    %203 = vector.shape_cast %202 : vector<8xf32> to vector<8x1xf32>
    %204 = vector.shape_cast %203 : vector<8x1xf32> to vector<1x8x1xf32>
    %205 = vector.broadcast %200 : vector<2x1x64xf32> to vector<2x8x64xf32>
    %206 = vector.broadcast %204 : vector<1x8x1xf32> to vector<2x8x64xf32>
    %207 = arith.mulf %205, %206 : vector<2x8x64xf32>
    %208 = arith.addf %199, %207 : vector<2x8x64xf32>
    %209 = vector.extract_strided_slice %1 {offsets = [0, 23, 0], sizes = [2, 1, 64], strides = [1, 1, 1]} : vector<2x36x64xf32> to vector<2x1x64xf32>
    %210 = vector.extract_strided_slice %2 {offsets = [23, 0], sizes = [1, 8], strides = [1, 1]} : vector<36x8xf32> to vector<1x8xf32>
    %211 = vector.shape_cast %210 : vector<1x8xf32> to vector<8xf32>
    %212 = vector.shape_cast %211 : vector<8xf32> to vector<8x1xf32>
    %213 = vector.shape_cast %212 : vector<8x1xf32> to vector<1x8x1xf32>
    %214 = vector.broadcast %209 : vector<2x1x64xf32> to vector<2x8x64xf32>
    %215 = vector.broadcast %213 : vector<1x8x1xf32> to vector<2x8x64xf32>
    %216 = arith.mulf %214, %215 : vector<2x8x64xf32>
    %217 = arith.addf %208, %216 : vector<2x8x64xf32>
    %218 = vector.extract_strided_slice %1 {offsets = [0, 24, 0], sizes = [2, 1, 64], strides = [1, 1, 1]} : vector<2x36x64xf32> to vector<2x1x64xf32>
    %219 = vector.extract_strided_slice %2 {offsets = [24, 0], sizes = [1, 8], strides = [1, 1]} : vector<36x8xf32> to vector<1x8xf32>
    %220 = vector.shape_cast %219 : vector<1x8xf32> to vector<8xf32>
    %221 = vector.shape_cast %220 : vector<8xf32> to vector<8x1xf32>
    %222 = vector.shape_cast %221 : vector<8x1xf32> to vector<1x8x1xf32>
    %223 = vector.broadcast %218 : vector<2x1x64xf32> to vector<2x8x64xf32>
    %224 = vector.broadcast %222 : vector<1x8x1xf32> to vector<2x8x64xf32>
    %225 = arith.mulf %223, %224 : vector<2x8x64xf32>
    %226 = arith.addf %217, %225 : vector<2x8x64xf32>
    %227 = vector.extract_strided_slice %1 {offsets = [0, 25, 0], sizes = [2, 1, 64], strides = [1, 1, 1]} : vector<2x36x64xf32> to vector<2x1x64xf32>
    %228 = vector.extract_strided_slice %2 {offsets = [25, 0], sizes = [1, 8], strides = [1, 1]} : vector<36x8xf32> to vector<1x8xf32>
    %229 = vector.shape_cast %228 : vector<1x8xf32> to vector<8xf32>
    %230 = vector.shape_cast %229 : vector<8xf32> to vector<8x1xf32>
    %231 = vector.shape_cast %230 : vector<8x1xf32> to vector<1x8x1xf32>
    %232 = vector.broadcast %227 : vector<2x1x64xf32> to vector<2x8x64xf32>
    %233 = vector.broadcast %231 : vector<1x8x1xf32> to vector<2x8x64xf32>
    %234 = arith.mulf %232, %233 : vector<2x8x64xf32>
    %235 = arith.addf %226, %234 : vector<2x8x64xf32>
    %236 = vector.extract_strided_slice %1 {offsets = [0, 26, 0], sizes = [2, 1, 64], strides = [1, 1, 1]} : vector<2x36x64xf32> to vector<2x1x64xf32>
    %237 = vector.extract_strided_slice %2 {offsets = [26, 0], sizes = [1, 8], strides = [1, 1]} : vector<36x8xf32> to vector<1x8xf32>
    %238 = vector.shape_cast %237 : vector<1x8xf32> to vector<8xf32>
    %239 = vector.shape_cast %238 : vector<8xf32> to vector<8x1xf32>
    %240 = vector.shape_cast %239 : vector<8x1xf32> to vector<1x8x1xf32>
    %241 = vector.broadcast %236 : vector<2x1x64xf32> to vector<2x8x64xf32>
    %242 = vector.broadcast %240 : vector<1x8x1xf32> to vector<2x8x64xf32>
    %243 = arith.mulf %241, %242 : vector<2x8x64xf32>
    %244 = arith.addf %235, %243 : vector<2x8x64xf32>
    %245 = vector.extract_strided_slice %1 {offsets = [0, 27, 0], sizes = [2, 1, 64], strides = [1, 1, 1]} : vector<2x36x64xf32> to vector<2x1x64xf32>
    %246 = vector.extract_strided_slice %2 {offsets = [27, 0], sizes = [1, 8], strides = [1, 1]} : vector<36x8xf32> to vector<1x8xf32>
    %247 = vector.shape_cast %246 : vector<1x8xf32> to vector<8xf32>
    %248 = vector.shape_cast %247 : vector<8xf32> to vector<8x1xf32>
    %249 = vector.shape_cast %248 : vector<8x1xf32> to vector<1x8x1xf32>
    %250 = vector.broadcast %245 : vector<2x1x64xf32> to vector<2x8x64xf32>
    %251 = vector.broadcast %249 : vector<1x8x1xf32> to vector<2x8x64xf32>
    %252 = arith.mulf %250, %251 : vector<2x8x64xf32>
    %253 = arith.addf %244, %252 : vector<2x8x64xf32>
    %254 = vector.extract_strided_slice %1 {offsets = [0, 28, 0], sizes = [2, 1, 64], strides = [1, 1, 1]} : vector<2x36x64xf32> to vector<2x1x64xf32>
    %255 = vector.extract_strided_slice %2 {offsets = [28, 0], sizes = [1, 8], strides = [1, 1]} : vector<36x8xf32> to vector<1x8xf32>
    %256 = vector.shape_cast %255 : vector<1x8xf32> to vector<8xf32>
    %257 = vector.shape_cast %256 : vector<8xf32> to vector<8x1xf32>
    %258 = vector.shape_cast %257 : vector<8x1xf32> to vector<1x8x1xf32>
    %259 = vector.broadcast %254 : vector<2x1x64xf32> to vector<2x8x64xf32>
    %260 = vector.broadcast %258 : vector<1x8x1xf32> to vector<2x8x64xf32>
    %261 = arith.mulf %259, %260 : vector<2x8x64xf32>
    %262 = arith.addf %253, %261 : vector<2x8x64xf32>
    %263 = vector.extract_strided_slice %1 {offsets = [0, 29, 0], sizes = [2, 1, 64], strides = [1, 1, 1]} : vector<2x36x64xf32> to vector<2x1x64xf32>
    %264 = vector.extract_strided_slice %2 {offsets = [29, 0], sizes = [1, 8], strides = [1, 1]} : vector<36x8xf32> to vector<1x8xf32>
    %265 = vector.shape_cast %264 : vector<1x8xf32> to vector<8xf32>
    %266 = vector.shape_cast %265 : vector<8xf32> to vector<8x1xf32>
    %267 = vector.shape_cast %266 : vector<8x1xf32> to vector<1x8x1xf32>
    %268 = vector.broadcast %263 : vector<2x1x64xf32> to vector<2x8x64xf32>
    %269 = vector.broadcast %267 : vector<1x8x1xf32> to vector<2x8x64xf32>
    %270 = arith.mulf %268, %269 : vector<2x8x64xf32>
    %271 = arith.addf %262, %270 : vector<2x8x64xf32>
    %272 = vector.extract_strided_slice %1 {offsets = [0, 30, 0], sizes = [2, 1, 64], strides = [1, 1, 1]} : vector<2x36x64xf32> to vector<2x1x64xf32>
    %273 = vector.extract_strided_slice %2 {offsets = [30, 0], sizes = [1, 8], strides = [1, 1]} : vector<36x8xf32> to vector<1x8xf32>
    %274 = vector.shape_cast %273 : vector<1x8xf32> to vector<8xf32>
    %275 = vector.shape_cast %274 : vector<8xf32> to vector<8x1xf32>
    %276 = vector.shape_cast %275 : vector<8x1xf32> to vector<1x8x1xf32>
    %277 = vector.broadcast %272 : vector<2x1x64xf32> to vector<2x8x64xf32>
    %278 = vector.broadcast %276 : vector<1x8x1xf32> to vector<2x8x64xf32>
    %279 = arith.mulf %277, %278 : vector<2x8x64xf32>
    %280 = arith.addf %271, %279 : vector<2x8x64xf32>
    %281 = vector.extract_strided_slice %1 {offsets = [0, 31, 0], sizes = [2, 1, 64], strides = [1, 1, 1]} : vector<2x36x64xf32> to vector<2x1x64xf32>
    %282 = vector.extract_strided_slice %2 {offsets = [31, 0], sizes = [1, 8], strides = [1, 1]} : vector<36x8xf32> to vector<1x8xf32>
    %283 = vector.shape_cast %282 : vector<1x8xf32> to vector<8xf32>
    %284 = vector.shape_cast %283 : vector<8xf32> to vector<8x1xf32>
    %285 = vector.shape_cast %284 : vector<8x1xf32> to vector<1x8x1xf32>
    %286 = vector.broadcast %281 : vector<2x1x64xf32> to vector<2x8x64xf32>
    %287 = vector.broadcast %285 : vector<1x8x1xf32> to vector<2x8x64xf32>
    %288 = arith.mulf %286, %287 : vector<2x8x64xf32>
    %289 = arith.addf %280, %288 : vector<2x8x64xf32>
    %290 = vector.extract_strided_slice %1 {offsets = [0, 32, 0], sizes = [2, 1, 64], strides = [1, 1, 1]} : vector<2x36x64xf32> to vector<2x1x64xf32>
    %291 = vector.extract_strided_slice %2 {offsets = [32, 0], sizes = [1, 8], strides = [1, 1]} : vector<36x8xf32> to vector<1x8xf32>
    %292 = vector.shape_cast %291 : vector<1x8xf32> to vector<8xf32>
    %293 = vector.shape_cast %292 : vector<8xf32> to vector<8x1xf32>
    %294 = vector.shape_cast %293 : vector<8x1xf32> to vector<1x8x1xf32>
    %295 = vector.broadcast %290 : vector<2x1x64xf32> to vector<2x8x64xf32>
    %296 = vector.broadcast %294 : vector<1x8x1xf32> to vector<2x8x64xf32>
    %297 = arith.mulf %295, %296 : vector<2x8x64xf32>
    %298 = arith.addf %289, %297 : vector<2x8x64xf32>
    %299 = vector.extract_strided_slice %1 {offsets = [0, 33, 0], sizes = [2, 1, 64], strides = [1, 1, 1]} : vector<2x36x64xf32> to vector<2x1x64xf32>
    %300 = vector.extract_strided_slice %2 {offsets = [33, 0], sizes = [1, 8], strides = [1, 1]} : vector<36x8xf32> to vector<1x8xf32>
    %301 = vector.shape_cast %300 : vector<1x8xf32> to vector<8xf32>
    %302 = vector.shape_cast %301 : vector<8xf32> to vector<8x1xf32>
    %303 = vector.shape_cast %302 : vector<8x1xf32> to vector<1x8x1xf32>
    %304 = vector.broadcast %299 : vector<2x1x64xf32> to vector<2x8x64xf32>
    %305 = vector.broadcast %303 : vector<1x8x1xf32> to vector<2x8x64xf32>
    %306 = arith.mulf %304, %305 : vector<2x8x64xf32>
    %307 = arith.addf %298, %306 : vector<2x8x64xf32>
    %308 = vector.extract_strided_slice %1 {offsets = [0, 34, 0], sizes = [2, 1, 64], strides = [1, 1, 1]} : vector<2x36x64xf32> to vector<2x1x64xf32>
    %309 = vector.extract_strided_slice %2 {offsets = [34, 0], sizes = [1, 8], strides = [1, 1]} : vector<36x8xf32> to vector<1x8xf32>
    %310 = vector.shape_cast %309 : vector<1x8xf32> to vector<8xf32>
    %311 = vector.shape_cast %310 : vector<8xf32> to vector<8x1xf32>
    %312 = vector.shape_cast %311 : vector<8x1xf32> to vector<1x8x1xf32>
    %313 = vector.broadcast %308 : vector<2x1x64xf32> to vector<2x8x64xf32>
    %314 = vector.broadcast %312 : vector<1x8x1xf32> to vector<2x8x64xf32>
    %315 = arith.mulf %313, %314 : vector<2x8x64xf32>
    %316 = arith.addf %307, %315 : vector<2x8x64xf32>
    %317 = vector.extract_strided_slice %1 {offsets = [0, 35, 0], sizes = [2, 1, 64], strides = [1, 1, 1]} : vector<2x36x64xf32> to vector<2x1x64xf32>
    %318 = vector.extract_strided_slice %2 {offsets = [35, 0], sizes = [1, 8], strides = [1, 1]} : vector<36x8xf32> to vector<1x8xf32>
    %319 = vector.shape_cast %318 : vector<1x8xf32> to vector<8xf32>
    %320 = vector.shape_cast %319 : vector<8xf32> to vector<8x1xf32>
    %321 = vector.shape_cast %320 : vector<8x1xf32> to vector<1x8x1xf32>
    %322 = vector.broadcast %317 : vector<2x1x64xf32> to vector<2x8x64xf32>
    %323 = vector.broadcast %321 : vector<1x8x1xf32> to vector<2x8x64xf32>
    %324 = arith.mulf %322, %323 : vector<2x8x64xf32>
    %325 = arith.addf %316, %324 : vector<2x8x64xf32>
    %c0_6 = arith.constant 0 : index
    %c0_7 = arith.constant 0 : index
    %326 = vector.load %arg8[%c0_6, %c0_7] : memref<1x8xf32, #tpu.memory_space<vmem>>, vector<1x8xf32>
    %327 = vector.shape_cast %326 : vector<1x8xf32> to vector<1x8x1xf32>
    %328 = vector.broadcast %327 : vector<1x8x1xf32> to vector<2x8x64xf32>
    %329 = arith.addf %325, %328 : vector<2x8x64xf32>
    %cst = arith.constant 0.000000e+00 : f32
    %330 = vector.broadcast %cst : f32 to vector<2x8x64xf32>
    %331 = arith.cmpf ogt, %329, %330 : vector<2x8x64xf32>
    %cst_8 = arith.constant 0.00999999977 : f32
    %332 = vector.broadcast %cst_8 : f32 to vector<2x8x64xf32>
    %333 = arith.mulf %332, %329 : vector<2x8x64xf32>
    %334 = arith.select %331, %329, %333 : vector<2x8x64xi1>, vector<2x8x64xf32>
    %335 = arith.truncf %334 : vector<2x8x64xf32> to vector<2x8x64xbf16>
    %336 = vector.extract_strided_slice %335 {offsets = [0, 0, 0], sizes = [2, 1, 64], strides = [1, 1, 1]} : vector<2x8x64xbf16> to vector<2x1x64xbf16>
    %337 = vector.shape_cast %336 : vector<2x1x64xbf16> to vector<2x64xbf16>
    %c0_9 = arith.constant 0 : index
    %c0_10 = arith.constant 0 : index
    %c0_11 = arith.constant 0 : index
    %338 = vector.load %arg9[%c0_9, %c0_10, %c0_11] : memref<8x64x192xbf16, #tpu.memory_space<vmem>>, vector<1x64x192xbf16>
    %339 = vector.shape_cast %338 : vector<1x64x192xbf16> to vector<64x192xbf16>
    %cst_12 = arith.constant dense<0.000000e+00> : vector<2x192xf32>
    %340 = tpu.matmul %337, %339, %cst_12 {dimension_numbers = #tpu.dot_dimension_numbers<[1], [0], [0], [1], [0, 0, 1, 1], [], []>} : vector<2x64xbf16>, vector<64x192xbf16>, vector<2x192xf32> -> vector<2x192xf32>
    %341 = vector.extract_strided_slice %335 {offsets = [0, 1, 0], sizes = [2, 1, 64], strides = [1, 1, 1]} : vector<2x8x64xbf16> to vector<2x1x64xbf16>
    %342 = vector.shape_cast %341 : vector<2x1x64xbf16> to vector<2x64xbf16>
    %c1 = arith.constant 1 : index
    %c0_13 = arith.constant 0 : index
    %c0_14 = arith.constant 0 : index
    %343 = vector.load %arg9[%c1, %c0_13, %c0_14] : memref<8x64x192xbf16, #tpu.memory_space<vmem>>, vector<1x64x192xbf16>
    %344 = vector.shape_cast %343 : vector<1x64x192xbf16> to vector<64x192xbf16>
    %cst_15 = arith.constant dense<0.000000e+00> : vector<2x192xf32>
    %345 = tpu.matmul %342, %344, %cst_15 {dimension_numbers = #tpu.dot_dimension_numbers<[1], [0], [0], [1], [0, 0, 1, 1], [], []>} : vector<2x64xbf16>, vector<64x192xbf16>, vector<2x192xf32> -> vector<2x192xf32>
    %346 = arith.addf %340, %345 : vector<2x192xf32>
    %347 = vector.extract_strided_slice %335 {offsets = [0, 2, 0], sizes = [2, 1, 64], strides = [1, 1, 1]} : vector<2x8x64xbf16> to vector<2x1x64xbf16>
    %348 = vector.shape_cast %347 : vector<2x1x64xbf16> to vector<2x64xbf16>
    %c2 = arith.constant 2 : index
    %c0_16 = arith.constant 0 : index
    %c0_17 = arith.constant 0 : index
    %349 = vector.load %arg9[%c2, %c0_16, %c0_17] : memref<8x64x192xbf16, #tpu.memory_space<vmem>>, vector<1x64x192xbf16>
    %350 = vector.shape_cast %349 : vector<1x64x192xbf16> to vector<64x192xbf16>
    %cst_18 = arith.constant dense<0.000000e+00> : vector<2x192xf32>
    %351 = tpu.matmul %348, %350, %cst_18 {dimension_numbers = #tpu.dot_dimension_numbers<[1], [0], [0], [1], [0, 0, 1, 1], [], []>} : vector<2x64xbf16>, vector<64x192xbf16>, vector<2x192xf32> -> vector<2x192xf32>
    %352 = arith.addf %346, %351 : vector<2x192xf32>
    %353 = vector.extract_strided_slice %335 {offsets = [0, 3, 0], sizes = [2, 1, 64], strides = [1, 1, 1]} : vector<2x8x64xbf16> to vector<2x1x64xbf16>
    %354 = vector.shape_cast %353 : vector<2x1x64xbf16> to vector<2x64xbf16>
    %c3 = arith.constant 3 : index
    %c0_19 = arith.constant 0 : index
    %c0_20 = arith.constant 0 : index
    %355 = vector.load %arg9[%c3, %c0_19, %c0_20] : memref<8x64x192xbf16, #tpu.memory_space<vmem>>, vector<1x64x192xbf16>
    %356 = vector.shape_cast %355 : vector<1x64x192xbf16> to vector<64x192xbf16>
    %cst_21 = arith.constant dense<0.000000e+00> : vector<2x192xf32>
    %357 = tpu.matmul %354, %356, %cst_21 {dimension_numbers = #tpu.dot_dimension_numbers<[1], [0], [0], [1], [0, 0, 1, 1], [], []>} : vector<2x64xbf16>, vector<64x192xbf16>, vector<2x192xf32> -> vector<2x192xf32>
    %358 = arith.addf %352, %357 : vector<2x192xf32>
    %359 = vector.extract_strided_slice %335 {offsets = [0, 4, 0], sizes = [2, 1, 64], strides = [1, 1, 1]} : vector<2x8x64xbf16> to vector<2x1x64xbf16>
    %360 = vector.shape_cast %359 : vector<2x1x64xbf16> to vector<2x64xbf16>
    %c4 = arith.constant 4 : index
    %c0_22 = arith.constant 0 : index
    %c0_23 = arith.constant 0 : index
    %361 = vector.load %arg9[%c4, %c0_22, %c0_23] : memref<8x64x192xbf16, #tpu.memory_space<vmem>>, vector<1x64x192xbf16>
    %362 = vector.shape_cast %361 : vector<1x64x192xbf16> to vector<64x192xbf16>
    %cst_24 = arith.constant dense<0.000000e+00> : vector<2x192xf32>
    %363 = tpu.matmul %360, %362, %cst_24 {dimension_numbers = #tpu.dot_dimension_numbers<[1], [0], [0], [1], [0, 0, 1, 1], [], []>} : vector<2x64xbf16>, vector<64x192xbf16>, vector<2x192xf32> -> vector<2x192xf32>
    %364 = arith.addf %358, %363 : vector<2x192xf32>
    %365 = vector.extract_strided_slice %335 {offsets = [0, 5, 0], sizes = [2, 1, 64], strides = [1, 1, 1]} : vector<2x8x64xbf16> to vector<2x1x64xbf16>
    %366 = vector.shape_cast %365 : vector<2x1x64xbf16> to vector<2x64xbf16>
    %c5 = arith.constant 5 : index
    %c0_25 = arith.constant 0 : index
    %c0_26 = arith.constant 0 : index
    %367 = vector.load %arg9[%c5, %c0_25, %c0_26] : memref<8x64x192xbf16, #tpu.memory_space<vmem>>, vector<1x64x192xbf16>
    %368 = vector.shape_cast %367 : vector<1x64x192xbf16> to vector<64x192xbf16>
    %cst_27 = arith.constant dense<0.000000e+00> : vector<2x192xf32>
    %369 = tpu.matmul %366, %368, %cst_27 {dimension_numbers = #tpu.dot_dimension_numbers<[1], [0], [0], [1], [0, 0, 1, 1], [], []>} : vector<2x64xbf16>, vector<64x192xbf16>, vector<2x192xf32> -> vector<2x192xf32>
    %370 = arith.addf %364, %369 : vector<2x192xf32>
    %371 = vector.extract_strided_slice %335 {offsets = [0, 6, 0], sizes = [2, 1, 64], strides = [1, 1, 1]} : vector<2x8x64xbf16> to vector<2x1x64xbf16>
    %372 = vector.shape_cast %371 : vector<2x1x64xbf16> to vector<2x64xbf16>
    %c6 = arith.constant 6 : index
    %c0_28 = arith.constant 0 : index
    %c0_29 = arith.constant 0 : index
    %373 = vector.load %arg9[%c6, %c0_28, %c0_29] : memref<8x64x192xbf16, #tpu.memory_space<vmem>>, vector<1x64x192xbf16>
    %374 = vector.shape_cast %373 : vector<1x64x192xbf16> to vector<64x192xbf16>
    %cst_30 = arith.constant dense<0.000000e+00> : vector<2x192xf32>
    %375 = tpu.matmul %372, %374, %cst_30 {dimension_numbers = #tpu.dot_dimension_numbers<[1], [0], [0], [1], [0, 0, 1, 1], [], []>} : vector<2x64xbf16>, vector<64x192xbf16>, vector<2x192xf32> -> vector<2x192xf32>
    %376 = arith.addf %370, %375 : vector<2x192xf32>
    %377 = vector.extract_strided_slice %335 {offsets = [0, 7, 0], sizes = [2, 1, 64], strides = [1, 1, 1]} : vector<2x8x64xbf16> to vector<2x1x64xbf16>
    %378 = vector.shape_cast %377 : vector<2x1x64xbf16> to vector<2x64xbf16>
    %c7 = arith.constant 7 : index
    %c0_31 = arith.constant 0 : index
    %c0_32 = arith.constant 0 : index
    %379 = vector.load %arg9[%c7, %c0_31, %c0_32] : memref<8x64x192xbf16, #tpu.memory_space<vmem>>, vector<1x64x192xbf16>
    %380 = vector.shape_cast %379 : vector<1x64x192xbf16> to vector<64x192xbf16>
    %cst_33 = arith.constant dense<0.000000e+00> : vector<2x192xf32>
    %381 = tpu.matmul %378, %380, %cst_33 {dimension_numbers = #tpu.dot_dimension_numbers<[1], [0], [0], [1], [0, 0, 1, 1], [], []>} : vector<2x64xbf16>, vector<64x192xbf16>, vector<2x192xf32> -> vector<2x192xf32>
    %382 = arith.addf %376, %381 : vector<2x192xf32>
    %c0_34 = arith.constant 0 : index
    %c0_35 = arith.constant 0 : index
    %383 = vector.load %arg10[%c0_34, %c0_35] : memref<1x192xf32, #tpu.memory_space<vmem>>, vector<1x192xf32>
    %384 = vector.broadcast %383 : vector<1x192xf32> to vector<2x192xf32>
    %385 = arith.addf %382, %384 : vector<2x192xf32>
    %cst_36 = arith.constant 0.000000e+00 : f32
    %386 = vector.broadcast %cst_36 : f32 to vector<2x192xf32>
    %387 = arith.cmpf ogt, %385, %386 : vector<2x192xf32>
    %cst_37 = arith.constant 0.00999999977 : f32
    %388 = vector.broadcast %cst_37 : f32 to vector<2x192xf32>
    %389 = arith.mulf %388, %385 : vector<2x192xf32>
    %390 = arith.select %387, %385, %389 : vector<2x192xi1>, vector<2x192xf32>
    %c0_38 = arith.constant 0 : index
    %c0_39 = arith.constant 0 : index
    %391 = vector.load %arg11[%c0_38, %c0_39] : memref<2x16xf32, #tpu.memory_space<vmem>>, vector<2x16xf32>
    %392 = vector.extract_strided_slice %0 {offsets = [0, 0], sizes = [2, 1], strides = [1, 1]} : vector<2x2xf32> to vector<2x1xf32>
    %393 = vector.extract_strided_slice %391 {offsets = [0, 0], sizes = [1, 16], strides = [1, 1]} : vector<2x16xf32> to vector<1x16xf32>
    %394 = vector.shape_cast %393 : vector<1x16xf32> to vector<16xf32>
    %395 = vector.shape_cast %394 : vector<16xf32> to vector<1x16xf32>
    %396 = vector.broadcast %392 : vector<2x1xf32> to vector<2x16xf32>
    %397 = vector.broadcast %395 : vector<1x16xf32> to vector<2x16xf32>
    %398 = arith.mulf %396, %397 : vector<2x16xf32>
    %399 = vector.extract_strided_slice %0 {offsets = [0, 1], sizes = [2, 1], strides = [1, 1]} : vector<2x2xf32> to vector<2x1xf32>
    %400 = vector.extract_strided_slice %391 {offsets = [1, 0], sizes = [1, 16], strides = [1, 1]} : vector<2x16xf32> to vector<1x16xf32>
    %401 = vector.shape_cast %400 : vector<1x16xf32> to vector<16xf32>
    %402 = vector.shape_cast %401 : vector<16xf32> to vector<1x16xf32>
    %403 = vector.broadcast %399 : vector<2x1xf32> to vector<2x16xf32>
    %404 = vector.broadcast %402 : vector<1x16xf32> to vector<2x16xf32>
    %405 = arith.mulf %403, %404 : vector<2x16xf32>
    %406 = arith.addf %398, %405 : vector<2x16xf32>
    %c0_40 = arith.constant 0 : index
    %c0_41 = arith.constant 0 : index
    %407 = vector.load %arg12[%c0_40, %c0_41] : memref<1x16xf32, #tpu.memory_space<vmem>>, vector<1x16xf32>
    %408 = vector.broadcast %407 : vector<1x16xf32> to vector<2x16xf32>
    %409 = arith.addf %406, %408 : vector<2x16xf32>
    %cst_42 = arith.constant 0.000000e+00 : f32
    %410 = vector.broadcast %cst_42 : f32 to vector<2x16xf32>
    %411 = arith.cmpf ogt, %409, %410 : vector<2x16xf32>
    %cst_43 = arith.constant 0.00999999977 : f32
    %412 = vector.broadcast %cst_43 : f32 to vector<2x16xf32>
    %413 = arith.mulf %412, %409 : vector<2x16xf32>
    %414 = arith.select %411, %409, %413 : vector<2x16xi1>, vector<2x16xf32>
    %c0_44 = arith.constant 0 : index
    %c0_45 = arith.constant 0 : index
    %415 = vector.load %arg13[%c0_44, %c0_45] : memref<16x8xf32, #tpu.memory_space<vmem>>, vector<16x8xf32>
    %416 = vector.extract_strided_slice %414 {offsets = [0, 0], sizes = [2, 1], strides = [1, 1]} : vector<2x16xf32> to vector<2x1xf32>
    %417 = vector.extract_strided_slice %415 {offsets = [0, 0], sizes = [1, 8], strides = [1, 1]} : vector<16x8xf32> to vector<1x8xf32>
    %418 = vector.shape_cast %417 : vector<1x8xf32> to vector<8xf32>
    %419 = vector.shape_cast %418 : vector<8xf32> to vector<1x8xf32>
    %420 = vector.broadcast %416 : vector<2x1xf32> to vector<2x8xf32>
    %421 = vector.broadcast %419 : vector<1x8xf32> to vector<2x8xf32>
    %422 = arith.mulf %420, %421 : vector<2x8xf32>
    %423 = vector.extract_strided_slice %414 {offsets = [0, 1], sizes = [2, 1], strides = [1, 1]} : vector<2x16xf32> to vector<2x1xf32>
    %424 = vector.extract_strided_slice %415 {offsets = [1, 0], sizes = [1, 8], strides = [1, 1]} : vector<16x8xf32> to vector<1x8xf32>
    %425 = vector.shape_cast %424 : vector<1x8xf32> to vector<8xf32>
    %426 = vector.shape_cast %425 : vector<8xf32> to vector<1x8xf32>
    %427 = vector.broadcast %423 : vector<2x1xf32> to vector<2x8xf32>
    %428 = vector.broadcast %426 : vector<1x8xf32> to vector<2x8xf32>
    %429 = arith.mulf %427, %428 : vector<2x8xf32>
    %430 = arith.addf %422, %429 : vector<2x8xf32>
    %431 = vector.extract_strided_slice %414 {offsets = [0, 2], sizes = [2, 1], strides = [1, 1]} : vector<2x16xf32> to vector<2x1xf32>
    %432 = vector.extract_strided_slice %415 {offsets = [2, 0], sizes = [1, 8], strides = [1, 1]} : vector<16x8xf32> to vector<1x8xf32>
    %433 = vector.shape_cast %432 : vector<1x8xf32> to vector<8xf32>
    %434 = vector.shape_cast %433 : vector<8xf32> to vector<1x8xf32>
    %435 = vector.broadcast %431 : vector<2x1xf32> to vector<2x8xf32>
    %436 = vector.broadcast %434 : vector<1x8xf32> to vector<2x8xf32>
    %437 = arith.mulf %435, %436 : vector<2x8xf32>
    %438 = arith.addf %430, %437 : vector<2x8xf32>
    %439 = vector.extract_strided_slice %414 {offsets = [0, 3], sizes = [2, 1], strides = [1, 1]} : vector<2x16xf32> to vector<2x1xf32>
    %440 = vector.extract_strided_slice %415 {offsets = [3, 0], sizes = [1, 8], strides = [1, 1]} : vector<16x8xf32> to vector<1x8xf32>
    %441 = vector.shape_cast %440 : vector<1x8xf32> to vector<8xf32>
    %442 = vector.shape_cast %441 : vector<8xf32> to vector<1x8xf32>
    %443 = vector.broadcast %439 : vector<2x1xf32> to vector<2x8xf32>
    %444 = vector.broadcast %442 : vector<1x8xf32> to vector<2x8xf32>
    %445 = arith.mulf %443, %444 : vector<2x8xf32>
    %446 = arith.addf %438, %445 : vector<2x8xf32>
    %447 = vector.extract_strided_slice %414 {offsets = [0, 4], sizes = [2, 1], strides = [1, 1]} : vector<2x16xf32> to vector<2x1xf32>
    %448 = vector.extract_strided_slice %415 {offsets = [4, 0], sizes = [1, 8], strides = [1, 1]} : vector<16x8xf32> to vector<1x8xf32>
    %449 = vector.shape_cast %448 : vector<1x8xf32> to vector<8xf32>
    %450 = vector.shape_cast %449 : vector<8xf32> to vector<1x8xf32>
    %451 = vector.broadcast %447 : vector<2x1xf32> to vector<2x8xf32>
    %452 = vector.broadcast %450 : vector<1x8xf32> to vector<2x8xf32>
    %453 = arith.mulf %451, %452 : vector<2x8xf32>
    %454 = arith.addf %446, %453 : vector<2x8xf32>
    %455 = vector.extract_strided_slice %414 {offsets = [0, 5], sizes = [2, 1], strides = [1, 1]} : vector<2x16xf32> to vector<2x1xf32>
    %456 = vector.extract_strided_slice %415 {offsets = [5, 0], sizes = [1, 8], strides = [1, 1]} : vector<16x8xf32> to vector<1x8xf32>
    %457 = vector.shape_cast %456 : vector<1x8xf32> to vector<8xf32>
    %458 = vector.shape_cast %457 : vector<8xf32> to vector<1x8xf32>
    %459 = vector.broadcast %455 : vector<2x1xf32> to vector<2x8xf32>
    %460 = vector.broadcast %458 : vector<1x8xf32> to vector<2x8xf32>
    %461 = arith.mulf %459, %460 : vector<2x8xf32>
    %462 = arith.addf %454, %461 : vector<2x8xf32>
    %463 = vector.extract_strided_slice %414 {offsets = [0, 6], sizes = [2, 1], strides = [1, 1]} : vector<2x16xf32> to vector<2x1xf32>
    %464 = vector.extract_strided_slice %415 {offsets = [6, 0], sizes = [1, 8], strides = [1, 1]} : vector<16x8xf32> to vector<1x8xf32>
    %465 = vector.shape_cast %464 : vector<1x8xf32> to vector<8xf32>
    %466 = vector.shape_cast %465 : vector<8xf32> to vector<1x8xf32>
    %467 = vector.broadcast %463 : vector<2x1xf32> to vector<2x8xf32>
    %468 = vector.broadcast %466 : vector<1x8xf32> to vector<2x8xf32>
    %469 = arith.mulf %467, %468 : vector<2x8xf32>
    %470 = arith.addf %462, %469 : vector<2x8xf32>
    %471 = vector.extract_strided_slice %414 {offsets = [0, 7], sizes = [2, 1], strides = [1, 1]} : vector<2x16xf32> to vector<2x1xf32>
    %472 = vector.extract_strided_slice %415 {offsets = [7, 0], sizes = [1, 8], strides = [1, 1]} : vector<16x8xf32> to vector<1x8xf32>
    %473 = vector.shape_cast %472 : vector<1x8xf32> to vector<8xf32>
    %474 = vector.shape_cast %473 : vector<8xf32> to vector<1x8xf32>
    %475 = vector.broadcast %471 : vector<2x1xf32> to vector<2x8xf32>
    %476 = vector.broadcast %474 : vector<1x8xf32> to vector<2x8xf32>
    %477 = arith.mulf %475, %476 : vector<2x8xf32>
    %478 = arith.addf %470, %477 : vector<2x8xf32>
    %479 = vector.extract_strided_slice %414 {offsets = [0, 8], sizes = [2, 1], strides = [1, 1]} : vector<2x16xf32> to vector<2x1xf32>
    %480 = vector.extract_strided_slice %415 {offsets = [8, 0], sizes = [1, 8], strides = [1, 1]} : vector<16x8xf32> to vector<1x8xf32>
    %481 = vector.shape_cast %480 : vector<1x8xf32> to vector<8xf32>
    %482 = vector.shape_cast %481 : vector<8xf32> to vector<1x8xf32>
    %483 = vector.broadcast %479 : vector<2x1xf32> to vector<2x8xf32>
    %484 = vector.broadcast %482 : vector<1x8xf32> to vector<2x8xf32>
    %485 = arith.mulf %483, %484 : vector<2x8xf32>
    %486 = arith.addf %478, %485 : vector<2x8xf32>
    %487 = vector.extract_strided_slice %414 {offsets = [0, 9], sizes = [2, 1], strides = [1, 1]} : vector<2x16xf32> to vector<2x1xf32>
    %488 = vector.extract_strided_slice %415 {offsets = [9, 0], sizes = [1, 8], strides = [1, 1]} : vector<16x8xf32> to vector<1x8xf32>
    %489 = vector.shape_cast %488 : vector<1x8xf32> to vector<8xf32>
    %490 = vector.shape_cast %489 : vector<8xf32> to vector<1x8xf32>
    %491 = vector.broadcast %487 : vector<2x1xf32> to vector<2x8xf32>
    %492 = vector.broadcast %490 : vector<1x8xf32> to vector<2x8xf32>
    %493 = arith.mulf %491, %492 : vector<2x8xf32>
    %494 = arith.addf %486, %493 : vector<2x8xf32>
    %495 = vector.extract_strided_slice %414 {offsets = [0, 10], sizes = [2, 1], strides = [1, 1]} : vector<2x16xf32> to vector<2x1xf32>
    %496 = vector.extract_strided_slice %415 {offsets = [10, 0], sizes = [1, 8], strides = [1, 1]} : vector<16x8xf32> to vector<1x8xf32>
    %497 = vector.shape_cast %496 : vector<1x8xf32> to vector<8xf32>
    %498 = vector.shape_cast %497 : vector<8xf32> to vector<1x8xf32>
    %499 = vector.broadcast %495 : vector<2x1xf32> to vector<2x8xf32>
    %500 = vector.broadcast %498 : vector<1x8xf32> to vector<2x8xf32>
    %501 = arith.mulf %499, %500 : vector<2x8xf32>
    %502 = arith.addf %494, %501 : vector<2x8xf32>
    %503 = vector.extract_strided_slice %414 {offsets = [0, 11], sizes = [2, 1], strides = [1, 1]} : vector<2x16xf32> to vector<2x1xf32>
    %504 = vector.extract_strided_slice %415 {offsets = [11, 0], sizes = [1, 8], strides = [1, 1]} : vector<16x8xf32> to vector<1x8xf32>
    %505 = vector.shape_cast %504 : vector<1x8xf32> to vector<8xf32>
    %506 = vector.shape_cast %505 : vector<8xf32> to vector<1x8xf32>
    %507 = vector.broadcast %503 : vector<2x1xf32> to vector<2x8xf32>
    %508 = vector.broadcast %506 : vector<1x8xf32> to vector<2x8xf32>
    %509 = arith.mulf %507, %508 : vector<2x8xf32>
    %510 = arith.addf %502, %509 : vector<2x8xf32>
    %511 = vector.extract_strided_slice %414 {offsets = [0, 12], sizes = [2, 1], strides = [1, 1]} : vector<2x16xf32> to vector<2x1xf32>
    %512 = vector.extract_strided_slice %415 {offsets = [12, 0], sizes = [1, 8], strides = [1, 1]} : vector<16x8xf32> to vector<1x8xf32>
    %513 = vector.shape_cast %512 : vector<1x8xf32> to vector<8xf32>
    %514 = vector.shape_cast %513 : vector<8xf32> to vector<1x8xf32>
    %515 = vector.broadcast %511 : vector<2x1xf32> to vector<2x8xf32>
    %516 = vector.broadcast %514 : vector<1x8xf32> to vector<2x8xf32>
    %517 = arith.mulf %515, %516 : vector<2x8xf32>
    %518 = arith.addf %510, %517 : vector<2x8xf32>
    %519 = vector.extract_strided_slice %414 {offsets = [0, 13], sizes = [2, 1], strides = [1, 1]} : vector<2x16xf32> to vector<2x1xf32>
    %520 = vector.extract_strided_slice %415 {offsets = [13, 0], sizes = [1, 8], strides = [1, 1]} : vector<16x8xf32> to vector<1x8xf32>
    %521 = vector.shape_cast %520 : vector<1x8xf32> to vector<8xf32>
    %522 = vector.shape_cast %521 : vector<8xf32> to vector<1x8xf32>
    %523 = vector.broadcast %519 : vector<2x1xf32> to vector<2x8xf32>
    %524 = vector.broadcast %522 : vector<1x8xf32> to vector<2x8xf32>
    %525 = arith.mulf %523, %524 : vector<2x8xf32>
    %526 = arith.addf %518, %525 : vector<2x8xf32>
    %527 = vector.extract_strided_slice %414 {offsets = [0, 14], sizes = [2, 1], strides = [1, 1]} : vector<2x16xf32> to vector<2x1xf32>
    %528 = vector.extract_strided_slice %415 {offsets = [14, 0], sizes = [1, 8], strides = [1, 1]} : vector<16x8xf32> to vector<1x8xf32>
    %529 = vector.shape_cast %528 : vector<1x8xf32> to vector<8xf32>
    %530 = vector.shape_cast %529 : vector<8xf32> to vector<1x8xf32>
    %531 = vector.broadcast %527 : vector<2x1xf32> to vector<2x8xf32>
    %532 = vector.broadcast %530 : vector<1x8xf32> to vector<2x8xf32>
    %533 = arith.mulf %531, %532 : vector<2x8xf32>
    %534 = arith.addf %526, %533 : vector<2x8xf32>
    %535 = vector.extract_strided_slice %414 {offsets = [0, 15], sizes = [2, 1], strides = [1, 1]} : vector<2x16xf32> to vector<2x1xf32>
    %536 = vector.extract_strided_slice %415 {offsets = [15, 0], sizes = [1, 8], strides = [1, 1]} : vector<16x8xf32> to vector<1x8xf32>
    %537 = vector.shape_cast %536 : vector<1x8xf32> to vector<8xf32>
    %538 = vector.shape_cast %537 : vector<8xf32> to vector<1x8xf32>
    %539 = vector.broadcast %535 : vector<2x1xf32> to vector<2x8xf32>
    %540 = vector.broadcast %538 : vector<1x8xf32> to vector<2x8xf32>
    %541 = arith.mulf %539, %540 : vector<2x8xf32>
    %542 = arith.addf %534, %541 : vector<2x8xf32>
    %c0_46 = arith.constant 0 : index
    %c0_47 = arith.constant 0 : index
    %543 = vector.load %arg14[%c0_46, %c0_47] : memref<1x8xf32, #tpu.memory_space<vmem>>, vector<1x8xf32>
    %544 = vector.broadcast %543 : vector<1x8xf32> to vector<2x8xf32>
    %545 = arith.addf %542, %544 : vector<2x8xf32>
    %cst_48 = arith.constant 0.000000e+00 : f32
    %546 = vector.broadcast %cst_48 : f32 to vector<2x8xf32>
    %547 = arith.cmpf ogt, %545, %546 : vector<2x8xf32>
    %cst_49 = arith.constant 0.00999999977 : f32
    %548 = vector.broadcast %cst_49 : f32 to vector<2x8xf32>
    %549 = arith.mulf %548, %545 : vector<2x8xf32>
    %550 = arith.select %547, %545, %549 : vector<2x8xi1>, vector<2x8xf32>
    %c0_50 = arith.constant 0 : index
    %c0_51 = arith.constant 0 : index
    %c0_52 = arith.constant 0 : index
    %551 = vector.load %arg3[%c0_50, %c0_51, %c0_52] : memref<2x5x3xf32, #tpu.memory_space<vmem>>, vector<2x5x3xf32>
    %c0_53 = arith.constant 0 : index
    %c0_54 = arith.constant 0 : index
    %552 = vector.load %arg4[%c0_53, %c0_54] : memref<2x5xf32, #tpu.memory_space<vmem>>, vector<2x5xf32>
    %c0_55 = arith.constant 0 : index
    %c0_56 = arith.constant 0 : index
    %553 = vector.load %arg17[%c0_55, %c0_56] : memref<2x3xf32, #tpu.memory_space<vmem>>, vector<2x3xf32>
    %554 = vector.extract_strided_slice %0 {offsets = [0, 0], sizes = [2, 1], strides = [1, 1]} : vector<2x2xf32> to vector<2x1xf32>
    %555 = vector.extract_strided_slice %553 {offsets = [0, 0], sizes = [1, 3], strides = [1, 1]} : vector<2x3xf32> to vector<1x3xf32>
    %556 = vector.shape_cast %555 : vector<1x3xf32> to vector<3xf32>
    %557 = vector.shape_cast %556 : vector<3xf32> to vector<1x3xf32>
    %558 = vector.broadcast %554 : vector<2x1xf32> to vector<2x3xf32>
    %559 = vector.broadcast %557 : vector<1x3xf32> to vector<2x3xf32>
    %560 = arith.mulf %558, %559 : vector<2x3xf32>
    %561 = vector.extract_strided_slice %0 {offsets = [0, 1], sizes = [2, 1], strides = [1, 1]} : vector<2x2xf32> to vector<2x1xf32>
    %562 = vector.extract_strided_slice %553 {offsets = [1, 0], sizes = [1, 3], strides = [1, 1]} : vector<2x3xf32> to vector<1x3xf32>
    %563 = vector.shape_cast %562 : vector<1x3xf32> to vector<3xf32>
    %564 = vector.shape_cast %563 : vector<3xf32> to vector<1x3xf32>
    %565 = vector.broadcast %561 : vector<2x1xf32> to vector<2x3xf32>
    %566 = vector.broadcast %564 : vector<1x3xf32> to vector<2x3xf32>
    %567 = arith.mulf %565, %566 : vector<2x3xf32>
    %568 = arith.addf %560, %567 : vector<2x3xf32>
    %c0_57 = arith.constant 0 : index
    %c0_58 = arith.constant 0 : index
    %569 = vector.load %arg18[%c0_57, %c0_58] : memref<1x3xf32, #tpu.memory_space<vmem>>, vector<1x3xf32>
    %570 = vector.broadcast %569 : vector<1x3xf32> to vector<2x3xf32>
    %571 = arith.addf %568, %570 : vector<2x3xf32>
    %c0_59 = arith.constant 0 : index
    %c0_60 = arith.constant 0 : index
    %572 = vector.load %arg19[%c0_59, %c0_60] : memref<3x64xf32, #tpu.memory_space<vmem>>, vector<3x64xf32>
    %573 = vector.extract_strided_slice %571 {offsets = [0, 0], sizes = [2, 1], strides = [1, 1]} : vector<2x3xf32> to vector<2x1xf32>
    %574 = vector.extract_strided_slice %572 {offsets = [0, 0], sizes = [1, 64], strides = [1, 1]} : vector<3x64xf32> to vector<1x64xf32>
    %575 = vector.shape_cast %574 : vector<1x64xf32> to vector<64xf32>
    %576 = vector.shape_cast %575 : vector<64xf32> to vector<1x64xf32>
    %577 = vector.broadcast %573 : vector<2x1xf32> to vector<2x64xf32>
    %578 = vector.broadcast %576 : vector<1x64xf32> to vector<2x64xf32>
    %579 = arith.mulf %577, %578 : vector<2x64xf32>
    %580 = vector.extract_strided_slice %571 {offsets = [0, 1], sizes = [2, 1], strides = [1, 1]} : vector<2x3xf32> to vector<2x1xf32>
    %581 = vector.extract_strided_slice %572 {offsets = [1, 0], sizes = [1, 64], strides = [1, 1]} : vector<3x64xf32> to vector<1x64xf32>
    %582 = vector.shape_cast %581 : vector<1x64xf32> to vector<64xf32>
    %583 = vector.shape_cast %582 : vector<64xf32> to vector<1x64xf32>
    %584 = vector.broadcast %580 : vector<2x1xf32> to vector<2x64xf32>
    %585 = vector.broadcast %583 : vector<1x64xf32> to vector<2x64xf32>
    %586 = arith.mulf %584, %585 : vector<2x64xf32>
    %587 = arith.addf %579, %586 : vector<2x64xf32>
    %588 = vector.extract_strided_slice %571 {offsets = [0, 2], sizes = [2, 1], strides = [1, 1]} : vector<2x3xf32> to vector<2x1xf32>
    %589 = vector.extract_strided_slice %572 {offsets = [2, 0], sizes = [1, 64], strides = [1, 1]} : vector<3x64xf32> to vector<1x64xf32>
    %590 = vector.shape_cast %589 : vector<1x64xf32> to vector<64xf32>
    %591 = vector.shape_cast %590 : vector<64xf32> to vector<1x64xf32>
    %592 = vector.broadcast %588 : vector<2x1xf32> to vector<2x64xf32>
    %593 = vector.broadcast %591 : vector<1x64xf32> to vector<2x64xf32>
    %594 = arith.mulf %592, %593 : vector<2x64xf32>
    %595 = arith.addf %587, %594 : vector<2x64xf32>
    %c0_61 = arith.constant 0 : index
    %c0_62 = arith.constant 0 : index
    %596 = vector.load %arg20[%c0_61, %c0_62] : memref<1x64xf32, #tpu.memory_space<vmem>>, vector<1x64xf32>
    %597 = vector.broadcast %596 : vector<1x64xf32> to vector<2x64xf32>
    %598 = arith.addf %595, %597 : vector<2x64xf32>
    %c0_63 = arith.constant 0 : index
    %c0_64 = arith.constant 0 : index
    %599 = vector.load %arg21[%c0_63, %c0_64] : memref<3x64xf32, #tpu.memory_space<vmem>>, vector<3x64xf32>
    %c0_65 = arith.constant 0 : index
    %c0_66 = arith.constant 0 : index
    %600 = vector.load %arg23[%c0_65, %c0_66] : memref<3x64xf32, #tpu.memory_space<vmem>>, vector<3x64xf32>
    %601 = vector.extract_strided_slice %551 {offsets = [0, 0, 0], sizes = [2, 5, 1], strides = [1, 1, 1]} : vector<2x5x3xf32> to vector<2x5x1xf32>
    %602 = vector.extract_strided_slice %599 {offsets = [0, 0], sizes = [1, 64], strides = [1, 1]} : vector<3x64xf32> to vector<1x64xf32>
    %603 = vector.shape_cast %602 : vector<1x64xf32> to vector<64xf32>
    %604 = vector.shape_cast %603 : vector<64xf32> to vector<1x1x64xf32>
    %605 = vector.broadcast %601 : vector<2x5x1xf32> to vector<2x5x64xf32>
    %606 = vector.broadcast %604 : vector<1x1x64xf32> to vector<2x5x64xf32>
    %607 = arith.mulf %605, %606 : vector<2x5x64xf32>
    %608 = vector.extract_strided_slice %551 {offsets = [0, 0, 1], sizes = [2, 5, 1], strides = [1, 1, 1]} : vector<2x5x3xf32> to vector<2x5x1xf32>
    %609 = vector.extract_strided_slice %599 {offsets = [1, 0], sizes = [1, 64], strides = [1, 1]} : vector<3x64xf32> to vector<1x64xf32>
    %610 = vector.shape_cast %609 : vector<1x64xf32> to vector<64xf32>
    %611 = vector.shape_cast %610 : vector<64xf32> to vector<1x1x64xf32>
    %612 = vector.broadcast %608 : vector<2x5x1xf32> to vector<2x5x64xf32>
    %613 = vector.broadcast %611 : vector<1x1x64xf32> to vector<2x5x64xf32>
    %614 = arith.mulf %612, %613 : vector<2x5x64xf32>
    %615 = arith.addf %607, %614 : vector<2x5x64xf32>
    %616 = vector.extract_strided_slice %551 {offsets = [0, 0, 2], sizes = [2, 5, 1], strides = [1, 1, 1]} : vector<2x5x3xf32> to vector<2x5x1xf32>
    %617 = vector.extract_strided_slice %599 {offsets = [2, 0], sizes = [1, 64], strides = [1, 1]} : vector<3x64xf32> to vector<1x64xf32>
    %618 = vector.shape_cast %617 : vector<1x64xf32> to vector<64xf32>
    %619 = vector.shape_cast %618 : vector<64xf32> to vector<1x1x64xf32>
    %620 = vector.broadcast %616 : vector<2x5x1xf32> to vector<2x5x64xf32>
    %621 = vector.broadcast %619 : vector<1x1x64xf32> to vector<2x5x64xf32>
    %622 = arith.mulf %620, %621 : vector<2x5x64xf32>
    %623 = arith.addf %615, %622 : vector<2x5x64xf32>
    %c0_67 = arith.constant 0 : index
    %c0_68 = arith.constant 0 : index
    %624 = vector.load %arg22[%c0_67, %c0_68] : memref<1x64xf32, #tpu.memory_space<vmem>>, vector<1x64xf32>
    %625 = vector.shape_cast %624 : vector<1x64xf32> to vector<1x1x64xf32>
    %626 = vector.broadcast %625 : vector<1x1x64xf32> to vector<2x5x64xf32>
    %627 = arith.addf %623, %626 : vector<2x5x64xf32>
    %628 = vector.extract_strided_slice %551 {offsets = [0, 0, 0], sizes = [2, 5, 1], strides = [1, 1, 1]} : vector<2x5x3xf32> to vector<2x5x1xf32>
    %629 = vector.extract_strided_slice %600 {offsets = [0, 0], sizes = [1, 64], strides = [1, 1]} : vector<3x64xf32> to vector<1x64xf32>
    %630 = vector.shape_cast %629 : vector<1x64xf32> to vector<64xf32>
    %631 = vector.shape_cast %630 : vector<64xf32> to vector<1x1x64xf32>
    %632 = vector.broadcast %628 : vector<2x5x1xf32> to vector<2x5x64xf32>
    %633 = vector.broadcast %631 : vector<1x1x64xf32> to vector<2x5x64xf32>
    %634 = arith.mulf %632, %633 : vector<2x5x64xf32>
    %635 = vector.extract_strided_slice %551 {offsets = [0, 0, 1], sizes = [2, 5, 1], strides = [1, 1, 1]} : vector<2x5x3xf32> to vector<2x5x1xf32>
    %636 = vector.extract_strided_slice %600 {offsets = [1, 0], sizes = [1, 64], strides = [1, 1]} : vector<3x64xf32> to vector<1x64xf32>
    %637 = vector.shape_cast %636 : vector<1x64xf32> to vector<64xf32>
    %638 = vector.shape_cast %637 : vector<64xf32> to vector<1x1x64xf32>
    %639 = vector.broadcast %635 : vector<2x5x1xf32> to vector<2x5x64xf32>
    %640 = vector.broadcast %638 : vector<1x1x64xf32> to vector<2x5x64xf32>
    %641 = arith.mulf %639, %640 : vector<2x5x64xf32>
    %642 = arith.addf %634, %641 : vector<2x5x64xf32>
    %643 = vector.extract_strided_slice %551 {offsets = [0, 0, 2], sizes = [2, 5, 1], strides = [1, 1, 1]} : vector<2x5x3xf32> to vector<2x5x1xf32>
    %644 = vector.extract_strided_slice %600 {offsets = [2, 0], sizes = [1, 64], strides = [1, 1]} : vector<3x64xf32> to vector<1x64xf32>
    %645 = vector.shape_cast %644 : vector<1x64xf32> to vector<64xf32>
    %646 = vector.shape_cast %645 : vector<64xf32> to vector<1x1x64xf32>
    %647 = vector.broadcast %643 : vector<2x5x1xf32> to vector<2x5x64xf32>
    %648 = vector.broadcast %646 : vector<1x1x64xf32> to vector<2x5x64xf32>
    %649 = arith.mulf %647, %648 : vector<2x5x64xf32>
    %650 = arith.addf %642, %649 : vector<2x5x64xf32>
    %c0_69 = arith.constant 0 : index
    %c0_70 = arith.constant 0 : index
    %651 = vector.load %arg24[%c0_69, %c0_70] : memref<1x64xf32, #tpu.memory_space<vmem>>, vector<1x64xf32>
    %652 = vector.shape_cast %651 : vector<1x64xf32> to vector<1x1x64xf32>
    %653 = vector.broadcast %652 : vector<1x1x64xf32> to vector<2x5x64xf32>
    %654 = arith.addf %650, %653 : vector<2x5x64xf32>
    %655 = vector.shape_cast %598 : vector<2x64xf32> to vector<2x1x64xf32>
    %656 = vector.broadcast %655 : vector<2x1x64xf32> to vector<2x5x64xf32>
    %657 = arith.mulf %656, %627 : vector<2x5x64xf32>
    %cst_71 = arith.constant dense<0.000000e+00> : vector<2x5xf32>
    %658 = vector.multi_reduction <add>, %657, %cst_71 [2] : vector<2x5x64xf32> to vector<2x5xf32>
    %cst_72 = arith.constant 1.250000e-01 : f32
    %659 = vector.broadcast %cst_72 : f32 to vector<2x5xf32>
    %660 = arith.mulf %658, %659 : vector<2x5xf32>
    %cst_73 = arith.constant 0.000000e+00 : f32
    %661 = vector.broadcast %cst_73 : f32 to vector<2x5xf32>
    %662 = arith.cmpf ogt, %552, %661 : vector<2x5xf32>
    %cst_74 = arith.constant -1.000000e+09 : f32
    %663 = vector.broadcast %cst_74 : f32 to vector<2x5xf32>
    %664 = arith.select %662, %660, %663 : vector<2x5xi1>, vector<2x5xf32>
    %cst_75 = arith.constant dense<0xFF800000> : vector<2xf32>
    %665 = vector.multi_reduction <maximumf>, %664, %cst_75 [1] : vector<2x5xf32> to vector<2xf32>
    %666 = vector.shape_cast %665 : vector<2xf32> to vector<2x1xf32>
    %667 = vector.broadcast %666 : vector<2x1xf32> to vector<2x5xf32>
    %668 = arith.subf %664, %667 : vector<2x5xf32>
    %669 = math.exp %668 : vector<2x5xf32>
    %cst_76 = arith.constant dense<0.000000e+00> : vector<2xf32>
    %670 = vector.multi_reduction <add>, %669, %cst_76 [1] : vector<2x5xf32> to vector<2xf32>
    %671 = vector.shape_cast %670 : vector<2xf32> to vector<2x1xf32>
    %672 = tpu.reciprocal %671 {approx = true} : vector<2x1xf32> -> vector<2x1xf32>
    %673 = vector.broadcast %672 : vector<2x1xf32> to vector<2x5xf32>
    %674 = arith.mulf %669, %673 : vector<2x5xf32>
    %675 = vector.shape_cast %674 : vector<2x5xf32> to vector<2x5x1xf32>
    %676 = vector.broadcast %675 : vector<2x5x1xf32> to vector<2x5x64xf32>
    %677 = arith.mulf %676, %654 : vector<2x5x64xf32>
    %cst_77 = arith.constant dense<0.000000e+00> : vector<2x64xf32>
    %678 = vector.multi_reduction <add>, %677, %cst_77 [1] : vector<2x5x64xf32> to vector<2x64xf32>
    %c0_78 = arith.constant 0 : index
    %c0_79 = arith.constant 0 : index
    %c0_80 = arith.constant 0 : index
    %679 = vector.load %arg5[%c0_78, %c0_79, %c0_80] : memref<2x6x3xf32, #tpu.memory_space<vmem>>, vector<2x6x3xf32>
    %c0_81 = arith.constant 0 : index
    %c0_82 = arith.constant 0 : index
    %680 = vector.load %arg6[%c0_81, %c0_82] : memref<2x6xf32, #tpu.memory_space<vmem>>, vector<2x6xf32>
    %c0_83 = arith.constant 0 : index
    %c0_84 = arith.constant 0 : index
    %681 = vector.load %arg26[%c0_83, %c0_84] : memref<2x3xf32, #tpu.memory_space<vmem>>, vector<2x3xf32>
    %682 = vector.extract_strided_slice %0 {offsets = [0, 0], sizes = [2, 1], strides = [1, 1]} : vector<2x2xf32> to vector<2x1xf32>
    %683 = vector.extract_strided_slice %681 {offsets = [0, 0], sizes = [1, 3], strides = [1, 1]} : vector<2x3xf32> to vector<1x3xf32>
    %684 = vector.shape_cast %683 : vector<1x3xf32> to vector<3xf32>
    %685 = vector.shape_cast %684 : vector<3xf32> to vector<1x3xf32>
    %686 = vector.broadcast %682 : vector<2x1xf32> to vector<2x3xf32>
    %687 = vector.broadcast %685 : vector<1x3xf32> to vector<2x3xf32>
    %688 = arith.mulf %686, %687 : vector<2x3xf32>
    %689 = vector.extract_strided_slice %0 {offsets = [0, 1], sizes = [2, 1], strides = [1, 1]} : vector<2x2xf32> to vector<2x1xf32>
    %690 = vector.extract_strided_slice %681 {offsets = [1, 0], sizes = [1, 3], strides = [1, 1]} : vector<2x3xf32> to vector<1x3xf32>
    %691 = vector.shape_cast %690 : vector<1x3xf32> to vector<3xf32>
    %692 = vector.shape_cast %691 : vector<3xf32> to vector<1x3xf32>
    %693 = vector.broadcast %689 : vector<2x1xf32> to vector<2x3xf32>
    %694 = vector.broadcast %692 : vector<1x3xf32> to vector<2x3xf32>
    %695 = arith.mulf %693, %694 : vector<2x3xf32>
    %696 = arith.addf %688, %695 : vector<2x3xf32>
    %c0_85 = arith.constant 0 : index
    %c0_86 = arith.constant 0 : index
    %697 = vector.load %arg27[%c0_85, %c0_86] : memref<1x3xf32, #tpu.memory_space<vmem>>, vector<1x3xf32>
    %698 = vector.broadcast %697 : vector<1x3xf32> to vector<2x3xf32>
    %699 = arith.addf %696, %698 : vector<2x3xf32>
    %c0_87 = arith.constant 0 : index
    %c0_88 = arith.constant 0 : index
    %700 = vector.load %arg28[%c0_87, %c0_88] : memref<3x64xf32, #tpu.memory_space<vmem>>, vector<3x64xf32>
    %701 = vector.extract_strided_slice %699 {offsets = [0, 0], sizes = [2, 1], strides = [1, 1]} : vector<2x3xf32> to vector<2x1xf32>
    %702 = vector.extract_strided_slice %700 {offsets = [0, 0], sizes = [1, 64], strides = [1, 1]} : vector<3x64xf32> to vector<1x64xf32>
    %703 = vector.shape_cast %702 : vector<1x64xf32> to vector<64xf32>
    %704 = vector.shape_cast %703 : vector<64xf32> to vector<1x64xf32>
    %705 = vector.broadcast %701 : vector<2x1xf32> to vector<2x64xf32>
    %706 = vector.broadcast %704 : vector<1x64xf32> to vector<2x64xf32>
    %707 = arith.mulf %705, %706 : vector<2x64xf32>
    %708 = vector.extract_strided_slice %699 {offsets = [0, 1], sizes = [2, 1], strides = [1, 1]} : vector<2x3xf32> to vector<2x1xf32>
    %709 = vector.extract_strided_slice %700 {offsets = [1, 0], sizes = [1, 64], strides = [1, 1]} : vector<3x64xf32> to vector<1x64xf32>
    %710 = vector.shape_cast %709 : vector<1x64xf32> to vector<64xf32>
    %711 = vector.shape_cast %710 : vector<64xf32> to vector<1x64xf32>
    %712 = vector.broadcast %708 : vector<2x1xf32> to vector<2x64xf32>
    %713 = vector.broadcast %711 : vector<1x64xf32> to vector<2x64xf32>
    %714 = arith.mulf %712, %713 : vector<2x64xf32>
    %715 = arith.addf %707, %714 : vector<2x64xf32>
    %716 = vector.extract_strided_slice %699 {offsets = [0, 2], sizes = [2, 1], strides = [1, 1]} : vector<2x3xf32> to vector<2x1xf32>
    %717 = vector.extract_strided_slice %700 {offsets = [2, 0], sizes = [1, 64], strides = [1, 1]} : vector<3x64xf32> to vector<1x64xf32>
    %718 = vector.shape_cast %717 : vector<1x64xf32> to vector<64xf32>
    %719 = vector.shape_cast %718 : vector<64xf32> to vector<1x64xf32>
    %720 = vector.broadcast %716 : vector<2x1xf32> to vector<2x64xf32>
    %721 = vector.broadcast %719 : vector<1x64xf32> to vector<2x64xf32>
    %722 = arith.mulf %720, %721 : vector<2x64xf32>
    %723 = arith.addf %715, %722 : vector<2x64xf32>
    %c0_89 = arith.constant 0 : index
    %c0_90 = arith.constant 0 : index
    %724 = vector.load %arg29[%c0_89, %c0_90] : memref<1x64xf32, #tpu.memory_space<vmem>>, vector<1x64xf32>
    %725 = vector.broadcast %724 : vector<1x64xf32> to vector<2x64xf32>
    %726 = arith.addf %723, %725 : vector<2x64xf32>
    %c0_91 = arith.constant 0 : index
    %c0_92 = arith.constant 0 : index
    %727 = vector.load %arg30[%c0_91, %c0_92] : memref<3x64xf32, #tpu.memory_space<vmem>>, vector<3x64xf32>
    %c0_93 = arith.constant 0 : index
    %c0_94 = arith.constant 0 : index
    %728 = vector.load %arg32[%c0_93, %c0_94] : memref<3x64xf32, #tpu.memory_space<vmem>>, vector<3x64xf32>
    %729 = vector.extract_strided_slice %679 {offsets = [0, 0, 0], sizes = [2, 6, 1], strides = [1, 1, 1]} : vector<2x6x3xf32> to vector<2x6x1xf32>
    %730 = vector.extract_strided_slice %727 {offsets = [0, 0], sizes = [1, 64], strides = [1, 1]} : vector<3x64xf32> to vector<1x64xf32>
    %731 = vector.shape_cast %730 : vector<1x64xf32> to vector<64xf32>
    %732 = vector.shape_cast %731 : vector<64xf32> to vector<1x1x64xf32>
    %733 = vector.broadcast %729 : vector<2x6x1xf32> to vector<2x6x64xf32>
    %734 = vector.broadcast %732 : vector<1x1x64xf32> to vector<2x6x64xf32>
    %735 = arith.mulf %733, %734 : vector<2x6x64xf32>
    %736 = vector.extract_strided_slice %679 {offsets = [0, 0, 1], sizes = [2, 6, 1], strides = [1, 1, 1]} : vector<2x6x3xf32> to vector<2x6x1xf32>
    %737 = vector.extract_strided_slice %727 {offsets = [1, 0], sizes = [1, 64], strides = [1, 1]} : vector<3x64xf32> to vector<1x64xf32>
    %738 = vector.shape_cast %737 : vector<1x64xf32> to vector<64xf32>
    %739 = vector.shape_cast %738 : vector<64xf32> to vector<1x1x64xf32>
    %740 = vector.broadcast %736 : vector<2x6x1xf32> to vector<2x6x64xf32>
    %741 = vector.broadcast %739 : vector<1x1x64xf32> to vector<2x6x64xf32>
    %742 = arith.mulf %740, %741 : vector<2x6x64xf32>
    %743 = arith.addf %735, %742 : vector<2x6x64xf32>
    %744 = vector.extract_strided_slice %679 {offsets = [0, 0, 2], sizes = [2, 6, 1], strides = [1, 1, 1]} : vector<2x6x3xf32> to vector<2x6x1xf32>
    %745 = vector.extract_strided_slice %727 {offsets = [2, 0], sizes = [1, 64], strides = [1, 1]} : vector<3x64xf32> to vector<1x64xf32>
    %746 = vector.shape_cast %745 : vector<1x64xf32> to vector<64xf32>
    %747 = vector.shape_cast %746 : vector<64xf32> to vector<1x1x64xf32>
    %748 = vector.broadcast %744 : vector<2x6x1xf32> to vector<2x6x64xf32>
    %749 = vector.broadcast %747 : vector<1x1x64xf32> to vector<2x6x64xf32>
    %750 = arith.mulf %748, %749 : vector<2x6x64xf32>
    %751 = arith.addf %743, %750 : vector<2x6x64xf32>
    %c0_95 = arith.constant 0 : index
    %c0_96 = arith.constant 0 : index
    %752 = vector.load %arg31[%c0_95, %c0_96] : memref<1x64xf32, #tpu.memory_space<vmem>>, vector<1x64xf32>
    %753 = vector.shape_cast %752 : vector<1x64xf32> to vector<1x1x64xf32>
    %754 = vector.broadcast %753 : vector<1x1x64xf32> to vector<2x6x64xf32>
    %755 = arith.addf %751, %754 : vector<2x6x64xf32>
    %756 = vector.extract_strided_slice %679 {offsets = [0, 0, 0], sizes = [2, 6, 1], strides = [1, 1, 1]} : vector<2x6x3xf32> to vector<2x6x1xf32>
    %757 = vector.extract_strided_slice %728 {offsets = [0, 0], sizes = [1, 64], strides = [1, 1]} : vector<3x64xf32> to vector<1x64xf32>
    %758 = vector.shape_cast %757 : vector<1x64xf32> to vector<64xf32>
    %759 = vector.shape_cast %758 : vector<64xf32> to vector<1x1x64xf32>
    %760 = vector.broadcast %756 : vector<2x6x1xf32> to vector<2x6x64xf32>
    %761 = vector.broadcast %759 : vector<1x1x64xf32> to vector<2x6x64xf32>
    %762 = arith.mulf %760, %761 : vector<2x6x64xf32>
    %763 = vector.extract_strided_slice %679 {offsets = [0, 0, 1], sizes = [2, 6, 1], strides = [1, 1, 1]} : vector<2x6x3xf32> to vector<2x6x1xf32>
    %764 = vector.extract_strided_slice %728 {offsets = [1, 0], sizes = [1, 64], strides = [1, 1]} : vector<3x64xf32> to vector<1x64xf32>
    %765 = vector.shape_cast %764 : vector<1x64xf32> to vector<64xf32>
    %766 = vector.shape_cast %765 : vector<64xf32> to vector<1x1x64xf32>
    %767 = vector.broadcast %763 : vector<2x6x1xf32> to vector<2x6x64xf32>
    %768 = vector.broadcast %766 : vector<1x1x64xf32> to vector<2x6x64xf32>
    %769 = arith.mulf %767, %768 : vector<2x6x64xf32>
    %770 = arith.addf %762, %769 : vector<2x6x64xf32>
    %771 = vector.extract_strided_slice %679 {offsets = [0, 0, 2], sizes = [2, 6, 1], strides = [1, 1, 1]} : vector<2x6x3xf32> to vector<2x6x1xf32>
    %772 = vector.extract_strided_slice %728 {offsets = [2, 0], sizes = [1, 64], strides = [1, 1]} : vector<3x64xf32> to vector<1x64xf32>
    %773 = vector.shape_cast %772 : vector<1x64xf32> to vector<64xf32>
    %774 = vector.shape_cast %773 : vector<64xf32> to vector<1x1x64xf32>
    %775 = vector.broadcast %771 : vector<2x6x1xf32> to vector<2x6x64xf32>
    %776 = vector.broadcast %774 : vector<1x1x64xf32> to vector<2x6x64xf32>
    %777 = arith.mulf %775, %776 : vector<2x6x64xf32>
    %778 = arith.addf %770, %777 : vector<2x6x64xf32>
    %c0_97 = arith.constant 0 : index
    %c0_98 = arith.constant 0 : index
    %779 = vector.load %arg33[%c0_97, %c0_98] : memref<1x64xf32, #tpu.memory_space<vmem>>, vector<1x64xf32>
    %780 = vector.shape_cast %779 : vector<1x64xf32> to vector<1x1x64xf32>
    %781 = vector.broadcast %780 : vector<1x1x64xf32> to vector<2x6x64xf32>
    %782 = arith.addf %778, %781 : vector<2x6x64xf32>
    %783 = vector.shape_cast %726 : vector<2x64xf32> to vector<2x1x64xf32>
    %784 = vector.broadcast %783 : vector<2x1x64xf32> to vector<2x6x64xf32>
    %785 = arith.mulf %784, %755 : vector<2x6x64xf32>
    %cst_99 = arith.constant dense<0.000000e+00> : vector<2x6xf32>
    %786 = vector.multi_reduction <add>, %785, %cst_99 [2] : vector<2x6x64xf32> to vector<2x6xf32>
    %cst_100 = arith.constant 1.250000e-01 : f32
    %787 = vector.broadcast %cst_100 : f32 to vector<2x6xf32>
    %788 = arith.mulf %786, %787 : vector<2x6xf32>
    %cst_101 = arith.constant 0.000000e+00 : f32
    %789 = vector.broadcast %cst_101 : f32 to vector<2x6xf32>
    %790 = arith.cmpf ogt, %680, %789 : vector<2x6xf32>
    %cst_102 = arith.constant -1.000000e+09 : f32
    %791 = vector.broadcast %cst_102 : f32 to vector<2x6xf32>
    %792 = arith.select %790, %788, %791 : vector<2x6xi1>, vector<2x6xf32>
    %cst_103 = arith.constant dense<0xFF800000> : vector<2xf32>
    %793 = vector.multi_reduction <maximumf>, %792, %cst_103 [1] : vector<2x6xf32> to vector<2xf32>
    %794 = vector.shape_cast %793 : vector<2xf32> to vector<2x1xf32>
    %795 = vector.broadcast %794 : vector<2x1xf32> to vector<2x6xf32>
    %796 = arith.subf %792, %795 : vector<2x6xf32>
    %797 = math.exp %796 : vector<2x6xf32>
    %cst_104 = arith.constant dense<0.000000e+00> : vector<2xf32>
    %798 = vector.multi_reduction <add>, %797, %cst_104 [1] : vector<2x6xf32> to vector<2xf32>
    %799 = vector.shape_cast %798 : vector<2xf32> to vector<2x1xf32>
    %800 = tpu.reciprocal %799 {approx = true} : vector<2x1xf32> -> vector<2x1xf32>
    %801 = vector.broadcast %800 : vector<2x1xf32> to vector<2x6xf32>
    %802 = arith.mulf %797, %801 : vector<2x6xf32>
    %803 = vector.shape_cast %802 : vector<2x6xf32> to vector<2x6x1xf32>
    %804 = vector.broadcast %803 : vector<2x6x1xf32> to vector<2x6x64xf32>
    %805 = arith.mulf %804, %782 : vector<2x6x64xf32>
    %cst_105 = arith.constant dense<0.000000e+00> : vector<2x64xf32>
    %806 = vector.multi_reduction <add>, %805, %cst_105 [1] : vector<2x6x64xf32> to vector<2x64xf32>
    %c0_106 = arith.constant 0 : index
    %c0_107 = arith.constant 0 : index
    %807 = vector.load %arg15[%c0_106, %c0_107] : memref<8x64xf32, #tpu.memory_space<vmem>>, vector<8x64xf32>
    %808 = vector.extract_strided_slice %550 {offsets = [0, 0], sizes = [2, 1], strides = [1, 1]} : vector<2x8xf32> to vector<2x1xf32>
    %809 = vector.extract_strided_slice %807 {offsets = [0, 0], sizes = [1, 64], strides = [1, 1]} : vector<8x64xf32> to vector<1x64xf32>
    %810 = vector.shape_cast %809 : vector<1x64xf32> to vector<64xf32>
    %811 = vector.shape_cast %810 : vector<64xf32> to vector<1x64xf32>
    %812 = vector.broadcast %808 : vector<2x1xf32> to vector<2x64xf32>
    %813 = vector.broadcast %811 : vector<1x64xf32> to vector<2x64xf32>
    %814 = arith.mulf %812, %813 : vector<2x64xf32>
    %815 = vector.extract_strided_slice %550 {offsets = [0, 1], sizes = [2, 1], strides = [1, 1]} : vector<2x8xf32> to vector<2x1xf32>
    %816 = vector.extract_strided_slice %807 {offsets = [1, 0], sizes = [1, 64], strides = [1, 1]} : vector<8x64xf32> to vector<1x64xf32>
    %817 = vector.shape_cast %816 : vector<1x64xf32> to vector<64xf32>
    %818 = vector.shape_cast %817 : vector<64xf32> to vector<1x64xf32>
    %819 = vector.broadcast %815 : vector<2x1xf32> to vector<2x64xf32>
    %820 = vector.broadcast %818 : vector<1x64xf32> to vector<2x64xf32>
    %821 = arith.mulf %819, %820 : vector<2x64xf32>
    %822 = arith.addf %814, %821 : vector<2x64xf32>
    %823 = vector.extract_strided_slice %550 {offsets = [0, 2], sizes = [2, 1], strides = [1, 1]} : vector<2x8xf32> to vector<2x1xf32>
    %824 = vector.extract_strided_slice %807 {offsets = [2, 0], sizes = [1, 64], strides = [1, 1]} : vector<8x64xf32> to vector<1x64xf32>
    %825 = vector.shape_cast %824 : vector<1x64xf32> to vector<64xf32>
    %826 = vector.shape_cast %825 : vector<64xf32> to vector<1x64xf32>
    %827 = vector.broadcast %823 : vector<2x1xf32> to vector<2x64xf32>
    %828 = vector.broadcast %826 : vector<1x64xf32> to vector<2x64xf32>
    %829 = arith.mulf %827, %828 : vector<2x64xf32>
    %830 = arith.addf %822, %829 : vector<2x64xf32>
    %831 = vector.extract_strided_slice %550 {offsets = [0, 3], sizes = [2, 1], strides = [1, 1]} : vector<2x8xf32> to vector<2x1xf32>
    %832 = vector.extract_strided_slice %807 {offsets = [3, 0], sizes = [1, 64], strides = [1, 1]} : vector<8x64xf32> to vector<1x64xf32>
    %833 = vector.shape_cast %832 : vector<1x64xf32> to vector<64xf32>
    %834 = vector.shape_cast %833 : vector<64xf32> to vector<1x64xf32>
    %835 = vector.broadcast %831 : vector<2x1xf32> to vector<2x64xf32>
    %836 = vector.broadcast %834 : vector<1x64xf32> to vector<2x64xf32>
    %837 = arith.mulf %835, %836 : vector<2x64xf32>
    %838 = arith.addf %830, %837 : vector<2x64xf32>
    %839 = vector.extract_strided_slice %550 {offsets = [0, 4], sizes = [2, 1], strides = [1, 1]} : vector<2x8xf32> to vector<2x1xf32>
    %840 = vector.extract_strided_slice %807 {offsets = [4, 0], sizes = [1, 64], strides = [1, 1]} : vector<8x64xf32> to vector<1x64xf32>
    %841 = vector.shape_cast %840 : vector<1x64xf32> to vector<64xf32>
    %842 = vector.shape_cast %841 : vector<64xf32> to vector<1x64xf32>
    %843 = vector.broadcast %839 : vector<2x1xf32> to vector<2x64xf32>
    %844 = vector.broadcast %842 : vector<1x64xf32> to vector<2x64xf32>
    %845 = arith.mulf %843, %844 : vector<2x64xf32>
    %846 = arith.addf %838, %845 : vector<2x64xf32>
    %847 = vector.extract_strided_slice %550 {offsets = [0, 5], sizes = [2, 1], strides = [1, 1]} : vector<2x8xf32> to vector<2x1xf32>
    %848 = vector.extract_strided_slice %807 {offsets = [5, 0], sizes = [1, 64], strides = [1, 1]} : vector<8x64xf32> to vector<1x64xf32>
    %849 = vector.shape_cast %848 : vector<1x64xf32> to vector<64xf32>
    %850 = vector.shape_cast %849 : vector<64xf32> to vector<1x64xf32>
    %851 = vector.broadcast %847 : vector<2x1xf32> to vector<2x64xf32>
    %852 = vector.broadcast %850 : vector<1x64xf32> to vector<2x64xf32>
    %853 = arith.mulf %851, %852 : vector<2x64xf32>
    %854 = arith.addf %846, %853 : vector<2x64xf32>
    %855 = vector.extract_strided_slice %550 {offsets = [0, 6], sizes = [2, 1], strides = [1, 1]} : vector<2x8xf32> to vector<2x1xf32>
    %856 = vector.extract_strided_slice %807 {offsets = [6, 0], sizes = [1, 64], strides = [1, 1]} : vector<8x64xf32> to vector<1x64xf32>
    %857 = vector.shape_cast %856 : vector<1x64xf32> to vector<64xf32>
    %858 = vector.shape_cast %857 : vector<64xf32> to vector<1x64xf32>
    %859 = vector.broadcast %855 : vector<2x1xf32> to vector<2x64xf32>
    %860 = vector.broadcast %858 : vector<1x64xf32> to vector<2x64xf32>
    %861 = arith.mulf %859, %860 : vector<2x64xf32>
    %862 = arith.addf %854, %861 : vector<2x64xf32>
    %863 = vector.extract_strided_slice %550 {offsets = [0, 7], sizes = [2, 1], strides = [1, 1]} : vector<2x8xf32> to vector<2x1xf32>
    %864 = vector.extract_strided_slice %807 {offsets = [7, 0], sizes = [1, 64], strides = [1, 1]} : vector<8x64xf32> to vector<1x64xf32>
    %865 = vector.shape_cast %864 : vector<1x64xf32> to vector<64xf32>
    %866 = vector.shape_cast %865 : vector<64xf32> to vector<1x64xf32>
    %867 = vector.broadcast %863 : vector<2x1xf32> to vector<2x64xf32>
    %868 = vector.broadcast %866 : vector<1x64xf32> to vector<2x64xf32>
    %869 = arith.mulf %867, %868 : vector<2x64xf32>
    %870 = arith.addf %862, %869 : vector<2x64xf32>
    %871 = arith.truncf %390 : vector<2x192xf32> to vector<2x192xbf16>
    %c0_108 = arith.constant 0 : index
    %c0_109 = arith.constant 0 : index
    %872 = vector.load %arg16[%c0_108, %c0_109] : memref<192x64xbf16, #tpu.memory_space<vmem>>, vector<192x64xbf16>
    %cst_110 = arith.constant dense<0.000000e+00> : vector<2x64xf32>
    %873 = tpu.matmul %871, %872, %cst_110 {dimension_numbers = #tpu.dot_dimension_numbers<[1], [0], [0], [1], [0, 0, 1, 1], [], []>} : vector<2x192xbf16>, vector<192x64xbf16>, vector<2x64xf32> -> vector<2x64xf32>
    %874 = arith.addf %870, %873 : vector<2x64xf32>
    %875 = arith.truncf %678 : vector<2x64xf32> to vector<2x64xbf16>
    %c0_111 = arith.constant 0 : index
    %c0_112 = arith.constant 0 : index
    %876 = vector.load %arg25[%c0_111, %c0_112] : memref<64x64xbf16, #tpu.memory_space<vmem>>, vector<64x64xbf16>
    %cst_113 = arith.constant dense<0.000000e+00> : vector<2x64xf32>
    %877 = tpu.matmul %875, %876, %cst_113 {dimension_numbers = #tpu.dot_dimension_numbers<[1], [0], [0], [1], [0, 0, 1, 1], [], []>} : vector<2x64xbf16>, vector<64x64xbf16>, vector<2x64xf32> -> vector<2x64xf32>
    %878 = arith.addf %874, %877 : vector<2x64xf32>
    %879 = arith.truncf %806 : vector<2x64xf32> to vector<2x64xbf16>
    %c0_114 = arith.constant 0 : index
    %c0_115 = arith.constant 0 : index
    %880 = vector.load %arg34[%c0_114, %c0_115] : memref<64x64xbf16, #tpu.memory_space<vmem>>, vector<64x64xbf16>
    %cst_116 = arith.constant dense<0.000000e+00> : vector<2x64xf32>
    %881 = tpu.matmul %879, %880, %cst_116 {dimension_numbers = #tpu.dot_dimension_numbers<[1], [0], [0], [1], [0, 0, 1, 1], [], []>} : vector<2x64xbf16>, vector<64x64xbf16>, vector<2x64xf32> -> vector<2x64xf32>
    %882 = arith.addf %878, %881 : vector<2x64xf32>
    %c0_117 = arith.constant 0 : index
    %c0_118 = arith.constant 0 : index
    %883 = vector.load %arg35[%c0_117, %c0_118] : memref<2x64xf32, #tpu.memory_space<vmem>>, vector<2x64xf32>
    %884 = vector.extract_strided_slice %0 {offsets = [0, 0], sizes = [2, 1], strides = [1, 1]} : vector<2x2xf32> to vector<2x1xf32>
    %885 = vector.extract_strided_slice %883 {offsets = [0, 0], sizes = [1, 64], strides = [1, 1]} : vector<2x64xf32> to vector<1x64xf32>
    %886 = vector.shape_cast %885 : vector<1x64xf32> to vector<64xf32>
    %887 = vector.shape_cast %886 : vector<64xf32> to vector<1x64xf32>
    %888 = vector.broadcast %884 : vector<2x1xf32> to vector<2x64xf32>
    %889 = vector.broadcast %887 : vector<1x64xf32> to vector<2x64xf32>
    %890 = arith.mulf %888, %889 : vector<2x64xf32>
    %891 = vector.extract_strided_slice %0 {offsets = [0, 1], sizes = [2, 1], strides = [1, 1]} : vector<2x2xf32> to vector<2x1xf32>
    %892 = vector.extract_strided_slice %883 {offsets = [1, 0], sizes = [1, 64], strides = [1, 1]} : vector<2x64xf32> to vector<1x64xf32>
    %893 = vector.shape_cast %892 : vector<1x64xf32> to vector<64xf32>
    %894 = vector.shape_cast %893 : vector<64xf32> to vector<1x64xf32>
    %895 = vector.broadcast %891 : vector<2x1xf32> to vector<2x64xf32>
    %896 = vector.broadcast %894 : vector<1x64xf32> to vector<2x64xf32>
    %897 = arith.mulf %895, %896 : vector<2x64xf32>
    %898 = arith.addf %890, %897 : vector<2x64xf32>
    %899 = arith.addf %882, %898 : vector<2x64xf32>
    %c0_119 = arith.constant 0 : index
    %c0_120 = arith.constant 0 : index
    %900 = vector.load %arg36[%c0_119, %c0_120] : memref<1x64xf32, #tpu.memory_space<vmem>>, vector<1x64xf32>
    %901 = vector.broadcast %900 : vector<1x64xf32> to vector<2x64xf32>
    %902 = arith.addf %899, %901 : vector<2x64xf32>
    %cst_121 = arith.constant 0.000000e+00 : f32
    %903 = vector.broadcast %cst_121 : f32 to vector<2x64xf32>
    %904 = arith.cmpf ogt, %902, %903 : vector<2x64xf32>
    %cst_122 = arith.constant 0.00999999977 : f32
    %905 = vector.broadcast %cst_122 : f32 to vector<2x64xf32>
    %906 = arith.mulf %905, %902 : vector<2x64xf32>
    %907 = arith.select %904, %902, %906 : vector<2x64xi1>, vector<2x64xf32>
    %908 = arith.truncf %907 : vector<2x64xf32> to vector<2x64xbf16>
    %c0_123 = arith.constant 0 : index
    %c0_124 = arith.constant 0 : index
    %909 = vector.load %arg37[%c0_123, %c0_124] : memref<64x192xbf16, #tpu.memory_space<vmem>>, vector<64x192xbf16>
    %cst_125 = arith.constant dense<0.000000e+00> : vector<2x192xf32>
    %910 = tpu.matmul %908, %909, %cst_125 {dimension_numbers = #tpu.dot_dimension_numbers<[1], [0], [0], [1], [0, 0, 1, 1], [], []>} : vector<2x64xbf16>, vector<64x192xbf16>, vector<2x192xf32> -> vector<2x192xf32>
    %c0_126 = arith.constant 0 : index
    %c0_127 = arith.constant 0 : index
    %911 = vector.load %arg38[%c0_126, %c0_127] : memref<1x192xf32, #tpu.memory_space<vmem>>, vector<1x192xf32>
    %912 = vector.broadcast %911 : vector<1x192xf32> to vector<2x192xf32>
    %913 = arith.addf %910, %912 : vector<2x192xf32>
    %cst_128 = arith.constant 0.000000e+00 : f32
    %914 = vector.broadcast %cst_128 : f32 to vector<2x192xf32>
    %915 = arith.cmpf ogt, %913, %914 : vector<2x192xf32>
    %cst_129 = arith.constant 0.00999999977 : f32
    %916 = vector.broadcast %cst_129 : f32 to vector<2x192xf32>
    %917 = arith.mulf %916, %913 : vector<2x192xf32>
    %918 = arith.select %915, %913, %917 : vector<2x192xi1>, vector<2x192xf32>
    %c0_130 = arith.constant 0 : index
    %c0_131 = arith.constant 0 : index
    %919 = vector.load %arg39[%c0_130, %c0_131] : memref<2x192xf32, #tpu.memory_space<vmem>>, vector<2x192xf32>
    tpu.vector_store %arg39[%c0_130, %c0_131], %918 {strides = array<i32>} : memref<2x192xf32, #tpu.memory_space<vmem>>, vector<2x192xf32>,
    return
  }
  func.func @transform_0(%arg0: i32) -> (i32, i32, i32) {
    %c0_i32 = arith.constant 0 : i32
    %c0_i32_0 = arith.constant 0 : i32
    %c0_i32_1 = arith.constant 0 : i32
    return %arg0, %c0_i32, %c0_i32_0 : i32, i32, i32
  }
  func.func @transform_1(%arg0: i32) -> (i32, i32) {
    %c0_i32 = arith.constant 0 : i32
    %c0_i32_0 = arith.constant 0 : i32
    return %arg0, %c0_i32 : i32, i32
  }
  func.func @transform_2(%arg0: i32) -> (i32, i32, i32) {
    %c0_i32 = arith.constant 0 : i32
    %c0_i32_0 = arith.constant 0 : i32
    %c0_i32_1 = arith.constant 0 : i32
    return %arg0, %c0_i32, %c0_i32_0 : i32, i32, i32
  }
  func.func @transform_3(%arg0: i32) -> (i32, i32) {
    %c0_i32 = arith.constant 0 : i32
    %c0_i32_0 = arith.constant 0 : i32
    return %arg0, %c0_i32 : i32, i32
  }
  func.func @transform_4(%arg0: i32) -> (i32, i32, i32) {
    %c0_i32 = arith.constant 0 : i32
    %c0_i32_0 = arith.constant 0 : i32
    %c0_i32_1 = arith.constant 0 : i32
    return %arg0, %c0_i32, %c0_i32_0 : i32, i32, i32
  }
  func.func @transform_5(%arg0: i32) -> (i32, i32) {
    %c0_i32 = arith.constant 0 : i32
    %c0_i32_0 = arith.constant 0 : i32
    return %arg0, %c0_i32 : i32, i32
  }
  func.func @transform_6(%arg0: i32) -> (i32, i32) {
    %c0_i32 = arith.constant 0 : i32
    %c0_i32_0 = arith.constant 0 : i32
    %c0_i32_1 = arith.constant 0 : i32
    return %c0_i32, %c0_i32_0 : i32, i32
  }
  func.func @transform_7(%arg0: i32) -> (i32, i32) {
    %c0_i32 = arith.constant 0 : i32
    %c0_i32_0 = arith.constant 0 : i32
    %c0_i32_1 = arith.constant 0 : i32
    return %c0_i32, %c0_i32_0 : i32, i32
  }
  func.func @transform_8(%arg0: i32) -> (i32, i32, i32) {
    %c0_i32 = arith.constant 0 : i32
    %c0_i32_0 = arith.constant 0 : i32
    %c0_i32_1 = arith.constant 0 : i32
    %c0_i32_2 = arith.constant 0 : i32
    return %c0_i32, %c0_i32_0, %c0_i32_1 : i32, i32, i32
  }
  func.func @transform_9(%arg0: i32) -> (i32, i32) {
    %c0_i32 = arith.constant 0 : i32
    %c0_i32_0 = arith.constant 0 : i32
    %c0_i32_1 = arith.constant 0 : i32
    return %c0_i32, %c0_i32_0 : i32, i32
  }
  func.func @transform_10(%arg0: i32) -> (i32, i32) {
    %c0_i32 = arith.constant 0 : i32
    %c0_i32_0 = arith.constant 0 : i32
    %c0_i32_1 = arith.constant 0 : i32
    return %c0_i32, %c0_i32_0 : i32, i32
  }
  func.func @transform_11(%arg0: i32) -> (i32, i32) {
    %c0_i32 = arith.constant 0 : i32
    %c0_i32_0 = arith.constant 0 : i32
    %c0_i32_1 = arith.constant 0 : i32
    return %c0_i32, %c0_i32_0 : i32, i32
  }
  func.func @transform_12(%arg0: i32) -> (i32, i32) {
    %c0_i32 = arith.constant 0 : i32
    %c0_i32_0 = arith.constant 0 : i32
    %c0_i32_1 = arith.constant 0 : i32
    return %c0_i32, %c0_i32_0 : i32, i32
  }
  func.func @transform_13(%arg0: i32) -> (i32, i32) {
    %c0_i32 = arith.constant 0 : i32
    %c0_i32_0 = arith.constant 0 : i32
    %c0_i32_1 = arith.constant 0 : i32
    return %c0_i32, %c0_i32_0 : i32, i32
  }
  func.func @transform_14(%arg0: i32) -> (i32, i32) {
    %c0_i32 = arith.constant 0 : i32
    %c0_i32_0 = arith.constant 0 : i32
    %c0_i32_1 = arith.constant 0 : i32
    return %c0_i32, %c0_i32_0 : i32, i32
  }
  func.func @transform_15(%arg0: i32) -> (i32, i32) {
    %c0_i32 = arith.constant 0 : i32
    %c0_i32_0 = arith.constant 0 : i32
    %c0_i32_1 = arith.constant 0 : i32
    return %c0_i32, %c0_i32_0 : i32, i32
  }
  func.func @transform_16(%arg0: i32) -> (i32, i32) {
    %c0_i32 = arith.constant 0 : i32
    %c0_i32_0 = arith.constant 0 : i32
    %c0_i32_1 = arith.constant 0 : i32
    return %c0_i32, %c0_i32_0 : i32, i32
  }
  func.func @transform_17(%arg0: i32) -> (i32, i32) {
    %c0_i32 = arith.constant 0 : i32
    %c0_i32_0 = arith.constant 0 : i32
    %c0_i32_1 = arith.constant 0 : i32
    return %c0_i32, %c0_i32_0 : i32, i32
  }
  func.func @transform_18(%arg0: i32) -> (i32, i32) {
    %c0_i32 = arith.constant 0 : i32
    %c0_i32_0 = arith.constant 0 : i32
    %c0_i32_1 = arith.constant 0 : i32
    return %c0_i32, %c0_i32_0 : i32, i32
  }
  func.func @transform_19(%arg0: i32) -> (i32, i32) {
    %c0_i32 = arith.constant 0 : i32
    %c0_i32_0 = arith.constant 0 : i32
    %c0_i32_1 = arith.constant 0 : i32
    return %c0_i32, %c0_i32_0 : i32, i32
  }
  func.func @transform_20(%arg0: i32) -> (i32, i32) {
    %c0_i32 = arith.constant 0 : i32
    %c0_i32_0 = arith.constant 0 : i32
    %c0_i32_1 = arith.constant 0 : i32
    return %c0_i32, %c0_i32_0 : i32, i32
  }
  func.func @transform_21(%arg0: i32) -> (i32, i32) {
    %c0_i32 = arith.constant 0 : i32
    %c0_i32_0 = arith.constant 0 : i32
    %c0_i32_1 = arith.constant 0 : i32
    return %c0_i32, %c0_i32_0 : i32, i32
  }
  func.func @transform_22(%arg0: i32) -> (i32, i32) {
    %c0_i32 = arith.constant 0 : i32
    %c0_i32_0 = arith.constant 0 : i32
    %c0_i32_1 = arith.constant 0 : i32
    return %c0_i32, %c0_i32_0 : i32, i32
  }
  func.func @transform_23(%arg0: i32) -> (i32, i32) {
    %c0_i32 = arith.constant 0 : i32
    %c0_i32_0 = arith.constant 0 : i32
    %c0_i32_1 = arith.constant 0 : i32
    return %c0_i32, %c0_i32_0 : i32, i32
  }
  func.func @transform_24(%arg0: i32) -> (i32, i32) {
    %c0_i32 = arith.constant 0 : i32
    %c0_i32_0 = arith.constant 0 : i32
    %c0_i32_1 = arith.constant 0 : i32
    return %c0_i32, %c0_i32_0 : i32, i32
  }
  func.func @transform_25(%arg0: i32) -> (i32, i32) {
    %c0_i32 = arith.constant 0 : i32
    %c0_i32_0 = arith.constant 0 : i32
    %c0_i32_1 = arith.constant 0 : i32
    return %c0_i32, %c0_i32_0 : i32, i32
  }
  func.func @transform_26(%arg0: i32) -> (i32, i32) {
    %c0_i32 = arith.constant 0 : i32
    %c0_i32_0 = arith.constant 0 : i32
    %c0_i32_1 = arith.constant 0 : i32
    return %c0_i32, %c0_i32_0 : i32, i32
  }
  func.func @transform_27(%arg0: i32) -> (i32, i32) {
    %c0_i32 = arith.constant 0 : i32
    %c0_i32_0 = arith.constant 0 : i32
    %c0_i32_1 = arith.constant 0 : i32
    return %c0_i32, %c0_i32_0 : i32, i32
  }
  func.func @transform_28(%arg0: i32) -> (i32, i32) {
    %c0_i32 = arith.constant 0 : i32
    %c0_i32_0 = arith.constant 0 : i32
    %c0_i32_1 = arith.constant 0 : i32
    return %c0_i32, %c0_i32_0 : i32, i32
  }
  func.func @transform_29(%arg0: i32) -> (i32, i32) {
    %c0_i32 = arith.constant 0 : i32
    %c0_i32_0 = arith.constant 0 : i32
    %c0_i32_1 = arith.constant 0 : i32
    return %c0_i32, %c0_i32_0 : i32, i32
  }
  func.func @transform_30(%arg0: i32) -> (i32, i32) {
    %c0_i32 = arith.constant 0 : i32
    %c0_i32_0 = arith.constant 0 : i32
    %c0_i32_1 = arith.constant 0 : i32
    return %c0_i32, %c0_i32_0 : i32, i32
  }
  func.func @transform_31(%arg0: i32) -> (i32, i32) {
    %c0_i32 = arith.constant 0 : i32
    %c0_i32_0 = arith.constant 0 : i32
    %c0_i32_1 = arith.constant 0 : i32
    return %c0_i32, %c0_i32_0 : i32, i32
  }
  func.func @transform_32(%arg0: i32) -> (i32, i32) {
    %c0_i32 = arith.constant 0 : i32
    %c0_i32_0 = arith.constant 0 : i32
    %c0_i32_1 = arith.constant 0 : i32
    return %c0_i32, %c0_i32_0 : i32, i32
  }
  func.func @transform_33(%arg0: i32) -> (i32, i32) {
    %c0_i32 = arith.constant 0 : i32
    %c0_i32_0 = arith.constant 0 : i32
    %c0_i32_1 = arith.constant 0 : i32
    return %c0_i32, %c0_i32_0 : i32, i32
  }
  func.func @transform_34(%arg0: i32) -> (i32, i32) {
    %c0_i32 = arith.constant 0 : i32
    %c0_i32_0 = arith.constant 0 : i32
    %c0_i32_1 = arith.constant 0 : i32
    return %c0_i32, %c0_i32_0 : i32, i32
  }
  func.func @transform_35(%arg0: i32) -> (i32, i32) {
    %c0_i32 = arith.constant 0 : i32
    %c0_i32_0 = arith.constant 0 : i32
    %c0_i32_1 = arith.constant 0 : i32
    return %c0_i32, %c0_i32_0 : i32, i32
  }
  func.func @transform_36(%arg0: i32) -> (i32, i32) {
    %c0_i32 = arith.constant 0 : i32
    %c0_i32_0 = arith.constant 0 : i32
    %c0_i32_1 = arith.constant 0 : i32
    return %c0_i32, %c0_i32_0 : i32, i32
  }
  func.func @transform_37(%arg0: i32) -> (i32, i32) {
    %c0_i32 = arith.constant 0 : i32
    %c0_i32_0 = arith.constant 0 : i32
    %c0_i32_1 = arith.constant 0 : i32
    return %c0_i32, %c0_i32_0 : i32, i32
  }
  func.func @transform_38(%arg0: i32) -> (i32, i32) {
    %c0_i32 = arith.constant 0 : i32
    %c0_i32_0 = arith.constant 0 : i32
    return %arg0, %c0_i32 : i32, i32
  }
}

</mosaic_0001>

<bundles_post_ra>
// kernel: inter_critic_core.1
= control target key start
LH: loop header
LB: loop body
LE: loop exit
PB: predicated region body
PF: predicated region fallthrough
CT: control target
= control target key end

     0   :  { %s3455_s6 = smov 1   ;;  %s3456_s10 = smov 2   ;;  %s4494_s0 = inlined_call_operand.smem [shape: u32[39], index: -1, kind: input, shape index: {}] }
   0x1   :  { %s3522_s5 = sld [smem:[%s4494_s0]]   ;;  %s3457_s14 = smov 3  }
   0x2   :  { %s3527_s9 = sld [smem:[%s4494_s0 + %s3455_s6]]   ;;  %s3458_s18 = smov 4  }
   0x3   :  { %s3532_s13 = sld [smem:[%s4494_s0 + %s3456_s10]]   ;;  %s3459_s22 = smov 5  }
   0x4   :  { %s3537_s17 = sld [smem:[%s4494_s0 + %s3457_s14]]   ;;  %s3460_s26 = smov 6  }
   0x5   :  { %s3542_s21 = sld [smem:[%s4494_s0 + %s3458_s18]]   ;;  %s3461_s30 = smov 7  }
   0x6   :  { %s3547_s25 = sld [smem:[%s4494_s0 + %s3459_s22]]   ;;  %s3462_s4 = smov 8  }
   0x7   :  { %s3552_s29 = sld [smem:[%s4494_s0 + %s3460_s26]]   ;;  %s3463_s10 = smov 9  }
   0x8   :  { %s3557_s3 = sld [smem:[%s4494_s0 + %s3461_s30]]   ;;  %s3464_s15 = smov 10  }
   0x9   :  { %s3562_s8 = sld [smem:[%s4494_s0 + %s3462_s4]]   ;;  %s3465_s20 = smov 11  }
   0xa   :  { %4513 = sst [smem:[#allocation5_spill]] %s3537_s17  ;;  %s3466_s26 = smov 12  }
   0xb   :  { %s3567_s14 = sld [smem:[%s4494_s0 + %s3463_s10]]   ;;  %s3467_s1 = smov 13  }
   0xc   :  { %4514 = sst [smem:[#allocation6_spill]] %s3547_s25  ;;  %s3468_s7 = smov 14  }
   0xd   :  { %s3572_s19 = sld [smem:[%s4494_s0 + %s3464_s15]]   ;;  %s3469_s15 = smov 15  }
   0xe   :  { %4515 = sst [smem:[#allocation7_spill]] %s3557_s3  ;;  %s3470_s22 = smov 16  }
   0xf   :  { %4516 = sst [smem:[#allocation8_spill]] %s3562_s8  ;;  %s3471_s28 = smov 17  }
  0x10   :  { %s3577_s24 = sld [smem:[%s4494_s0 + %s3465_s20]]  }
  0x11   :  { %4517 = sst [smem:[#allocation9_spill]] %s3567_s14 }
  0x12   :  { %s3582_s30 = sld [smem:[%s4494_s0 + %s3466_s26]]  }
  0x13   :  { %s3587_s6 = sld [smem:[%s4494_s0 + %s3467_s1]]  }
  0x14   :  { %s3592_s12 = sld [smem:[%s4494_s0 + %s3468_s7]]   ;;  %s3472_s7 = smov 18  }
  0x15   :  { %s3597_s20 = sld [smem:[%s4494_s0 + %s3469_s15]]   ;;  %s3473_s15 = smov 19  }
  0x16   :  { %4518 = sst [smem:[#allocation10_spill]] %s3577_s24 }
  0x17   :  { %s3602_s27 = sld [smem:[%s4494_s0 + %s3470_s22]]   ;;  %s3474_s22 = smov 20  }
  0x18   :  { %4519 = sst [smem:[#allocation11_spill]] %s3582_s30 }
  0x19   :  { %4520 = sst [smem:[#allocation12_spill]] %s3587_s6 }
  0x1a   :  { %4521 = sst [smem:[#allocation13_spill]] %s3592_s12 }
  0x1b   :  { %4522 = sst [smem:[#allocation14_spill]] %s3597_s20 }
  0x1c   :  { %s3607_s4 = sld [smem:[%s4494_s0 + %s3471_s28]]   ;;  %s3475_s28 = smov 21  }
  0x1d   :  { %s3612_s12 = sld [smem:[%s4494_s0 + %s3472_s7]]   ;;  %s3476_s7 = smov 22  }
  0x1e   :  { %s3617_s6 = sld [smem:[%s4494_s0 + %s3473_s15]]   ;;  %s3477_s15 = smov 23  }
  0x1f   :  { %s3622_s30 = sld [smem:[%s4494_s0 + %s3474_s22]]   ;;  %s3478_s22 = smov 24  }
  0x20   :  { %s3627_s14 = sld [smem:[%s4494_s0 + %s3475_s28]]   ;;  %s3479_s28 = smov 25  }
  0x21   :  { %s3632_s24 = sld [smem:[%s4494_s0 + %s3476_s7]]   ;;  %s3480_s7 = smov 26  }
  0x22   :  { %s3637_s20 = sld [smem:[%s4494_s0 + %s3477_s15]]   ;;  %s3481_s15 = smov 27  }
  0x23   :  { %4523 = sst [smem:[#allocation15_spill]] %s3612_s12 }
  0x24   :  { %4524 = sst [smem:[#allocation16_spill]] %s3617_s6 }
  0x25   :  { %s3642_s25 = sld [smem:[%s4494_s0 + %s3478_s22]]   ;;  %s3482_s22 = smov 28  }
  0x26   :  { %4525 = sst [smem:[#allocation17_spill]] %s3627_s14 }
  0x27   :  { %4526 = sst [smem:[#allocation18_spill]] %s3632_s24 }
  0x28   :  { %4527 = sst [smem:[#allocation19_spill]] %s3637_s20 }
  0x29   :  { %s3647_s17 = sld [smem:[%s4494_s0 + %s3479_s28]]   ;;  %s3483_s28 = smov 29  }
  0x2a   :  { %s3652_s24 = sld [smem:[%s4494_s0 + %s3480_s7]]   ;;  %s3484_s7 = smov 30  }
  0x2b   :  { %4528 = sst [smem:[#allocation20_spill]] %s3642_s25 }
  0x2c   :  { %s3657_s20 = sld [smem:[%s4494_s0 + %s3481_s15]]   ;;  %s3485_s15 = smov 31  }
  0x2d   :  { %s3662_s25 = sld [smem:[%s4494_s0 + %s3482_s22]]   ;;  %s3486_s22 = smov 32  }
  0x2e   :  { %s3667_s3 = sld [smem:[%s4494_s0 + %s3483_s28]]   ;;  %s3487_s28 = smov 33  }
  0x2f   :  { %s3672_s8 = sld [smem:[%s4494_s0 + %s3484_s7]]   ;;  %s3488_s7 = smov 34  }
  0x30   :  { %s3687_s14 = sld [smem:[%s4494_s0 + %s3487_s28]]   ;;  %s3491_s28 = smov 37  }
  0x32   :  { %4529 = sst [smem:[#allocation21_spill]] %s3657_s20 }
  0x33   :  { %4530 = sst [smem:[#allocation22_spill]] %s3662_s25 }
  0x34   :  { %s3677_s20 = sld [smem:[%s4494_s0 + %s3485_s15]]   ;;  %s3489_s15 = smov 35  }
  0x35   :  { %4531 = sst [smem:[#allocation23_spill]] %s3672_s8 }
  0x36   :  { %s3682_s25 = sld [smem:[%s4494_s0 + %s3486_s22]]   ;;  %s3490_s22 = smov 36  }
  0x37   :  { %4533 = sst [smem:[#allocation25_spill]] %s3687_s14 }
  0x38   :  { %s3692_s8 = sld [smem:[%s4494_s0 + %s3488_s7]]   ;;  %s3492_s7 = smov 38  }
  0x39   :  { %s3697_s6 = sld [smem:[%s4494_s0 + %s3489_s15]]  }
  0x3a   :  { %s3707_s14 = sld [smem:[%s4494_s0 + %s3491_s28]]  }
  0x3b   :  { %s3712_s12 = sld [smem:[%s4494_s0 + %s3492_s7]]  }
  0x3c   :  { %4532 = sst [smem:[#allocation24_spill]] %s3682_s25 }
  0x3d   :  { %s3702_s25 = sld [smem:[%s4494_s0 + %s3490_s22]]  }
  0x3e   :  { %v1893_v0 = vld [vmem:[%s3532_s13 + $0x8] sm:$0x1f]  ;;  %v160_v1 = vld [vmem:[%s3527_s9] sm:$0x3]  ;;  %v4505_v2 = vlaneseq  ;;  %v4500_v3 = vmov 1   ;;  %v4503_v4 = vmov 0  }
  0x3f   :  { %3256 = vset.pattern.permute.xlu0 %v4500_v3  ;;  %3258 = vset.pattern.permute.xlu1 %v4503_v4  ;;  %v1892_v6 = vld [vmem:[%s3532_s13] sm:$0x1f]  ;;  %v4501_v9 = vmov 2   ;;  %v2147_v20 = vld [vmem:[%s3542_s21 + $0x8] sm:$0x3f] }
  0x40   :  { %1963 = vperm.xlu1 %3258, %v1893_v0   ;;  %1699 = vperm.xlu0 %3256, %v160_v1   ;;  %v3719_v5 = vshrl.u32 %v4505_v2, 7  ;;  %v171_v7 = vld [vmem:[%s3552_s29] sm:$0xff]  ;;  %v3767_v27 = vld [vmem:[%s3552_s29 + $0x8] sm:$0xff] }
  0x41   :  { %977 = vmatprep.mubr.bf16.mxu0 %v4503_v4  ;;  %1064 = vmatprep.mubr.bf16.mxu1 %v4503_v4  ;;  %v3763_v26 = vld [vmem:[%s3542_s21] sm:$0x3f] }
  0x42   :  { %v3728_v8 = vsub.s32 0, %v3719_v5  ;;  %v3733_v11 = vsub.s32 2, %v3719_v5  ;;  %v3736_v12 = vsub.s32 1, %v3719_v5  ;;  %v3740_v14 = vsub.s32 6, %v3719_v5 }
  0x43   :  { %v3744_v16 = vsub.s32 3, %v3719_v5  ;;  %v3749_v19 = vsub.s32 4, %v3719_v5  ;;  %v3754_v21 = vsub.s32 7, %v3719_v5  ;;  %v3758_v23 = vsub.s32 5, %v3719_v5 }
  0x44   :  { %3259 = vset.pattern.permute.xlu1 %v4500_v3  ;;  %3257 = vset.pattern.permute.xlu0 %v4503_v4  ;;  %v187_v10 = vrot.slane %v171_v7, %v3728_v8  ;;  %v223_v13 = vrot.slane %v171_v7, %v3733_v11  ;;  %v204_v15 = vrot.slane %v171_v7, %v3736_v12 }
  0x45   :  { %1973 = vperm.xlu1 %3259, %v1892_v6   ;;  %1690 = vperm.xlu0 %3257, %v160_v1   ;;  %v299_v17 = vrot.slane %v171_v7, %v3740_v14  ;;  %v242_v18 = vrot.slane %v171_v7, %v3744_v16  ;;  %v261_v22 = vrot.slane %v171_v7, %v3749_v19 }
  0x46   :  { %v318_v24 = vrot.slane %v171_v7, %v3754_v21  ;;  %v280_v25 = vrot.slane %v171_v7, %v3758_v23  ;;  %v375_v28 = vrot.slane %v3767_v27, %v3733_v11  ;;  %v413_v29 = vrot.slane %v3767_v27, %v3749_v19 }
  0x49   :  { %3260 = vset.pattern.permute.xlu1 %v4501_v9  ;;  %1958 = vperm.xlu0 %3257, %v1892_v6  }
  0x4a   :  { %1989 = vperm.xlu1 %3260, %v1892_v6  }
  0x4d   :  { %189 = vbcast.lane.b32.xlu0 %v187_v10, 256 }
  0x4e   :  { %1993 = vperm.xlu1 %3260, %v1893_v0  }
  0x51   :  { %225 = vbcast.lane.b32.xlu0 %v223_v13, 256 }
  0x52   :  { %206 = vbcast.lane.b32.xlu1 %v204_v15, 256 }
  0x53   :  { %3261 = vset.pattern.permute.xlu1 %v4503_v4 }
  0x55   :  { %301 = vbcast.lane.b32.xlu0 %v299_v17, 256 }
  0x56   :  { %244 = vbcast.lane.b32.xlu1 %v242_v18, 256 }
  0x59   :  { %2217 = vperm.xlu0 %3257, %v2147_v20  }
  0x5a   :  { %263 = vbcast.lane.b32.xlu1 %v261_v22, 256 }
  0x5d   :  { %320 = vbcast.lane.b32.xlu0 %v318_v24, 256 }
  0x5e   :  { %282 = vbcast.lane.b32.xlu1 %v280_v25, 256  ;;  %3266 = vset.pattern.permute.xlu0 %v4501_v9 }
  0x61   :  { %2247 = vperm.xlu0 %3266, %v2147_v20  }
  0x62   :  { %2212 = vperm.xlu1 %3261, %v3763_v26  }
  0x65   :  { %3267 = vset.pattern.permute.xlu0 %v4500_v3 }
  0x66   :  { %3262 = vset.pattern.permute.xlu1 %v4500_v3  ;;  %1977 = vperm.xlu0 %3267, %v1893_v0  }
  0x67   :  { %2227 = vperm.xlu1 %3262, %v3763_v26  }
  0x6a   :  { %377 = vbcast.lane.b32.xlu0 %v375_v28, 256 }
  0x6b   :  { %2231 = vperm.xlu1 %3262, %v2147_v20  }
  0x6c   :  { %82 = vsyncpa [#allocation3], 0  ;;  %v451_v30 = vrot.slane %v3767_v27, %v3740_v14  ;;  %v3780_v31 = vld [vmem:[%s3552_s29 + $0x10] sm:$0xff]  ;;  %v3792_v36 = vld [vmem:[%s3552_s29 + $0x18] sm:$0xff]  ;;  %s4543_s0 = sld [smem:[#allocation15_spill]]  ;;  %s4544_s9 = sld [smem:[#allocation16_spill]] }
  0x6d   :  { %v489_v32 = vrot.slane %v3780_v31, %v3728_v8  ;;  %v527_v33 = vrot.slane %v3780_v31, %v3733_v11  ;;  %v565_v34 = vrot.slane %v3780_v31, %v3749_v19  ;;  %v603_v35 = vrot.slane %v3780_v31, %v3740_v14  ;;  %v3803_v41 = vld [vmem:[%s3552_s29 + $0x20] sm:$0xf]  ;;  %s4545_s13 = sld [smem:[#allocation17_spill]]  ;;  %s4547_s21 = sld [smem:[#allocation22_spill]] }
  0x6e   :  { %415 = vbcast.lane.b32.xlu0 %v413_v29, 256  ;;  %v641_v37 = vrot.slane %v3792_v36, %v3728_v8  ;;  %v679_v38 = vrot.slane %v3792_v36, %v3733_v11  ;;  %v717_v39 = vrot.slane %v3792_v36, %v3749_v19  ;;  %v755_v40 = vrot.slane %v3792_v36, %v3740_v14  ;;  %v1687_v44 = vld [vmem:[%s3572_s19] sm:$0x3]  ;;  %v3841_v29 = vld [vmem:[%s3522_s5 + $0x28] sm:$0xff]  ;;  %s4548_s29 = sld [smem:[#allocation23_spill]]  ;;  %s4554_s19 = sld [smem:[#allocation6_spill]] }
  0x6f   :  { %3263 = vset.pattern.permute.xlu1 %v4503_v4  ;;  %v793_v42 = vrot.slane %v3803_v41, %v3728_v8  ;;  %v831_v43 = vrot.slane %v3803_v41, %v3733_v11  ;;  %v1895_v45 = vld [vmem:[%s3602_s27] sm:$0x3]  ;;  %v1705_v50 = vrot.slane %v1687_v44, %v3736_v12  ;;  %v1696_v54 = vrot.slane %v1687_v44, %v3728_v8  ;;  %s4560_s27 = sld [smem:[#allocation20_spill]]  ;;  %s4562_s15 = sld [smem:[#allocation19_spill]] }
  0x70   :  { %v2149_v46 = vld [vmem:[%s3647_s17] sm:$0x3]  ;;  %v1904_v51 = vrot.slane %v1895_v45, %v3736_v12  ;;  %v1899_v55 = vrot.slane %v1895_v45, %v3728_v8  ;;  %s4546_s17 = sld [smem:[#allocation21_spill]]  ;;  %vm2079_vm0 = vcmask 520192   ;;  %vm2333_vm1 = vcmask 521216   ;;  %s4567_s16 = sld [smem:[#allocation24_spill]] }
  0x71   :  { %v2789_v47 = vld [vmem:[%s3692_s8] sm:$0x3]  ;;  %v2158_v52 = vrot.slane %v2149_v46, %v3736_v12  ;;  %v2153_v56 = vrot.slane %v2149_v46, %v3728_v8  ;;  %s4550_s8 = sld [smem:[#allocation7_spill]]  ;;  %vm898_vm2 = vcmask 1041409   ;;  %vm2104_vm4 = vcmask 33792   ;;  %s4571_s18 = sld [smem:[#allocation25_spill]] }
  0x72   :  { %453 = vbcast.lane.b32.xlu0 %v451_v30, 256  ;;  %v2798_v53 = vrot.slane %v2789_v47, %v3736_v12  ;;  %v2793_v57 = vrot.slane %v2789_v47, %v3728_v8  ;;  %v3126_v10 = vld [vmem:[%s3652_s24] ss:$0 sm:$0xff]  ;;  %v238_v47 = vrot.slane %v3841_v29, %v3744_v16  ;;  %vm941_vm7 = vcmask 523264   ;;  %s4556_s24 = sld [smem:[#allocation14_spill]]  ;;  %s4573_s22 = sld [smem:[#allocation11_spill]] }
  0x73   :  { %v3122_v20 = vld [vmem:[%s3607_s4] ss:$0 sm:$0xff]  ;;  %vm2356_vm9 = vcmask 41984   ;;  %vm3500_vm13 = vmmov 0   ;;  %s4561_s4 = sld [smem:[#allocation18_spill]]  ;;  %s4574_s23 = sld [smem:[#allocation12_spill]] }
  0x74   :  { %v3838_v28 = vld [vmem:[%s3522_s5] sm:$0xff]  ;;  %s4576_s26 = sld [smem:[#allocation13_spill]] }
  0x75   :  { %v234_v46 = vrot.slane %v3838_v28, %v3744_v16 }
  0x76   :  { %491 = vbcast.lane.b32.xlu0 %v489_v32, 256  ;;  %v179_v32 = vrot.slane %v3838_v28, %v3728_v8 }
  0x7a   :  { %529 = vbcast.lane.b32.xlu0 %v527_v33, 256  ;;  %v183_v33 = vrot.slane %v3841_v29, %v3728_v8 }
  0x7e   :  { %567 = vbcast.lane.b32.xlu0 %v565_v34, 256 }
  0x82   :  { %605 = vbcast.lane.b32.xlu0 %v603_v35, 256 }
  0x86   :  { %643 = vbcast.lane.b32.xlu0 %v641_v37, 256  ;;  %v215_v37 = vrot.slane %v3838_v28, %v3733_v11 }
  0x8a   :  { %681 = vbcast.lane.b32.xlu0 %v679_v38, 256  ;;  %v219_v38 = vrot.slane %v3841_v29, %v3733_v11 }
  0x8e   :  { %719 = vbcast.lane.b32.xlu0 %v717_v39, 256  ;;  %v196_v39 = vrot.slane %v3838_v28, %v3736_v12 }
  0x92   :  { %757 = vbcast.lane.b32.xlu0 %v755_v40, 256  ;;  %v200_v40 = vrot.slane %v3841_v29, %v3736_v12 }
  0x96   :  { %795 = vbcast.lane.b32.xlu0 %v793_v42, 256 }
  0x9a   :  { %833 = vbcast.lane.b32.xlu0 %v831_v43, 256 }
  0xbf   :  { %v1700_v48 = vpop.permute.xlu0 %1699  ;;  %v3813_v49 = vpop.permute.xlu1 %1963 }
  0xc0   :  { %4534 = vst [vmem:[#allocation26_spill] sm:$0xff] %v3813_v49  ;;  %v1706_v58 = vmul.f32 %v1705_v50, %v1700_v48  ;;  %v1905_v59 = vmul.f32 %v1904_v51, %v1700_v48  ;;  %v2159_v60 = vmul.f32 %v2158_v52, %v1700_v48  ;;  %v2799_v61 = vmul.f32 %v2798_v53, %v1700_v48 }
  0xc4   :  { %v1691_v62 = vpop.permute.xlu0 %1690  ;;  %v3823_v63 = vpop.permute.xlu1 %1973 }
  0xc5   :  { %v1697_v0 = vmul.f32 %v1696_v54, %v1691_v62  ;;  %v1900_v1 = vmul.f32 %v1899_v55, %v1691_v62  ;;  %v2154_v6 = vmul.f32 %v2153_v56, %v1691_v62  ;;  %v2794_v7 = vmul.f32 %v2793_v57, %v1691_v62 }
  0xc6   :  { %v253_v57 = vrot.slane %v3838_v28, %v3749_v19 }
  0xc7   :  { %v3826_v13 = vadd.f32 %v1706_v58, %v1697_v0  ;;  %v3828_v15 = vadd.f32 %v2799_v61, %v2794_v7  ;;  %v2160_v17 = vadd.f32 %v2159_v60, %v2154_v6  ;;  %v1906_v18 = vadd.f32 %v1905_v59, %v1900_v1 }
  0xc8   :  { %v3831_v22 = vpop.permute.xlu0 %1958  ;;  %v257_v58 = vrot.slane %v3841_v29, %v3749_v19  ;;  %v291_v6 = vrot.slane %v3838_v28, %v3740_v14  ;;  %v295_v7 = vrot.slane %v3841_v29, %v3740_v14 }
  0xc9   :  { %4535 = vst [vmem:[#allocation27_spill] sm:$0xff] %v3828_v15  ;;  %v3833_v24 = vpop.permute.xlu1 %1989  ;;  %v3835_v25 = vadd.f32 %v3126_v10, %v2160_v17  ;;  %v1914_v30 = vadd.f32 %v3122_v20, %v1906_v18  ;;  %v337_v17 = vrot.slane %v3767_v27, %v3728_v8 }
  0xca   :  { %4536 = vst [vmem:[#allocation28_spill] sm:$0xff] %v3833_v24 }
  0xcb   :  { %2181 = vperm.xlu0 %3267, %v3835_v25   ;;  %1918 = vperm.xlu1 %3263, %v1914_v30  }
  0xcc   :  { %v190_v34 = vpop.permute.xlu0 %189 }
  0xcd   :  { %v3848_v35 = vpop.permute.xlu1 %1993  ;;  %v191_v42 = vmul.f32 %v190_v34, %v179_v32  ;;  %v192_v43 = vmul.f32 %v190_v34, %v183_v33  ;;  %v276_v32 = vrot.slane %v3841_v29, %v3758_v23 }
  0xce   :  { %4537 = vst [vmem:[#allocation29_spill] sm:$0xff] %v3848_v35 }
  0xcf   :  { %3269 = vset.pattern.permute.xlu0 %v4501_v9  ;;  %3264 = vset.pattern.permute.xlu1 %v4500_v3 }
  0xd0   :  { %2191 = vperm.xlu0 %3269, %v3835_v25   ;;  %v226_v44 = vpop.permute.xlu0 %225  ;;  %1927 = vperm.xlu1 %3264, %v1914_v30  }
  0xd1   :  { %v207_v45 = vpop.permute.xlu1 %206  ;;  %v227_v48 = vmul.f32 %v226_v44, %v215_v37  ;;  %v228_v50 = vmul.f32 %v226_v44, %v219_v38  ;;  %v310_v38 = vrot.slane %v3838_v28, %v3754_v21 }
  0xd2   :  { %v208_v51 = vmul.f32 %v207_v45, %v196_v39  ;;  %v209_v52 = vmul.f32 %v207_v45, %v200_v40  ;;  %v314_v39 = vrot.slane %v3841_v29, %v3754_v21 }
  0xd4   :  { %v210_v53 = vadd.f32 %v208_v51, %v191_v42  ;;  %v211_v54 = vadd.f32 %v209_v52, %v192_v43  ;;  %3270 = vset.pattern.permute.xlu0 %v4503_v4  ;;  %3265 = vset.pattern.permute.xlu1 %v4501_v9  ;;  %v302_v55 = vpop.permute.xlu0 %301  ;;  %v3123_v9 = vld [vmem:[%s4544_s9] ss:$0 sm:$0xff] }
  0xd5   :  { %v245_v56 = vpop.permute.xlu1 %244  ;;  %1937 = vperm.xlu1 %3265, %v1914_v30   ;;  %v272_v30 = vrot.slane %v3838_v28, %v3758_v23  ;;  %v303_v42 = vmul.f32 %v302_v55, %v291_v6  ;;  %v304_v43 = vmul.f32 %v302_v55, %v295_v7 }
  0xd6   :  { %v229_v59 = vadd.f32 %v227_v48, %v210_v53  ;;  %v230_v60 = vadd.f32 %v228_v50, %v211_v54  ;;  %v246_v61 = vmul.f32 %v245_v56, %v234_v46  ;;  %v247_v62 = vmul.f32 %v245_v56, %v238_v47  ;;  %v2208_v53 = vld [vmem:[%s3667_s3] sm:$0x7]  ;;  %s4549_s3 = sld [smem:[#allocation8_spill]] }
  0xd7   :  { %v2209_v54 = vld [vmem:[%s3677_s20] sm:$0x7]  ;;  %s4559_s20 = sld [smem:[#allocation9_spill]] }
  0xd8   :  { %v248_v0 = vadd.f32 %v246_v61, %v229_v59  ;;  %v249_v1 = vadd.f32 %v247_v62, %v230_v60  ;;  %v2218_v33 = vpop.permute.xlu0 %2217  ;;  %v394_v60 = vrot.slane %v3767_v27, %v3744_v16  ;;  %v3909_v61 = vrot.slane %v2208_v53, %v3736_v12 }
  0xd9   :  { %v264_v10 = vpop.permute.xlu1 %263  ;;  %2243 = vperm.xlu1 %3265, %v3763_v26   ;;  %v356_v26 = vrot.slane %v3767_v27, %v3736_v12  ;;  %v3912_v62 = vrot.slane %v2209_v54, %v3736_v12 }
  0xda   :  { %v265_v18 = vmul.f32 %v264_v10, %v253_v57  ;;  %v266_v20 = vmul.f32 %v264_v10, %v257_v58  ;;  %v3898_v57 = vrot.slane %v2208_v53, %v3728_v8  ;;  %v3901_v58 = vrot.slane %v2209_v54, %v3728_v8 }
  0xdb   :  { %4539 = vst [vmem:[#allocation31_spill] sm:$0xff] %v3912_v62 }
  0xdc   :  { %v267_v34 = vadd.f32 %v265_v18, %v248_v0  ;;  %v268_v37 = vadd.f32 %v266_v20, %v249_v1  ;;  %v321_v46 = vpop.permute.xlu0 %320  ;;  %4538 = vst [vmem:[#allocation30_spill] sm:$0xff] %v3901_v58  ;;  %v3915_v0 = vrot.slane %v2208_v53, %v3733_v11  ;;  %v3918_v1 = vrot.slane %v2209_v54, %v3733_v11 }
  0xdd   :  { %v283_v40 = vpop.permute.xlu1 %282  ;;  %339 = vbcast.lane.b32.xlu1 %v337_v17, 256  ;;  %v322_v28 = vmul.f32 %v321_v46, %v310_v38  ;;  %v323_v50 = vmul.f32 %v321_v46, %v314_v39  ;;  %v2272_v7 = vmul.f32 %v3901_v58, %v2218_v33  ;;  %v432_v17 = vrot.slane %v3767_v27, %v3758_v23 }
  0xde   :  { %v284_v44 = vmul.f32 %v283_v40, %v272_v30  ;;  %v285_v45 = vmul.f32 %v283_v40, %v276_v32  ;;  %3268 = vset.pattern.permute.xlu1 %v4503_v4  ;;  %4540 = vst [vmem:[#allocation32_spill] sm:$0xff] %v3918_v1  ;;  %v508_v40 = vrot.slane %v3780_v31, %v3736_v12 }
  0xe0   :  { %v286_v47 = vadd.f32 %v284_v44, %v267_v34  ;;  %v287_v48 = vadd.f32 %v285_v45, %v268_v37  ;;  %v2248_v6 = vpop.permute.xlu0 %2247  ;;  %v698_v44 = vrot.slane %v3792_v36, %v3744_v16  ;;  %v736_v45 = vrot.slane %v3792_v36, %v3758_v23 }
  0xe1   :  { %v3889_v51 = vpop.permute.xlu1 %2212  ;;  %358 = vbcast.lane.b32.xlu1 %v356_v26, 256  ;;  %v2255_v30 = vmul.f32 %v3915_v0, %v2248_v6  ;;  %v2286_v32 = vmul.f32 %v3918_v1, %v2248_v6  ;;  %v546_v26 = vrot.slane %v3780_v31, %v3744_v16 }
  0xe2   :  { %v305_v29 = vadd.f32 %v303_v42, %v286_v47  ;;  %v306_v52 = vadd.f32 %v304_v43, %v287_v48  ;;  %v584_v42 = vrot.slane %v3780_v31, %v3758_v23  ;;  %v660_v43 = vrot.slane %v3792_v36, %v3736_v12 }
  0xe3   :  { %v774_v47 = vrot.slane %v3792_v36, %v3754_v21 }
  0xe4   :  { %v3893_v56 = vadd.f32 %v322_v28, %v305_v29  ;;  %v3895_v55 = vadd.f32 %v323_v50, %v306_v52  ;;  %v850_v28 = vrot.slane %v3803_v41, %v3744_v16 }
  0xe5   :  { %2172 = vperm.xlu1 %3268, %v3835_v25   ;;  %v2225_v25 = vmul.f32 %v3898_v57, %v2218_v33  ;;  %v470_v33 = vrot.slane %v3767_v27, %v3754_v21  ;;  %v622_v27 = vrot.slane %v3780_v31, %v3754_v21  ;;  %v3949_v46 = vpop.permute.xlu0 %1977  ;;  %v812_v31 = vrot.slane %v3803_v41, %v3736_v12 }
  0xe6   :  { %v3904_v59 = vpop.permute.xlu1 %2227  ;;  %4542 = vst [vmem:[#allocation34_spill] sm:$0xff] %v3949_v46 }
  0xe9   :  { %396 = vbcast.lane.b32.xlu1 %v394_v60, 256  ;;  %v3953_v48 = vpop.permute.xlu0 %377 }
  0xea   :  { %v2232_v10 = vpop.permute.xlu1 %2231  ;;  %3271 = vset.pattern.permute.xlu1 %v4500_v3 }
  0xeb   :  { %v2239_v18 = vmul.f32 %v3909_v61, %v2232_v10  ;;  %v2278_v20 = vmul.f32 %v3912_v62, %v2232_v10 }
  0xed   :  { %v2241_v34 = vadd.f32 %v2239_v18, %v2225_v25  ;;  %v2280_v37 = vadd.f32 %v2278_v20, %v2272_v7  ;;  %434 = vbcast.lane.b32.xlu1 %v432_v17, 256  ;;  %v3959_v50 = vpop.permute.xlu0 %415  ;;  %v1954_v7 = vld [vmem:[%s3622_s30] sm:$0x7]  ;;  %s4557_s30 = sld [smem:[#allocation10_spill]] }
  0xee   :  { %v1915_v17 = vld [vmem:[%s4543_s0] sm:$0x7]  ;;  %v1969_v20 = vrot.slane %v1954_v7, %v3728_v8 }
  0xef   :  { %v3931_v38 = vadd.f32 %v2255_v30, %v2241_v34  ;;  %v3933_v39 = vadd.f32 %v2286_v32, %v2280_v37  ;;  %v1933_v18 = vrot.slane %v1915_v17, %v3736_v12  ;;  %v1983_v30 = vrot.slane %v1954_v7, %v3736_v12 }
  0xf0   :  { %v1924_v32 = vrot.slane %v1915_v17, %v3728_v8  ;;  %v3496_v37 = vmov 1966171168  }
  0xf1   :  { %4541 = vst [vmem:[#allocation33_spill] sm:$0xff] %v3933_v39  ;;  %472 = vbcast.lane.b32.xlu1 %v470_v33, 256  ;;  %v3961_v29 = vpop.permute.xlu0 %453  ;;  %v2046_v33 = vunpack.c.l.s4 %v3496_v37 }
  0xf5   :  { %510 = vbcast.lane.b32.xlu1 %v508_v40, 256  ;;  %v3963_v52 = vpop.permute.xlu0 %491 }
  0xf9   :  { %548 = vbcast.lane.b32.xlu1 %v546_v26, 256  ;;  %v3965_v36 = vpop.permute.xlu0 %529  ;;  %v1943_v26 = vrot.slane %v1915_v17, %v3733_v11 }
  0xfd   :  { %586 = vbcast.lane.b32.xlu1 %v584_v42, 256  ;;  %v3967_v53 = vpop.permute.xlu0 %567  ;;  %v1984_v42 = vmul.f32 %v1983_v30, %v3823_v63 }
 0x101   :  { %624 = vbcast.lane.b32.xlu1 %v622_v27, 256  ;;  %v3969_v54 = vpop.permute.xlu0 %605  ;;  %v1970_v27 = vmul.f32 %v1969_v20, %v3831_v22 }
 0x103   :  { %v1986_v17 = vadd.f32 %v1984_v42, %v1970_v27 }
 0x105   :  { %662 = vbcast.lane.b32.xlu1 %v660_v43, 256  ;;  %v3971_v60 = vpop.permute.xlu0 %643  ;;  %v1999_v43 = vrot.slane %v1954_v7, %v3733_v11 }
 0x107   :  { %v2000_v3 = vmul.f32 %v1999_v43, %v3833_v24  ;;  %v2001_v2 = vmul.f32 %v1999_v43, %v3848_v35 }
 0x109   :  { %700 = vbcast.lane.b32.xlu1 %v698_v44, 256  ;;  %v3973_v6 = vpop.permute.xlu0 %681  ;;  %v2002_v27 = vadd.f32 %v2000_v3, %v1986_v17 }
 0x10d   :  { %738 = vbcast.lane.b32.xlu1 %v736_v45, 256  ;;  %v3975_v25 = vpop.permute.xlu0 %719 }
 0x111   :  { %776 = vbcast.lane.b32.xlu1 %v774_v47, 256  ;;  %v3978_v10 = vpop.permute.xlu0 %757  ;;  %v2047_v47 = vunpack.c.0.s8 %v2046_v33 }
 0x113   :  { %v3996_v7 = vsub.s32 %v2047_v47, %v3719_v5 }
 0x115   :  { %814 = vbcast.lane.b32.xlu1 %v812_v31, 256  ;;  %v3989_v44 = vpop.permute.xlu0 %795  ;;  %v1971_v31 = vmul.f32 %v1969_v20, %v3813_v49  ;;  %v4003_v20 = vld [vmem:[%s3522_s5 + $0x30] sm:$0xff] }
 0x116   :  { %v333_v42 = vrot.slane %v4003_v20, %v3728_v8  ;;  %v371_v17 = vrot.slane %v4003_v20, %v3733_v11 }
 0x119   :  { %852 = vbcast.lane.b32.xlu1 %v850_v28, 256  ;;  %v1985_v28 = vmul.f32 %v1983_v30, %v3949_v46  ;;  %v4005_v30 = vpop.permute.xlu0 %833 }
 0x14a   :  { %v1919_v41 = vpop.permute.xlu1 %1918 }
 0x14b   :  { %v1925_v45 = vmul.f32 %v1924_v32, %v1919_v41  ;;  %v1987_v41 = vadd.f32 %v1985_v28, %v1971_v31  ;;  %v4000_v32 = vld [vmem:[%s3522_s5 + $0x8] sm:$0xff] }
 0x14c   :  { %v348_v28 = vrot.slane %v4000_v32, %v3736_v12  ;;  %v367_v3 = vrot.slane %v4000_v32, %v3733_v11 }
 0x14d   :  { %v2003_v47 = vadd.f32 %v2001_v2, %v1987_v41  ;;  %v2182_v2 = vpop.permute.xlu0 %2181 }
 0x14f   :  { %v1928_v34 = vpop.permute.xlu1 %1927 }
 0x150   :  { %v1934_v40 = vmul.f32 %v1933_v18, %v1928_v34 }
 0x152   :  { %v1935_v18 = vadd.f32 %v1934_v40, %v1925_v45  ;;  %v3124_v45 = vld [vmem:[%s4545_s13] ss:$0 sm:$0xff] }
 0x153   :  { %v2011_v41 = vadd.f32 %v3124_v45, %v2002_v27  ;;  %v2012_v62 = vadd.f32 %v3124_v45, %v2003_v47  ;;  %v2192_v45 = vpop.permute.xlu0 %2191 }
 0x154   :  { %v1938_v37 = vpop.permute.xlu1 %1937 }
 0x155   :  { %v1944_v34 = vmul.f32 %v1943_v26, %v1938_v37  ;;  %v329_v26 = vrot.slane %v4000_v32, %v3728_v8  ;;  %v352_v37 = vrot.slane %v4003_v20, %v3736_v12 }
 0x157   :  { %v1945_v4 = vadd.f32 %v1944_v34, %v1935_v18  ;;  %v2169_v18 = vld [vmem:[%s4546_s17] sm:$0x7] }
 0x158   :  { %v4007_v33 = vpop.permute.xlu1 %2243 }
 0x159   :  { %v1953_v40 = vadd.f32 %v3123_v9, %v1945_v4 }
 0x15b   :  { %v2051_v43 = vrot.slane %v1953_v40, %v3996_v7 }
 0x15c   :  { %v340_v31 = vpop.permute.xlu1 %339 }
 0x15d   :  { %v341_v4 = vmul.f32 %v340_v31, %v329_v26  ;;  %v342_v9 = vmul.f32 %v340_v31, %v333_v42  ;;  %v2059_v34 = vrot.slane %v2051_v43, %v3996_v7  ;;  %v2052_v15 = vcombine.high %v2051_v43, %v2051_v43 }
 0x15e   :  { %v2187_v42 = vrot.slane %v2169_v18, %v3736_v12  ;;  %v2178_v43 = vrot.slane %v2169_v18, %v3728_v8 }
 0x15f   :  { %v343_v40 = vadd.f32 %v341_v4, %v3893_v56  ;;  %v344_v39 = vadd.f32 %v342_v9, %v3895_v55  ;;  %v2070_v1 = vrot.slane %v2059_v34, %v3728_v8  ;;  %v2066_v26 = vrot.slane %v2052_v15, %v3996_v7 }
 0x160   :  { %v359_v31 = vpop.permute.xlu1 %358  ;;  %v379_v56 = vmul.f32 %v3953_v48, %v367_v3  ;;  %v380_v55 = vmul.f32 %v3953_v48, %v371_v17  ;;  %v2197_v4 = vrot.slane %v2169_v18, %v3733_v11  ;;  %v2188_v49 = vmul.f32 %v2187_v42, %v2182_v2  ;;  %v4053_v17 = vld [vmem:[%s3522_s5 + $0x38] sm:$0xff]  ;;  %v3127_v42 = vld [vmem:[%s4547_s21] ss:$0 sm:$0xff] }
 0x161   :  { %v360_v58 = vmul.f32 %v359_v31, %v348_v28  ;;  %v361_v35 = vmul.f32 %v359_v31, %v352_v37  ;;  %v2077_v46 = vmul.f32 %v2070_v1, %v2011_v41  ;;  %v2074_v27 = vrot.slane %v2066_v26, %v3728_v8  ;;  %v4041_v37 = vld [vmem:[%s3522_s5 + $0x10] sm:$0xff] }
 0x162   :  { %v386_v1 = vrot.slane %v4000_v32, %v3744_v16  ;;  %v390_v28 = vrot.slane %v4003_v20, %v3744_v16  ;;  %v443_v18 = vrot.slane %v4000_v32, %v3740_v14  ;;  %v447_v3 = vrot.slane %v4003_v20, %v3740_v14 }
 0x163   :  { %v362_v15 = vadd.f32 %v360_v58, %v343_v40  ;;  %v363_v9 = vadd.f32 %v361_v35, %v344_v39  ;;  %v2080_v34 = vsel %vm2079_vm0, %v2077_v46, 0.0  ;;  %v2078_v24 = vmul.f32 %v2074_v27, %v2012_v62 }
 0x164   :  { %v2173_v47 = vpop.permute.xlu1 %2172  ;;  %2081 = vadd.xlane.f32.xlu0 %v2080_v34  ;;  %v405_v62 = vrot.slane %v4000_v32, %v3749_v19  ;;  %v409_v46 = vrot.slane %v4003_v20, %v3749_v19  ;;  %v2198_v2 = vmul.f32 %v2197_v4, %v2192_v45  ;;  %v2238_v40 = vmul.f32 %v3909_v61, %v3904_v59 }
 0x165   :  { %v2179_v48 = vmul.f32 %v2178_v43, %v2173_v47  ;;  %v2083_v35 = vsel %vm2079_vm0, %v2078_v24, 0.0  ;;  %v381_v58 = vadd.f32 %v379_v56, %v362_v15  ;;  %v382_v39 = vadd.f32 %v380_v55, %v363_v9 }
 0x166   :  { %2084 = vadd.xlane.f32.xlu1 %v2083_v35  ;;  %v2224_v24 = vmul.f32 %v3898_v57, %v3889_v51  ;;  %v481_v26 = vrot.slane %v4041_v37, %v3728_v8  ;;  %v424_v43 = vrot.slane %v4000_v32, %v3758_v23  ;;  %v417_v57 = vmul.f32 %v3959_v50, %v405_v62 }
 0x167   :  { %v2189_v41 = vadd.f32 %v2188_v49, %v2179_v48  ;;  %v428_v49 = vrot.slane %v4003_v20, %v3758_v23  ;;  %v485_v61 = vrot.slane %v4053_v17, %v3728_v8  ;;  %v2254_v15 = vmul.f32 %v3915_v0, %v4007_v33 }
 0x168   :  { %v397_v31 = vpop.permute.xlu1 %396  ;;  %v418_v9 = vmul.f32 %v3959_v50, %v409_v46  ;;  %v523_v48 = vrot.slane %v4053_v17, %v3733_v11  ;;  %v462_v62 = vrot.slane %v4000_v32, %v3754_v21  ;;  %v455_v50 = vmul.f32 %v3961_v29, %v443_v18 }
 0x169   :  { %v2199_v27 = vadd.f32 %v2198_v2, %v2189_v41  ;;  %v398_v56 = vmul.f32 %v397_v31, %v386_v1  ;;  %v399_v55 = vmul.f32 %v397_v31, %v390_v28  ;;  %v3128_v1 = vld [vmem:[%s4548_s29] ss:$0 sm:$0xff]  ;;  %v2240_v28 = vadd.f32 %v2238_v40, %v2224_v24 }
 0x16a   :  { %v466_v2 = vrot.slane %v4003_v20, %v3754_v21  ;;  %v2266_v46 = vadd.f32 %v3128_v1, %v3931_v38  ;;  %v456_v24 = vmul.f32 %v3961_v29, %v447_v3  ;;  %v500_v32 = vrot.slane %v4041_v37, %v3736_v12 }
 0x16b   :  { %v2207_v34 = vadd.f32 %v3127_v42, %v2199_v27  ;;  %v400_v45 = vadd.f32 %v398_v56, %v381_v58  ;;  %v401_v47 = vadd.f32 %v399_v55, %v382_v39  ;;  %v2256_v58 = vadd.f32 %v2254_v15, %v2240_v28  ;;  %v3295_v15 = vld [vmem:[%s4549_s3 + $0x44] ss:$8 sps:$4 sm:$0xff]   ;;  %v3299_v28 = vld [vmem:[%s4549_s3 + $0x40] ss:$8 sps:$4 sm:$0xff]  }
 0x16c   :  { %v435_v35 = vpop.permute.xlu1 %434  ;;  %v493_v20 = vmul.f32 %v3963_v52, %v481_v26  ;;  %v504_v18 = vrot.slane %v4053_v17, %v3736_v12  ;;  %945 = vmatprep.subr.bf16.mxu0 %v3295_v15 }
 0x16d   :  { %v419_v41 = vadd.f32 %v417_v57, %v400_v45  ;;  %v420_v31 = vadd.f32 %v418_v9, %v401_v47  ;;  %v436_v0 = vmul.f32 %v435_v35, %v424_v43  ;;  %v437_v4 = vmul.f32 %v435_v35, %v428_v49  ;;  %v3297_v9 = vld [vmem:[%s4549_s3 + $0x4] ss:$8 sps:$4 sm:$0xff]   ;;  %v3300_v35 = vld [vmem:[%s4549_s3] ss:$8 sps:$4 sm:$0xff]   ;;  %946 = vmatpush1.bf16.msra.mxu0 %v3299_v28 }
 0x16e   :  { %v2305_v39 = vrot.slane %v2207_v34, %v3996_v7  ;;  %v494_v49 = vmul.f32 %v3963_v52, %v485_v61  ;;  %v2265_v57 = vadd.f32 %v3128_v1, %v2256_v58  ;;  %v538_v47 = vrot.slane %v4041_v37, %v3744_v16  ;;  %1032 = vmatprep.subr.bf16.mxu1 %v3297_v9  ;;  %v3307_v9 = vld [vmem:[%s4549_s3 + $0x64] ss:$8 sps:$4 sm:$0xff]  }
 0x16f   :  { %v438_v40 = vadd.f32 %v436_v0, %v419_v41  ;;  %v439_v42 = vadd.f32 %v437_v4, %v420_v31  ;;  %v542_v52 = vrot.slane %v4053_v17, %v3744_v16  ;;  %v557_v0 = vrot.slane %v4041_v37, %v3749_v19  ;;  %1033 = vmatpush1.bf16.msra.mxu1 %v3300_v35  ;;  %v4135_v28 = vld [vmem:[%s3522_s5 + $0x40] sm:$0xff] }
 0x170   :  { %v473_v43 = vpop.permute.xlu1 %472  ;;  %v2313_v27 = vrot.slane %v2305_v39, %v3996_v7  ;;  %v2306_v56 = vcombine.high %v2305_v39, %v2305_v39 }
 0x171   :  { %v457_v38 = vadd.f32 %v455_v50, %v438_v40  ;;  %v458_v29 = vadd.f32 %v456_v24, %v439_v42  ;;  %v474_v3 = vmul.f32 %v473_v43, %v462_v62  ;;  %v475_v55 = vmul.f32 %v473_v43, %v466_v2  ;;  %v3301_v24 = vld [vmem:[%s4549_s3 + $0x54] ss:$8 sps:$4 sm:$0xff]  }
 0x172   :  { %v2324_v4 = vrot.slane %v2313_v27, %v3728_v8  ;;  %v2320_v26 = vrot.slane %v2306_v56, %v3996_v7  ;;  %v561_v50 = vrot.slane %v4053_v17, %v3749_v19  ;;  %v3303_v40 = vld [vmem:[%s4549_s3 + $0x14] ss:$8 sps:$4 sm:$0xff]   ;;  %v4551_v42 = vrot.slane %v4041_v37, %v3733_v11  ;;  %v2991_v27 = vld [vmem:[%s4550_s8] ss:$0 sm:$0xff]  ;;  %v3305_v56 = vld [vmem:[%s4549_s3 + $0x50] ss:$8 sps:$4 sm:$0xff]   ;;  %947 = vmatprep.subr.bf16.mxu0 %v3301_v24 }
 0x173   :  { %v476_v34 = vadd.f32 %v474_v3, %v457_v38  ;;  %v477_v45 = vadd.f32 %v475_v55, %v458_v29  ;;  %v3306_v38 = vld [vmem:[%s4549_s3 + $0x10] ss:$8 sps:$4 sm:$0xff]   ;;  %v580_v3 = vrot.slane %v4053_v17, %v3758_v23  ;;  %1034 = vmatprep.subr.bf16.mxu1 %v3303_v40  ;;  %948 = vmatpush1.bf16.msra.mxu0 %v3305_v56 }
 0x174   :  { %v511_v41 = vpop.permute.xlu1 %510  ;;  %v2331_v62 = vmul.f32 %v2324_v4, %v2265_v57  ;;  %v2328_v61 = vrot.slane %v2320_v26, %v3728_v8  ;;  %v4123_v55 = vld [vmem:[%s3522_s5 + $0x18] sm:$0xff]  ;;  %v595_v4 = vrot.slane %v4041_v37, %v3740_v14  ;;  %v599_v26 = vrot.slane %v4053_v17, %v3740_v14  ;;  %1035 = vmatpush1.bf16.msra.mxu1 %v3306_v38 }
 0x175   :  { %v495_v7 = vadd.f32 %v493_v20, %v476_v34  ;;  %v496_v1 = vadd.f32 %v494_v49, %v477_v45  ;;  %v512_v2 = vmul.f32 %v511_v41, %v500_v32  ;;  %v513_v31 = vmul.f32 %v511_v41, %v504_v18  ;;  %v3309_v34 = vld [vmem:[%s4549_s3 + $0x24] ss:$8 sps:$4 sm:$0xff]   ;;  %949 = vmatprep.subr.bf16.mxu0 %v3307_v9  ;;  %v3318_v40 = vld [vmem:[%s4549_s3 + $0x30] ss:$8 sps:$4 sm:$0xff]  }
 0x176   :  { %v2334_v58 = vsel %vm2333_vm1, %v2331_v62, 0.0  ;;  %v2332_v39 = vmul.f32 %v2328_v61, %v2266_v46  ;;  %v531_v32 = vmul.f32 %v3965_v36, %v4551_v42  ;;  %v532_v20 = vmul.f32 %v3965_v36, %v523_v48  ;;  %v3311_v62 = vld [vmem:[%s4549_s3 + $0x60] ss:$8 sps:$4 sm:$0xff]   ;;  %1036 = vmatprep.subr.bf16.mxu1 %v3309_v34  ;;  %v3321_v42 = vld [vmem:[%s4549_s3 + $0x84] ss:$8 sps:$4 sm:$0xff]  }
 0x177   :  { %v514_v43 = vadd.f32 %v512_v2, %v495_v7  ;;  %v515_v18 = vadd.f32 %v513_v31, %v496_v1  ;;  %2335 = vadd.xlane.f32.xlu1 %v2334_v58  ;;  %v576_v46 = vrot.slane %v4041_v37, %v3758_v23  ;;  %v569_v45 = vmul.f32 %v3967_v53, %v557_v0  ;;  %v3315_v58 = vld [vmem:[%s4549_s3 + $0x34] ss:$8 sps:$4 sm:$0xff]  }
 0x178   :  { %v549_v29 = vpop.permute.xlu1 %548  ;;  %v2337_v15 = vsel %vm2333_vm1, %v2332_v39, 0.0  ;;  %v614_v7 = vrot.slane %v4041_v37, %v3754_v21  ;;  %v618_v1 = vrot.slane %v4053_v17, %v3754_v21  ;;  %950 = vmatpush1.bf16.msra.mxu0 %v3311_v62  ;;  %v3317_v39 = vld [vmem:[%s4549_s3 + $0x70] ss:$8 sps:$4 sm:$0xff]   ;;  %v607_v24 = vmul.f32 %v3969_v54, %v595_v4 }
 0x179   :  { %v533_v36 = vadd.f32 %v531_v32, %v514_v43  ;;  %v534_v48 = vadd.f32 %v532_v20, %v515_v18  ;;  %v550_v49 = vmul.f32 %v549_v29, %v538_v47  ;;  %v551_v57 = vmul.f32 %v549_v29, %v542_v52  ;;  %v3312_v52 = vld [vmem:[%s4549_s3 + $0x20] ss:$8 sps:$4 sm:$0xff]   ;;  %v3324_v18 = vld [vmem:[%s4549_s3 + $0xc4] ss:$8 sps:$4 sm:$0xff]  }
 0x17a   :  { %864 = vbcast.lane.b32.xlu0 %v2991_v27, 256  ;;  %v570_v47 = vmul.f32 %v3967_v53, %v561_v50  ;;  %v3313_v50 = vld [vmem:[%s4549_s3 + $0x74] ss:$8 sps:$4 sm:$0xff]   ;;  %v633_v37 = vrot.slane %v4123_v55, %v3728_v8  ;;  %v637_v17 = vrot.slane %v4135_v28, %v3728_v8  ;;  %1037 = vmatpush1.bf16.msra.mxu1 %v3312_v52 }
 0x17b   :  { %v552_v35 = vadd.f32 %v550_v49, %v533_v36  ;;  %v553_v41 = vadd.f32 %v551_v57, %v534_v48  ;;  %2338 = vadd.xlane.f32.xlu1 %v2337_v15  ;;  %v608_v32 = vmul.f32 %v3969_v54, %v599_v26  ;;  %951 = vmatprep.subr.bf16.mxu0 %v3313_v50 }
 0x17c   :  { %v587_v61 = vpop.permute.xlu1 %586  ;;  %1038 = vmatprep.subr.bf16.mxu1 %v3315_v58  ;;  %v652_v56 = vrot.slane %v4123_v55, %v3736_v12  ;;  %v656_v38 = vrot.slane %v4135_v28, %v3736_v12  ;;  %952 = vmatpush1.bf16.msra.mxu0 %v3317_v39  ;;  %v671_v54 = vrot.slane %v4123_v55, %v3733_v11 }
 0x17d   :  { %v571_v53 = vadd.f32 %v569_v45, %v552_v35  ;;  %v572_v2 = vadd.f32 %v570_v47, %v553_v41  ;;  %v588_v31 = vmul.f32 %v587_v61, %v576_v46  ;;  %v589_v0 = vmul.f32 %v587_v61, %v580_v3  ;;  %1129 = vmatprep.subr.bf16.mxu0 %v3321_v42  ;;  %v170_v42 = vld [vmem:[%s3522_s5 + $0x48] sm:$0xf] }
 0x17e   :  { %v675_v48 = vrot.slane %v4135_v28, %v3733_v11  ;;  %1039 = vmatpush1.bf16.msra.mxu1 %v3318_v40  ;;  %v645_v49 = vmul.f32 %v3971_v60, %v633_v37  ;;  %v646_v57 = vmul.f32 %v3971_v60, %v637_v17  ;;  %v690_v9 = vrot.slane %v4123_v55, %v3744_v16  ;;  %v165_v40 = vld [vmem:[%s3522_s5 + $0x20] sm:$0xf]  ;;  %s4552_s5 = sld [smem:[#allocation5_spill]] }
 0x17f   :  { %v590_v20 = vadd.f32 %v588_v31, %v571_v53  ;;  %v591_v43 = vadd.f32 %v589_v0, %v572_v2  ;;  %1228 = vmatprep.subr.bf16.mxu1 %v3324_v18  ;;  %v694_v34 = vrot.slane %v4135_v28, %v3744_v16  ;;  %v709_v62 = vrot.slane %v4123_v55, %v3749_v19 }
 0x180   :  { %v625_v27 = vpop.permute.xlu1 %624  ;;  %v713_v60 = vrot.slane %v4135_v28, %v3749_v19  ;;  %v683_v52 = vmul.f32 %v3973_v6, %v671_v54  ;;  %v684_v61 = vmul.f32 %v3973_v6, %v675_v48  ;;  %v728_v2 = vrot.slane %v4123_v55, %v3758_v23 }
 0x181   :  { %v609_v29 = vadd.f32 %v607_v24, %v590_v20  ;;  %v610_v46 = vadd.f32 %v608_v32, %v591_v43  ;;  %v626_v3 = vmul.f32 %v625_v27, %v614_v7  ;;  %v627_v36 = vmul.f32 %v625_v27, %v618_v1 }
 0x182   :  { %v732_v31 = vrot.slane %v4135_v28, %v3758_v23  ;;  %v747_v24 = vrot.slane %v4123_v55, %v3740_v14  ;;  %v751_v37 = vrot.slane %v4135_v28, %v3740_v14  ;;  %v721_v6 = vmul.f32 %v3975_v25, %v709_v62 }
 0x183   :  { %v628_v4 = vadd.f32 %v626_v3, %v609_v29  ;;  %v629_v26 = vadd.f32 %v627_v36, %v610_v46  ;;  %v722_v17 = vmul.f32 %v3975_v25, %v713_v60  ;;  %v766_v18 = vrot.slane %v4123_v55, %v3754_v21 }
 0x184   :  { %v663_v15 = vpop.permute.xlu1 %662  ;;  %v770_v27 = vrot.slane %v4135_v28, %v3754_v21  ;;  %v785_v3 = vrot.slane %v165_v40, %v3728_v8  ;;  %v789_v36 = vrot.slane %v170_v42, %v3728_v8  ;;  %v759_v25 = vmul.f32 %v3978_v10, %v747_v24 }
 0x185   :  { %v647_v45 = vadd.f32 %v645_v49, %v628_v4  ;;  %v648_v47 = vadd.f32 %v646_v57, %v629_v26  ;;  %v664_v35 = vmul.f32 %v663_v15, %v652_v56  ;;  %v665_v41 = vmul.f32 %v663_v15, %v656_v38 }
 0x186   :  { %v760_v54 = vmul.f32 %v3978_v10, %v751_v37  ;;  %v804_v55 = vrot.slane %v165_v40, %v3736_v12  ;;  %v808_v4 = vrot.slane %v170_v42, %v3736_v12  ;;  %v4553_v24 = vlaneseq }
 0x187   :  { %v666_v7 = vadd.f32 %v664_v35, %v647_v45  ;;  %v667_v1 = vadd.f32 %v665_v41, %v648_v47  ;;  %v827_v45 = vrot.slane %v170_v42, %v3733_v11  ;;  %v797_v47 = vmul.f32 %v3989_v44, %v785_v3 }
 0x188   :  { %v701_v53 = vpop.permute.xlu1 %700  ;;  %v798_v35 = vmul.f32 %v3989_v44, %v789_v36  ;;  %v846_v44 = vrot.slane %v170_v42, %v3744_v16  ;;  %v2092_v37 = vand.u32 127, %v4553_v24 }
 0x189   :  { %v685_v0 = vadd.f32 %v683_v52, %v666_v7  ;;  %v686_v50 = vadd.f32 %v684_v61, %v667_v1  ;;  %v702_v58 = vmul.f32 %v701_v53, %v690_v9  ;;  %v703_v39 = vmul.f32 %v701_v53, %v694_v34 }
 0x18a   :  { %v823_v34 = vrot.slane %v165_v40, %v3733_v11  ;;  %v836_v53 = vmul.f32 %v4005_v30, %v827_v45 }
 0x18b   :  { %v704_v32 = vadd.f32 %v702_v58, %v685_v0  ;;  %v705_v20 = vadd.f32 %v703_v39, %v686_v50  ;;  %v842_v58 = vrot.slane %v165_v40, %v3744_v16 }
 0x18c   :  { %v739_v43 = vpop.permute.xlu1 %738  ;;  %v835_v1 = vmul.f32 %v4005_v30, %v823_v34 }
 0x18d   :  { %v723_v56 = vadd.f32 %v721_v6, %v704_v32  ;;  %v724_v38 = vadd.f32 %v722_v17, %v705_v20  ;;  %v740_v29 = vmul.f32 %v739_v43, %v728_v2  ;;  %v741_v46 = vmul.f32 %v739_v43, %v732_v31 }
 0x18e   :  { %v4207_v20 = vsub.s32 %v2092_v37, %v3719_v5 }
 0x18f   :  { %v742_v48 = vadd.f32 %v740_v29, %v723_v56  ;;  %v743_v49 = vadd.f32 %v741_v46, %v724_v38  ;;  %v1894_v38 = vld [vmem:[%s4552_s5] sm:$0x3] }
 0x190   :  { %v777_v57 = vpop.permute.xlu1 %776  ;;  %vm2088_vm3 = vcmp.gt.f32.partialorder %v1894_v38, 0.0 }
 0x191   :  { %v761_v28 = vadd.f32 %v759_v25, %v742_v48  ;;  %v762_v26 = vadd.f32 %v760_v54, %v743_v49  ;;  %v778_v15 = vmul.f32 %v777_v57, %v766_v18  ;;  %v779_v9 = vmul.f32 %v777_v57, %v770_v27 }
 0x193   :  { %v780_v10 = vadd.f32 %v778_v15, %v761_v28  ;;  %v781_v41 = vadd.f32 %v779_v9, %v762_v26 }
 0x194   :  { %v815_v62 = vpop.permute.xlu1 %814 }
 0x195   :  { %v799_v60 = vadd.f32 %v797_v47, %v780_v10  ;;  %v800_v52 = vadd.f32 %v798_v35, %v781_v41  ;;  %v816_v61 = vmul.f32 %v815_v62, %v804_v55  ;;  %v817_v7 = vmul.f32 %v815_v62, %v808_v4 }
 0x197   :  { %v818_v2 = vadd.f32 %v816_v61, %v799_v60  ;;  %v819_v31 = vadd.f32 %v817_v7, %v800_v52  ;;  %v3319_v60 = vld [vmem:[%s4549_s3 + $0x80] ss:$8 sps:$4 sm:$0xff]  }
 0x198   :  { %v853_v39 = vpop.permute.xlu1 %852  ;;  %v3322_v52 = vld [vmem:[%s4549_s3 + $0xc0] ss:$8 sps:$4 sm:$0xff]  }
 0x199   :  { %v837_v0 = vadd.f32 %v835_v1, %v818_v2  ;;  %v838_v50 = vadd.f32 %v836_v53, %v819_v31  ;;  %v854_v6 = vmul.f32 %v853_v39, %v842_v58  ;;  %v855_v17 = vmul.f32 %v853_v39, %v846_v44 }
 0x19b   :  { %v856_v27 = vadd.f32 %v854_v6, %v837_v0  ;;  %v857_v56 = vadd.f32 %v855_v17, %v838_v50  ;;  %v3327_v0 = vld [vmem:[%s4549_s3 + $0x94] ss:$8 sps:$4 sm:$0xff]  }
 0x19c   :  { %v3330_v50 = vld [vmem:[%s4549_s3 + $0xd4] ss:$8 sps:$4 sm:$0xff]  }
 0x1f1   :  { %v2082_v32 = vpop.xlane.xlu0 %2081 }
 0x1f2   :  { %v2086_v43 = vmul.f32 0.125, %v2082_v32 }
 0x1f3   :  { %v2085_v30 = vpop.xlane.xlu1 %2084 }
 0x1f4   :  { %v2087_v18 = vmul.f32 0.125, %v2085_v30  ;;  %v2096_v3 = vrot.slane %v2086_v43, %v4207_v20  ;;  %v3325_v43 = vld [vmem:[%s4549_s3 + $0x90] ss:$8 sps:$4 sm:$0xff]  }
 0x1f5   :  { %v865_v29 = vpop.permute.xlu0 %864  ;;  %v3328_v30 = vld [vmem:[%s4549_s3 + $0xd0] ss:$8 sps:$4 sm:$0xff]  }
 0x1f6   :  { %v2100_v40 = vrot.slane %v2087_v18, %v4207_v20  ;;  %v866_v46 = vadd.f32 %v865_v29, %v856_v27  ;;  %v867_v42 = vadd.f32 %v865_v29, %v857_v56  ;;  %v3333_v27 = vld [vmem:[%s4549_s3 + $0xa4] ss:$8 sps:$4 sm:$0xff]  }
 0x1f7   :  { %v3336_v56 = vld [vmem:[%s4549_s3 + $0xe4] ss:$8 sps:$4 sm:$0xff]  }
 0x1f8   :  { %vm868_vm5 = vcmp.gt.f32.partialorder %v866_v46, 0.0  ;;  %vm869_vm6 = vcmp.gt.f32.partialorder %v867_v42, 0.0  ;;  %v870_v36 = vmul.f32 0.01, %v866_v46  ;;  %v871_v25 = vmul.f32 0.01, %v867_v42 }
 0x1f9   :  { %v2101_v54 = vsel %vm898_vm2, %v2100_v40, %v2096_v3  ;;  %v2148_v3 = vld [vmem:[%s4554_s19] sm:$0x3] }
 0x1fa   :  { %v872_v48 = vsel %vm868_vm5, %v866_v46, %v870_v36  ;;  %v873_v49 = vsel %vm869_vm6, %v867_v42, %v871_v25  ;;  %v4213_v57 = vsel %vm2088_vm3, %v2101_v54, -1e+09  ;;  %v4555_v46 = vmov 0   ;;  %v3331_v25 = vld [vmem:[%s4549_s3 + $0xa0] ss:$8 sps:$4 sm:$0xff]  }
 0x1fb   :  { %v874_v55 = vpack.c.bf16 %v872_v48, %v872_v48  ;;  %v875_v4 = vpack.c.bf16 %v873_v49, %v873_v49  ;;  %v2105_v28 = vsel %vm2104_vm4, %v4213_v57, -inf  ;;  %v3334_v54 = vld [vmem:[%s4549_s3 + $0xe0] ss:$8 sps:$4 sm:$0xff]   ;;  %v3339_v48 = vld [vmem:[%s4549_s3 + $0xb4] ss:$8 sps:$4 sm:$0xff]   ;;  %vm2342_vm8 = vcmp.gt.f32.partialorder %v2148_v3, 0.0 }
 0x1fc   :  { %2106 = vmax.xlane.f32.xlu1 %v2105_v28  ;;  %v3342_v49 = vld [vmem:[%s4549_s3 + $0xf4] ss:$8 sps:$4 sm:$0xff]   ;;  %vm2936_vm3 = vcmask 519170  }
 0x1fd   :  { %v895_v26 = vunpack.c.l.b16 %v874_v55  ;;  %v896_v15 = vunpack.c.l.b16 %v875_v4  ;;  %v3387_v3 = vld [vmem:[%s4549_s3 + $0x1b4] ss:$8 sps:$4 sm:$0xff]  }
 0x1ff   :  { %v897_v9 = vrot.slane %v895_v26, 1  ;;  %v986_v34 = vrot.slane %v896_v15, 7  ;;  %v1082_v45 = vrot.slane %v895_v26, 2  ;;  %v1083_v47 = vrot.slane %v896_v15, 1 }
 0x200   :  { %v1181_v35 = vrot.slane %v895_v26, 3  ;;  %v1182_v10 = vrot.slane %v896_v15, 2  ;;  %v1280_v41 = vrot.slane %v895_v26, 4  ;;  %v1281_v62 = vrot.slane %v896_v15, 3 }
 0x201   :  { %v899_v61 = vsel %vm898_vm2, %v896_v15, %v897_v9  ;;  %v987_v7 = vsel %vm898_vm2, %v986_v34, %v895_v26  ;;  %v4222_v1 = vsel %vm898_vm2, %v1083_v47, %v1082_v45  ;;  %v1379_v53 = vrot.slane %v895_v26, 5  ;;  %v3345_v34 = vld [vmem:[%s4549_s3 + $0x104] ss:$8 sps:$4 sm:$0xff]   ;;  %v3343_v47 = vld [vmem:[%s4549_s3 + $0x100] ss:$8 sps:$4 sm:$0xff]  }
 0x202   :  { %v900_v2 = vpack.c.b16 %v899_v61, %v899_v61  ;;  %v988_v31 = vpack.c.b16 %v987_v7, %v987_v7  ;;  %v4227_v58 = vsel %vm898_vm2, %v1182_v10, %v1181_v35  ;;  %v4230_v44 = vsel %vm898_vm2, %v1281_v62, %v1280_v41  ;;  %v3348_v45 = vld [vmem:[%s4549_s3 + $0x144] ss:$8 sps:$4 sm:$0xff]   ;;  %v3346_v35 = vld [vmem:[%s4549_s3 + $0x140] ss:$8 sps:$4 sm:$0xff]   ;;  %v3351_v62 = vld [vmem:[%s4549_s3 + $0x114] ss:$8 sps:$4 sm:$0xff]  }
 0x203   :  { %v1380_v39 = vrot.slane %v896_v15, 4  ;;  %v1478_v24 = vrot.slane %v895_v26, 6  ;;  %v1479_v6 = vrot.slane %v896_v15, 5  ;;  %v1577_v17 = vrot.slane %v895_v26, 7  ;;  %v3337_v26 = vld [vmem:[%s4549_s3 + $0xb0] ss:$8 sps:$4 sm:$0xff]  }
 0x204   :  { %v2336_v37 = vpop.xlane.xlu1 %2335  ;;  %3008 = vmatmul.mubr.msk.bf16.vlgmr.msra.gmra.mrb[0].mxu0 %vm941_vm7, %v900_v2  ;;  %3017 = vmatmul.mubr.msk.bf16.vlgmr.msra.gmra.mrb[0].mxu1 %vm941_vm7, %v988_v31  ;;  %v1578_v32 = vrot.slane %v896_v15, 6  ;;  %v3340_v15 = vld [vmem:[%s4549_s3 + $0xf0] ss:$8 sps:$4 sm:$0xff]   ;;  %v1085_v10 = vpack.c.b16 %v4222_v1, %v4222_v1  ;;  %v1184_v41 = vpack.c.b16 %v4227_v58, %v4227_v58  ;;  %v3357_v7 = vld [vmem:[%s4549_s3 + $0x124] ss:$8 sps:$4 sm:$0xff]  }
 0x205   :  { %1130 = vmatpush1.bf16.msra.mxu0 %v3319_v60  ;;  %1229 = vmatpush1.bf16.msra.mxu1 %v3322_v52  ;;  %v4237_v18 = vsel %vm898_vm2, %v1380_v39, %v1379_v53  ;;  %v4242_v38 = vsel %vm898_vm2, %v1479_v6, %v1478_v24  ;;  %v2340_v40 = vmul.f32 0.125, %v2336_v37  ;;  %v3354_v60 = vld [vmem:[%s4549_s3 + $0x154] ss:$8 sps:$4 sm:$0xff]   ;;  %v3349_v52 = vld [vmem:[%s4549_s3 + $0x110] ss:$8 sps:$4 sm:$0xff]  }
 0x206   :  { %1131 = vmatprep.subr.bf16.mxu0 %v3327_v0  ;;  %1230 = vmatprep.subr.bf16.mxu1 %v3330_v50  ;;  %v4245_v29 = vsel %vm898_vm2, %v1578_v32, %v1577_v17  ;;  %v3352_v61 = vld [vmem:[%s4549_s3 + $0x150] ss:$8 sps:$4 sm:$0xff]   ;;  %v3360_v1 = vld [vmem:[%s4549_s3 + $0x164] ss:$8 sps:$4 sm:$0xff]   ;;  %v3355_v53 = vld [vmem:[%s4549_s3 + $0x120] ss:$8 sps:$4 sm:$0xff]   ;;  %v1283_v17 = vpack.c.b16 %v4230_v44, %v4230_v44  ;;  %v1382_v32 = vpack.c.b16 %v4237_v18, %v4237_v18 }
 0x207   :  { %1161 = vmatprep.mubr.bf16.mxu0 %v4555_v46  ;;  %1260 = vmatprep.mubr.bf16.mxu1 %v4555_v46  ;;  %v2348_v55 = vrot.slane %v2340_v40, %v4207_v20  ;;  %v3358_v2 = vld [vmem:[%s4549_s3 + $0x160] ss:$8 sps:$4 sm:$0xff]   ;;  %v3363_v31 = vld [vmem:[%s4549_s3 + $0x134] ss:$8 sps:$4 sm:$0xff]   ;;  %v3361_v50 = vld [vmem:[%s4549_s3 + $0x130] ss:$8 sps:$4 sm:$0xff]  }
 0x208   :  { %v2339_v42 = vpop.xlane.xlu1 %2338  ;;  %v3366_v0 = vld [vmem:[%s4549_s3 + $0x174] ss:$8 sps:$4 sm:$0xff]   ;;  %v3364_v58 = vld [vmem:[%s4549_s3 + $0x170] ss:$8 sps:$4 sm:$0xff]   ;;  %v3369_v39 = vld [vmem:[%s4549_s3 + $0x184] ss:$8 sps:$4 sm:$0xff]  }
 0x209   :  { %v2341_v36 = vmul.f32 0.125, %v2339_v42  ;;  %1132 = vmatpush1.bf16.msra.mxu0 %v3325_v43  ;;  %1231 = vmatpush1.bf16.msra.mxu1 %v3328_v30  ;;  %v3372_v24 = vld [vmem:[%s4549_s3 + $0x1c4] ss:$8 sps:$4 sm:$0xff]   ;;  %v3367_v37 = vld [vmem:[%s4549_s3 + $0x180] ss:$8 sps:$4 sm:$0xff]  }
 0x20a   :  { %1133 = vmatprep.subr.bf16.mxu0 %v3333_v27  ;;  %1232 = vmatprep.subr.bf16.mxu1 %v3336_v56  ;;  %v3370_v6 = vld [vmem:[%s4549_s3 + $0x1c0] ss:$8 sps:$4 sm:$0xff]   ;;  %v3375_v43 = vld [vmem:[%s4549_s3 + $0x194] ss:$8 sps:$4 sm:$0xff]   ;;  %v3373_v27 = vld [vmem:[%s4549_s3 + $0x190] ss:$8 sps:$4 sm:$0xff]  }
 0x20b   :  { %v2352_v4 = vrot.slane %v2341_v36, %v4207_v20  ;;  %v3378_v30 = vld [vmem:[%s4549_s3 + $0x1d4] ss:$8 sps:$4 sm:$0xff]   ;;  %v3376_v56 = vld [vmem:[%s4549_s3 + $0x1d0] ss:$8 sps:$4 sm:$0xff]   ;;  %v3381_v44 = vld [vmem:[%s4549_s3 + $0x1a4] ss:$8 sps:$4 sm:$0xff]  }
 0x20c   :  { %v3384_v18 = vld [vmem:[%s4549_s3 + $0x1e4] ss:$8 sps:$4 sm:$0xff]   ;;  %v3379_v40 = vld [vmem:[%s4549_s3 + $0x1a0] ss:$8 sps:$4 sm:$0xff]   ;;  %v3390_v36 = vld [vmem:[%s4549_s3 + $0x1f4] ss:$8 sps:$4 sm:$0xff]  }
 0x20d   :  { %1134 = vmatpush1.bf16.msra.mxu0 %v3331_v25  ;;  %1233 = vmatpush1.bf16.msra.mxu1 %v3334_v54  ;;  %v2353_v28 = vsel %vm898_vm2, %v2352_v4, %v2348_v55  ;;  %v3382_v42 = vld [vmem:[%s4549_s3 + $0x1e0] ss:$8 sps:$4 sm:$0xff]   ;;  %v3385_v25 = vld [vmem:[%s4549_s3 + $0x1b0] ss:$8 sps:$4 sm:$0xff]  }
 0x20e   :  { %v4259_v9 = vsel %vm2342_vm8, %v2353_v28, -1e+09  ;;  %1135 = vmatprep.subr.bf16.mxu0 %v3339_v48  ;;  %1234 = vmatprep.subr.bf16.mxu1 %v3342_v49  ;;  %v3388_v54 = vld [vmem:[%s4549_s3 + $0x1f0] ss:$8 sps:$4 sm:$0xff]   ;;  %v1481_v48 = vpack.c.b16 %v4242_v38, %v4242_v38  ;;  %v1580_v49 = vpack.c.b16 %v4245_v29, %v4245_v29  ;;  %v3391_v55 = vld [vmem:[%s4556_s24] sm:$0xff]   ;;  %v3392_v4 = vld [vmem:[%s4556_s24 + $0x8] sm:$0xff]  }
 0x20f   :  { %v2357_v20 = vsel %vm2356_vm9, %v4259_v9, -inf  ;;  %v3393_v38 = vld [vmem:[%s4556_s24 + $0x10] sm:$0xff]   ;;  %v3394_v29 = vld [vmem:[%s4556_s24 + $0x18] sm:$0xff]   ;;  %v3395_v28 = vld [vmem:[%s4556_s24 + $0x20] sm:$0xff]  }
 0x210   :  { %2358 = vmax.xlane.f32.xlu1 %v2357_v20 }
 0x211   :  { %1136 = vmatpush1.bf16.msra.mxu0 %v3337_v26  ;;  %1235 = vmatpush1.bf16.msra.mxu1 %v3340_v15  ;;  %v3396_v26 = vld [vmem:[%s4556_s24 + $0x28] sm:$0xff]   ;;  %v3397_v15 = vld [vmem:[%s4556_s24 + $0x30] sm:$0xff]  }
 0x212   :  { %1327 = vmatprep.subr.bf16.mxu0 %v3345_v34  ;;  %1426 = vmatprep.subr.bf16.mxu1 %v3348_v45  ;;  %v3398_v34 = vld [vmem:[%s4556_s24 + $0x38] sm:$0xff]   ;;  %v3399_v45 = vld [vmem:[%s4556_s24 + $0x40] sm:$0xff]  }
 0x214   :  { %3034 = vmatmul.mubr.msk.bf16.vlgmr.msra.gmra.mrb[4].mxu0 %vm941_vm7, %v1085_v10  ;;  %3051 = vmatmul.mubr.msk.bf16.vlgmr.msra.gmra.mrb[4].mxu1 %vm941_vm7, %v1184_v41  ;;  %v3400_v10 = vld [vmem:[%s4556_s24 + $0x48] sm:$0xff]   ;;  %v3401_v41 = vld [vmem:[%s4556_s24 + $0x50] sm:$0xff]  }
 0x215   :  { %1328 = vmatpush1.bf16.msra.mxu0 %v3343_v47  ;;  %1427 = vmatpush1.bf16.msra.mxu1 %v3346_v35 }
 0x216   :  { %1329 = vmatprep.subr.bf16.mxu0 %v3351_v62  ;;  %1428 = vmatprep.subr.bf16.mxu1 %v3354_v60  ;;  %v3402_v62 = vld [vmem:[%s4556_s24 + $0x58] sm:$0xff]  }
 0x217   :  { %1359 = vmatprep.mubr.bf16.mxu0 %v4555_v46  ;;  %1458 = vmatprep.mubr.bf16.mxu1 %v4555_v46 }
 0x219   :  { %1330 = vmatpush1.bf16.msra.mxu0 %v3349_v52  ;;  %1429 = vmatpush1.bf16.msra.mxu1 %v3352_v61 }
 0x21a   :  { %1331 = vmatprep.subr.bf16.mxu0 %v3357_v7  ;;  %1430 = vmatprep.subr.bf16.mxu1 %v3360_v1 }
 0x21d   :  { %1332 = vmatpush1.bf16.msra.mxu0 %v3355_v53  ;;  %1431 = vmatpush1.bf16.msra.mxu1 %v3358_v2  ;;  %v3120_v2 = vld [vmem:[%s4557_s30] ss:$0 sm:$0xff] }
 0x21e   :  { %1333 = vmatprep.subr.bf16.mxu0 %v3363_v31  ;;  %1432 = vmatprep.subr.bf16.mxu1 %v3366_v0  ;;  %v1715_v31 = vadd.f32 %v3120_v2, %v3826_v13 }
 0x220   :  { %v1717_v0 = vmul.f32 0.01, %v1715_v31  ;;  %vm1716_vm10 = vcmp.gt.f32.partialorder %v1715_v31, 0.0 }
 0x221   :  { %1334 = vmatpush1.bf16.msra.mxu0 %v3361_v50  ;;  %1433 = vmatpush1.bf16.msra.mxu1 %v3364_v58  ;;  %v3497_v58 = vmov 12  }
 0x222   :  { %1525 = vmatprep.subr.bf16.mxu0 %v3369_v39  ;;  %1624 = vmatprep.subr.bf16.mxu1 %v3372_v24  ;;  %v4353_v50 = vsel %vm1716_vm10, %v1715_v31, %v1717_v0  ;;  %v4558_v39 = vmov 2  }
 0x224   :  { %3068 = vmatmul.mubr.msk.bf16.vlgmr.msra.gmra.mrb[8].mxu0 %vm941_vm7, %v1283_v17  ;;  %3085 = vmatmul.mubr.msk.bf16.vlgmr.msra.gmra.mrb[8].mxu1 %vm941_vm7, %v1382_v32 }
 0x225   :  { %1526 = vmatpush1.bf16.msra.mxu0 %v3367_v37  ;;  %1625 = vmatpush1.bf16.msra.mxu1 %v3370_v6 }
 0x226   :  { %1527 = vmatprep.subr.bf16.mxu0 %v3375_v43  ;;  %1626 = vmatprep.subr.bf16.mxu1 %v3378_v30 }
 0x227   :  { %1557 = vmatprep.mubr.bf16.mxu0 %v4555_v46  ;;  %1656 = vmatprep.mubr.bf16.mxu1 %v4555_v46 }
 0x229   :  { %1528 = vmatpush1.bf16.msra.mxu0 %v3373_v27  ;;  %1627 = vmatpush1.bf16.msra.mxu1 %v3376_v56 }
 0x22a   :  { %1529 = vmatprep.subr.bf16.mxu0 %v3381_v44  ;;  %1628 = vmatprep.subr.bf16.mxu1 %v3384_v18 }
 0x22d   :  { %1530 = vmatpush1.bf16.msra.mxu0 %v3379_v40  ;;  %1629 = vmatpush1.bf16.msra.mxu1 %v3382_v42 }
 0x22e   :  { %1531 = vmatprep.subr.bf16.mxu0 %v3387_v3  ;;  %1630 = vmatprep.subr.bf16.mxu1 %v3390_v36 }
 0x231   :  { %1532 = vmatpush1.bf16.msra.mxu0 %v3385_v25  ;;  %1631 = vmatpush1.bf16.msra.mxu1 %v3388_v54 }
 0x232   :  { %2580 = vmatprep.subr.bf16.mxu0 %v4555_v46 }
 0x234   :  { %3102 = vmatmul.mubr.msk.bf16.vlgmr.msra.gmra.mrb[12].mxu0 %vm941_vm7, %v1481_v48  ;;  %3119 = vmatmul.mubr.msk.bf16.vlgmr.msra.gmra.mrb[12].mxu1 %vm941_vm7, %v1580_v49 }
 0x235   :  { %2581 = vmatpush1.bf16.msra.mxu0 %v3391_v55 }
 0x236   :  { %2582 = vmatprep.subr.bf16.mxu0 %v4555_v46 }
 0x239   :  { %2583 = vmatpush1.bf16.msra.mxu0 %v3392_v4 }
 0x23a   :  { %2584 = vmatprep.subr.bf16.mxu0 %v4555_v46 }
 0x23d   :  { %2585 = vmatpush1.bf16.msra.mxu0 %v3393_v38 }
 0x23e   :  { %2586 = vmatprep.subr.bf16.mxu0 %v4555_v46 }
 0x241   :  { %2587 = vmatpush1.bf16.msra.mxu0 %v3394_v29 }
 0x242   :  { %2588 = vmatprep.subr.bf16.mxu0 %v4555_v46 }
 0x245   :  { %2589 = vmatpush1.bf16.msra.mxu0 %v3395_v28 }
 0x246   :  { %2590 = vmatprep.subr.bf16.mxu0 %v4555_v46 }
 0x249   :  { %2591 = vmatpush1.bf16.msra.mxu0 %v3396_v26 }
 0x24a   :  { %2592 = vmatprep.subr.bf16.mxu0 %v4555_v46 }
 0x24d   :  { %2593 = vmatpush1.bf16.msra.mxu0 %v3397_v15 }
 0x24e   :  { %2594 = vmatprep.subr.bf16.mxu0 %v4555_v46 }
 0x251   :  { %2595 = vmatpush1.bf16.msra.mxu0 %v3398_v34 }
 0x252   :  { %2596 = vmatprep.subr.bf16.mxu0 %v4555_v46 }
 0x255   :  { %2597 = vmatpush1.bf16.msra.mxu0 %v3399_v45 }
 0x256   :  { %2598 = vmatprep.subr.bf16.mxu0 %v4555_v46 }
 0x259   :  { %2599 = vmatpush1.bf16.msra.mxu0 %v3400_v10 }
 0x25a   :  { %2600 = vmatprep.subr.bf16.mxu0 %v4555_v46 }
 0x25d   :  { %2601 = vmatpush1.bf16.msra.mxu0 %v3401_v41 }
 0x25e   :  { %2602 = vmatprep.subr.bf16.mxu0 %v4555_v46 }
 0x261   :  { %2603 = vmatpush1.bf16.msra.mxu0 %v3402_v62  ;;  %v1667_v62 = vld [vmem:[%s4559_s20] sm:$0x3] }
 0x262   :  { %v1676_v0 = vrot.slane %v1667_v62, %v3736_v12 }
 0x289   :  { %v2107_v20 = vpop.xlane.xlu1 %2106 }
 0x28a   :  { %v2108_v47 = vsub.f32 %v4213_v57, %v2107_v20 }
 0x28c   :  { %v2109_v35 = vmul.f32 1.442695, %v2108_v47 }
 0x28e   :  { %3423 = vpow2.f32 %v2109_v35 }
 0x298   :  { %v4342_v60 = vpop.eup %3423 }
 0x299   :  { %v2111_v57 = vsel %vm2104_vm4, %v4342_v60, 0.0 }
 0x29a   :  { %2112 = vadd.xlane.f32.xlu1 %v2111_v57 }
 0x29d   :  { %v2359_v52 = vpop.xlane.xlu1 %2358 }
 0x29e   :  { %v2360_v61 = vsub.f32 %v4259_v9, %v2359_v52  ;;  %v3498_v9 = vmov 15  }
 0x2a0   :  { %v2361_v7 = vmul.f32 1.442695, %v2360_v61 }
 0x2a2   :  { %3425 = vpow2.f32 %v2361_v7  ;;  %v1672_v7 = vrot.slane %v1667_v62, %v3728_v8  ;;  %v3511_v62 = vmov 14  }
 0x2ac   :  { %v4347_v1 = vpop.eup %3425 }
 0x2ad   :  { %v2363_v53 = vsel %vm2356_vm9, %v4347_v1, 0.0 }
 0x2ae   :  { %2364 = vadd.xlane.f32.xlu0 %v2363_v53 }
 0x2c4   :  { %1723 = vperm.xlu0 %3270, %v4353_v50  }
 0x2c8   :  { %3282 = vset.pattern.permute.xlu0 %v3497_v58 }
 0x2c9   :  { %1842 = vperm.xlu0 %3282, %v4353_v50  }
 0x2cd   :  { %3285 = vset.pattern.permute.xlu0 %v3498_v9 }
 0x2ce   :  { %1872 = vperm.xlu0 %3285, %v4353_v50  }
 0x2d2   :  { %3288 = vset.pattern.permute.xlu0 %v4558_v39 }
 0x2d7   :  { %v979_v24 = vpop.f32.mrb[0].mxu0  ;;  %v1066_v37 = vpop.f32.mrb[0].mxu1 }
 0x2d8   :  { %v1067_v6 = vadd.f32 %v1066_v37, %v979_v24  ;;  %v981_v13 = vpop.f32.mrb[1].mxu0  ;;  %v1068_v17 = vpop.f32.mrb[1].mxu1 }
 0x2d9   :  { %v1069_v32 = vadd.f32 %v1068_v17, %v981_v13  ;;  %v983_v43 = vpop.f32.mrb[2].mxu0  ;;  %v1070_v30 = vpop.f32.mrb[2].mxu1 }
 0x2da   :  { %v984_v27 = vpop.f32.mrb[3].mxu0  ;;  %v1071_v56 = vpop.f32.mrb[3].mxu1 }
 0x2e7   :  { %v1163_v44 = vpop.f32.mrb[4].mxu0  ;;  %v1262_v18 = vpop.f32.mrb[4].mxu1 }
 0x2e8   :  { %v1170_v40 = vadd.f32 %v1163_v44, %v1067_v6  ;;  %v1165_v42 = vpop.f32.mrb[5].mxu0  ;;  %v1264_v3 = vpop.f32.mrb[5].mxu1 }
 0x2e9   :  { %v1171_v36 = vadd.f32 %v1165_v42, %v1069_v32  ;;  %v1167_v25 = vpop.f32.mrb[6].mxu0  ;;  %v1266_v54 = vpop.f32.mrb[6].mxu1 }
 0x2ea   :  { %v1269_v48 = vadd.f32 %v1262_v18, %v1170_v40  ;;  %v1168_v49 = vpop.f32.mrb[7].mxu0  ;;  %v1267_v55 = vpop.f32.mrb[7].mxu1  ;;  %v3403_v25 = vld [vmem:[%s4560_s27] sm:$0xff]   ;;  %v3499_v54 = vmov 0.0  }
 0x2eb   :  { %v1270_v4 = vadd.f32 %v1264_v3, %v1171_v36  ;;  %3173 = vmatprep.subr.bf16.mxu1 %v3499_v54  ;;  %v3404_v55 = vld [vmem:[%s4560_s27 + $0x8] sm:$0xff]   ;;  %3181 = vmatprep.mubr.msk.bf16.mxu1 %vm3500_vm13, %v3499_v54 }
 0x2ec   :  { %3174 = vmatpush3.bf16.msra.mxu1 %v3403_v25 }
 0x2ed   :  { %3175 = vmatprep.subr.bf16.mxu1 %v3499_v54 }
 0x2f0   :  { %3176 = vmatpush3.bf16.msra.mxu1 %v3404_v55 }
 0x2f1   :  { %3177 = vmatprep.subr.bf16.mxu1 %v3499_v54 }
 0x2f7   :  { %v1361_v38 = vpop.f32.mrb[8].mxu0  ;;  %v1460_v29 = vpop.f32.mrb[8].mxu1 }
 0x2f8   :  { %v1368_v28 = vadd.f32 %v1361_v38, %v1269_v48  ;;  %v1363_v26 = vpop.f32.mrb[9].mxu0  ;;  %v1462_v15 = vpop.f32.mrb[9].mxu1 }
 0x2f9   :  { %v1369_v34 = vadd.f32 %v1363_v26, %v1270_v4  ;;  %v1365_v45 = vpop.f32.mrb[10].mxu0  ;;  %v1464_v20 = vpop.f32.mrb[10].mxu1  ;;  %v3406_v4 = vld [vmem:[%s4560_s27 + $0x18] sm:$0xff]  }
 0x2fa   :  { %v1467_v47 = vadd.f32 %v1460_v29, %v1368_v28  ;;  %v1366_v35 = vpop.f32.mrb[11].mxu0  ;;  %v1465_v10 = vpop.f32.mrb[11].mxu1  ;;  %v3504_v45 = vmov 6   ;;  %v3506_v20 = vmov 8  }
 0x2fb   :  { %v1468_v41 = vadd.f32 %v1462_v15, %v1369_v34  ;;  %v3501_v15 = vmov 3   ;;  %v3503_v34 = vmov 5   ;;  %v3508_v35 = vmov 10  }
 0x2fc   :  { %v3509_v10 = vmov 11  }
 0x307   :  { %v1559_v57 = vpop.f32.mrb[12].mxu0  ;;  %v1658_v52 = vpop.f32.mrb[12].mxu1 }
 0x308   :  { %v1566_v61 = vadd.f32 %v1559_v57, %v1467_v47  ;;  %v1561_v53 = vpop.f32.mrb[13].mxu0  ;;  %v1660_v2 = vpop.f32.mrb[13].mxu1  ;;  %v3507_v47 = vmov 9   ;;  %v1955_v57 = vld [vmem:[%s4561_s4] sm:$0x7] }
 0x309   :  { %v1567_v31 = vadd.f32 %v1561_v53, %v1468_v41  ;;  %v1563_v58 = vpop.f32.mrb[14].mxu0  ;;  %v1662_v9 = vpop.f32.mrb[14].mxu1  ;;  %v3510_v41 = vmov 13  }
 0x30a   :  { %v1665_v24 = vadd.f32 %v1658_v52, %v1566_v61  ;;  %v1564_v37 = vpop.f32.mrb[15].mxu0  ;;  %v1663_v6 = vpop.f32.mrb[15].mxu1  ;;  %v2016_v52 = vrot.slane %v1955_v57, %v3728_v8  ;;  %v2022_v61 = vrot.slane %v1955_v57, %v3736_v12  ;;  %v4564_v9 = vld [vmem:[#allocation28_spill] sm:$0xff] }
 0x30b   :  { %v1666_v13 = vadd.f32 %v1660_v2, %v1567_v31  ;;  %v2030_v2 = vrot.slane %v1955_v57, %v3733_v11  ;;  %v4563_v31 = vld [vmem:[#allocation26_spill] sm:$0xff]  ;;  %v4566_v6 = vld [vmem:[#allocation29_spill] sm:$0xff] }
 0x30c   :  { %v1679_v17 = vadd.f32 %v1672_v7, %v1665_v24  ;;  %v2023_v7 = vmul.f32 %v2022_v61, %v3823_v63  ;;  %v2017_v53 = vmul.f32 %v2016_v52, %v3831_v22  ;;  %v4565_v37 = vld [vmem:[#allocation34_spill] sm:$0xff] }
 0x30d   :  { %v1680_v32 = vadd.f32 %v1676_v0, %v1666_v13  ;;  %v2018_v0 = vmul.f32 %v2016_v52, %v4563_v31  ;;  %v2031_v24 = vmul.f32 %v2030_v2, %v4564_v9  ;;  %v2032_v13 = vmul.f32 %v2030_v2, %v4566_v6  ;;  %v3407_v6 = vld [vmem:[%s4571_s18] sm:$0xff]  }
 0x30e   :  { %vm1681_vm11 = vcmp.gt.f32.partialorder %v1679_v17, 0.0  ;;  %v1683_v43 = vmul.f32 0.01, %v1679_v17  ;;  %v2025_v58 = vadd.f32 %v2023_v7, %v2017_v53  ;;  %v3129_v7 = vld [vmem:[%s4567_s16] ss:$0 sm:$0xff] }
 0x30f   :  { %vm1682_vm12 = vcmp.gt.f32.partialorder %v1680_v32, 0.0  ;;  %v1684_v30 = vmul.f32 0.01, %v1680_v32 }
 0x310   :  { %v1685_v27 = vsel %vm1681_vm11, %v1679_v17, %v1683_v43  ;;  %v3125_v43 = vld [vmem:[%s4562_s15] ss:$0 sm:$0xff] }
 0x311   :  { %v1686_v56 = vsel %vm1682_vm12, %v1680_v32, %v1684_v30  ;;  %v2479_v18 = vpack.c.bf16 %v1685_v27, %v1685_v27  ;;  %v2033_v32 = vadd.f32 %v2031_v24, %v2025_v58  ;;  %v4572_v58 = vld [vmem:[#allocation33_spill] sm:$0xff] }
 0x312   :  { %v2480_v44 = vpack.c.bf16 %v1686_v56, %v1686_v56  ;;  %v2297_v9 = vadd.f32 %v3129_v7, %v4572_v58 }
 0x313   :  { %v2042_v30 = vadd.f32 %v3125_v43, %v2033_v32 }
 0x314   :  { %3142 = vmatprep.mubr.msk.bf16.mxu0 %vm941_vm7, %v2480_v44 }
 0x315   :  { %2613 = vmatmul.mubr.bf16.vlgmr.msra.gmra.mrb[16].mxu0 %v2479_v18 }
 0x327   :  { %v2113_v40 = vpop.xlane.xlu1 %2112 }
 0x328   :  { %3427 = vrcp.f32 %v2113_v40 }
 0x332   :  { %v3428_v42 = vpop.eup %3427 }
 0x333   :  { %v2115_v3 = vmul.f32 %v3428_v42, %v4342_v60  ;;  %v3405_v60 = vld [vmem:[%s4560_s27 + $0x10] sm:$0xff]  }
 0x334   :  { %3178 = vmatpush3.bf16.msra.mxu1 %v3405_v60  ;;  %v4569_v60 = vld [vmem:[#allocation31_spill] sm:$0xff] }
 0x335   :  { %v2119_v36 = vrot.slane %v2115_v3, %v3728_v8  ;;  %v2126_v48 = vrot.slane %v2115_v3, %v3736_v12  ;;  %3179 = vmatprep.subr.bf16.mxu1 %v3499_v54 }
 0x337   :  { %2121 = vbcast.lane.b32.xlu1 %v2119_v36, 256 }
 0x338   :  { %3180 = vmatpush3.bf16.msra.mxu1 %v3406_v4  ;;  %v2277_v4 = vmul.f32 %v4569_v60, %v3904_v59 }
 0x339   :  { %3185 = vmatprep.subr.bf16.mxu1 %v3499_v54 }
 0x33b   :  { %2128 = vbcast.lane.b32.xlu1 %v2126_v48, 256  ;;  %v2365_v49 = vpop.xlane.xlu0 %2364 }
 0x33c   :  { %3429 = vrcp.f32 %v2365_v49  ;;  %v4568_v49 = vld [vmem:[#allocation30_spill] sm:$0xff] }
 0x33d   :  { %v2271_v55 = vmul.f32 %v4568_v49, %v3889_v51 }
 0x346   :  { %v3430_v38 = vpop.eup %3429 }
 0x347   :  { %v2367_v29 = vmul.f32 %v3430_v38, %v4347_v1  ;;  %v3502_v1 = vmov 4  }
 0x349   :  { %v2371_v28 = vrot.slane %v2367_v29, %v3728_v8  ;;  %v2378_v26 = vrot.slane %v2367_v29, %v3736_v12 }
 0x34b   :  { %2373 = vbcast.lane.b32.xlu1 %v2371_v28, 256  ;;  %v4570_v28 = vld [vmem:[#allocation32_spill] sm:$0xff] }
 0x34f   :  { %2380 = vbcast.lane.b32.xlu1 %v2378_v26, 256  ;;  %v2285_v26 = vmul.f32 %v4570_v28, %v4007_v33 }
 0x353   :  { %1732 = vperm.xlu1 %3271, %v4353_v50  }
 0x357   :  { %3272 = vset.pattern.permute.xlu1 %v4558_v39  ;;  %v3505_v39 = vmov 7  }
 0x358   :  { %1742 = vperm.xlu1 %3272, %v4353_v50  }
 0x35c   :  { %3273 = vset.pattern.permute.xlu1 %v3501_v15 }
 0x35d   :  { %1752 = vperm.xlu1 %3273, %v4353_v50  }
 0x361   :  { %3274 = vset.pattern.permute.xlu1 %v3502_v1 }
 0x362   :  { %1762 = vperm.xlu1 %3274, %v4353_v50  }
 0x366   :  { %3275 = vset.pattern.permute.xlu1 %v3503_v34 }
 0x367   :  { %1772 = vperm.xlu1 %3275, %v4353_v50  }
 0x36b   :  { %3276 = vset.pattern.permute.xlu1 %v3504_v45 }
 0x36c   :  { %1782 = vperm.xlu1 %3276, %v4353_v50  }
 0x370   :  { %3277 = vset.pattern.permute.xlu1 %v3505_v39 }
 0x371   :  { %1792 = vperm.xlu1 %3277, %v4353_v50  }
 0x375   :  { %3278 = vset.pattern.permute.xlu1 %v3506_v20 }
 0x376   :  { %1802 = vperm.xlu1 %3278, %v4353_v50  }
 0x37a   :  { %3279 = vset.pattern.permute.xlu1 %v3507_v47 }
 0x37b   :  { %1812 = vperm.xlu1 %3279, %v4353_v50  }
 0x37f   :  { %3280 = vset.pattern.permute.xlu1 %v3508_v35  ;;  %v2279_v35 = vadd.f32 %v2277_v4, %v2271_v55 }
 0x380   :  { %1822 = vperm.xlu1 %3280, %v4353_v50  }
 0x384   :  { %3281 = vset.pattern.permute.xlu1 %v3509_v10 }
 0x385   :  { %1832 = vperm.xlu1 %3281, %v4353_v50  }
 0x389   :  { %3283 = vset.pattern.permute.xlu1 %v3510_v41 }
 0x38a   :  { %1852 = vperm.xlu1 %3283, %v4353_v50  }
 0x38e   :  { %3284 = vset.pattern.permute.xlu1 %v3511_v62  ;;  %v2287_v62 = vadd.f32 %v2285_v26, %v2279_v35 }
 0x38f   :  { %1862 = vperm.xlu1 %3284, %v4353_v50   ;;  %v2024_v50 = vmul.f32 %v2022_v61, %v4565_v37 }
 0x390   :  { %v2296_v51 = vadd.f32 %v3129_v7, %v2287_v62 }
 0x391   :  { %v2026_v17 = vadd.f32 %v2024_v50, %v2018_v0 }
 0x393   :  { %3286 = vset.pattern.permute.xlu1 %v4555_v46  ;;  %v2034_v27 = vadd.f32 %v2032_v13, %v2026_v17 }
 0x395   :  { %v2043_v44 = vadd.f32 %v3125_v43, %v2034_v27 }
 0x3a9   :  { %v2122_v56 = vpop.permute.xlu1 %2121 }
 0x3aa   :  { %v2130_v63 = vmul.f32 %v2122_v56, %v2042_v30  ;;  %v3408_v56 = vld [vmem:[%s4571_s18 + $0x8] sm:$0xff]  }
 0x3ac   :  { %v2132_v22 = vsel %vm2079_vm0, %v2130_v63, 0.0 }
 0x3ad   :  { %v2133_v18 = vrot.slane %v2132_v22, 4  ;;  %v2129_v40 = vpop.permute.xlu1 %2128 }
 0x3ae   :  { %v2131_v42 = vmul.f32 %v2129_v40, %v2043_v44  ;;  %v3409_v40 = vld [vmem:[%s4571_s18 + $0x10] sm:$0xff]  }
 0x3af   :  { %v2134_v3 = vadd.f32 %v2133_v18, %v2132_v22 }
 0x3b0   :  { %v2139_v36 = vsel %vm2079_vm0, %v2131_v42, 0.0 }
 0x3b1   :  { %v2135_v25 = vrot.slane %v2134_v3, 2  ;;  %v2140_v48 = vrot.slane %v2139_v36, 4 }
 0x3b3   :  { %v2136_v38 = vadd.f32 %v2135_v25, %v2134_v3  ;;  %v2141_v29 = vadd.f32 %v2140_v48, %v2139_v36  ;;  %v3410_v25 = vld [vmem:[%s4571_s18 + $0x18] sm:$0xff]  }
 0x3b5   :  { %v2137_v20 = vrot.slane %v2136_v38, 1  ;;  %v2142_v47 = vrot.slane %v2141_v29, 2 }
 0x3b7   :  { %v2138_v10 = vadd.f32 %v2137_v20, %v2136_v38  ;;  %v2143_v41 = vadd.f32 %v2142_v47, %v2141_v29 }
 0x3b9   :  { %v2144_v57 = vrot.slane %v2143_v41, 1  ;;  %v2621_v52 = vpack.c.bf16 %v2138_v10, %v2138_v10 }
 0x3bb   :  { %v2145_v61 = vadd.f32 %v2144_v57, %v2143_v41  ;;  %v2633_v31 = vunpack.c.l.b16 %v2621_v52  ;;  %v1719_v41 = vld [vmem:[%s4573_s22] sm:$0xff] }
 0x3bc   :  { %v1738_v57 = vrot.slane %v1719_v41, %v3736_v12  ;;  %v1729_v7 = vrot.slane %v1719_v41, %v3728_v8 }
 0x3bd   :  { %v2622_v53 = vpack.c.bf16 %v2145_v61, %v2145_v61  ;;  %v2374_v2 = vpop.permute.xlu1 %2373 }
 0x3be   :  { %v2382_v59 = vmul.f32 %v2374_v2, %v2296_v51  ;;  %v1748_v51 = vrot.slane %v1719_v41, %v3733_v11 }
 0x3bf   :  { %v2634_v0 = vunpack.c.l.b16 %v2622_v53  ;;  %v1724_v53 = vpop.permute.xlu0 %1723 }
 0x3c0   :  { %v2384_v33 = vsel %vm2333_vm1, %v2382_v59, 0.0 }
 0x3c1   :  { %v2385_v24 = vrot.slane %v2384_v33, 4  ;;  %v2381_v37 = vpop.permute.xlu1 %2380  ;;  %v2635_v50 = vsel %vm898_vm2, %v2634_v0, %v2633_v31  ;;  %v1730_v31 = vmul.f32 %v1729_v7, %v1724_v53 }
 0x3c2   :  { %v2383_v13 = vmul.f32 %v2381_v37, %v2297_v9  ;;  %v2636_v17 = vpack.c.b16 %v2635_v50, %v2635_v50 }
 0x3c3   :  { %v2386_v32 = vadd.f32 %v2385_v24, %v2384_v33  ;;  %v1768_v33 = vrot.slane %v1719_v41, %v3749_v19  ;;  %v1778_v24 = vrot.slane %v1719_v41, %v3758_v23 }
 0x3c4   :  { %v2391_v43 = vsel %vm2333_vm1, %v2383_v13, 0.0  ;;  %3182 = vmatmul.mubr.msk.bf16.vlgmr.msra.gmra.mrb[16].mxu1 %vm941_vm7, %v2636_v17 }
 0x3c5   :  { %v2387_v30 = vrot.slane %v2386_v32, 2  ;;  %v2392_v27 = vrot.slane %v2391_v43, 4  ;;  %3186 = vmatpush3.bf16.msra.mxu1 %v3407_v6  ;;  %3193 = vmatprep.mubr.msk.bf16.mxu1 %vm3500_vm13, %v3499_v54  ;;  %v1788_v6 = vrot.slane %v1719_v41, %v3740_v14 }
 0x3c6   :  { %3187 = vmatprep.subr.bf16.mxu1 %v3499_v54 }
 0x3c7   :  { %v2388_v63 = vadd.f32 %v2387_v30, %v2386_v32  ;;  %v2393_v22 = vadd.f32 %v2392_v27, %v2391_v43  ;;  %v1798_v43 = vrot.slane %v1719_v41, %v3754_v21  ;;  %v1720_v30 = vld [vmem:[%s4573_s22 + $0x8] sm:$0xff] }
 0x3c8   :  { %v1878_v7 = vrot.slane %v1720_v30, %v3754_v21 }
 0x3c9   :  { %v2389_v44 = vrot.slane %v2388_v63, 1  ;;  %v2394_v18 = vrot.slane %v2393_v22, 2  ;;  %3188 = vmatpush3.bf16.msra.mxu1 %v3408_v56 }
 0x3ca   :  { %3189 = vmatprep.subr.bf16.mxu1 %v3499_v54 }
 0x3cb   :  { %v2390_v42 = vadd.f32 %v2389_v44, %v2388_v63  ;;  %v2395_v3 = vadd.f32 %v2394_v18, %v2393_v22  ;;  %v1808_v63 = vrot.slane %v1720_v30, %v3728_v8 }
 0x3cd   :  { %v2396_v36 = vrot.slane %v2395_v3, 1  ;;  %3190 = vmatpush3.bf16.msra.mxu1 %v3409_v40  ;;  %v2705_v48 = vpack.c.bf16 %v2390_v42, %v2390_v42  ;;  %v1818_v40 = vrot.slane %v1720_v30, %v3736_v12 }
 0x3ce   :  { %3191 = vmatprep.subr.bf16.mxu1 %v3499_v54 }
 0x3cf   :  { %v2397_v49 = vadd.f32 %v2396_v36, %v2395_v3  ;;  %v2717_v4 = vunpack.c.l.b16 %v2705_v48  ;;  %v1828_v36 = vrot.slane %v1720_v30, %v3733_v11 }
 0x3d1   :  { %v2706_v55 = vpack.c.bf16 %v2397_v49, %v2397_v49  ;;  %3192 = vmatpush3.bf16.msra.mxu1 %v3410_v25 }
 0x3d2   :  { %v1733_v60 = vpop.permute.xlu1 %1732 }
 0x3d3   :  { %v2718_v38 = vunpack.c.l.b16 %v2706_v55  ;;  %v1739_v2 = vmul.f32 %v1738_v57, %v1733_v60 }
 0x3d5   :  { %v2719_v29 = vsel %vm898_vm2, %v2718_v38, %v2717_v4  ;;  %v1740_v58 = vadd.f32 %v1739_v2, %v1730_v31  ;;  %v1838_v4 = vrot.slane %v1720_v30, %v3744_v16  ;;  %vm2935_vm2 = vcmask 1041408  }
 0x3d6   :  { %v2720_v28 = vpack.c.b16 %v2719_v29, %v2719_v29  ;;  %vm2937_vm4 = vmor %vm2936_vm3, %vm2935_vm2 }
 0x3d7   :  { %v1743_v26 = vpop.permute.xlu1 %1742 }
 0x3d8   :  { %3194 = vmatmul.mubr.msk.bf16.vlgmr.msra.gmra.mrb[20].mxu1 %vm941_vm7, %v2720_v28  ;;  %v1749_v0 = vmul.f32 %v1748_v51, %v1743_v26  ;;  %v1848_v28 = vrot.slane %v1720_v30, %v3749_v19 }
 0x3d9   :  { %2909 = vmatprep.mubr.bf16.mxu1 %v4555_v46  ;;  %v1758_v46 = vrot.slane %v1719_v41, %v3744_v16 }
 0x3da   :  { %v1750_v37 = vadd.f32 %v1749_v0, %v1740_v58  ;;  %v3121_v0 = vld [vmem:[%s4574_s23] ss:$0 sm:$0xff] }
 0x3dc   :  { %v1753_v20 = vpop.permute.xlu1 %1752 }
 0x3dd   :  { %v1759_v9 = vmul.f32 %v1758_v46, %v1753_v20 }
 0x3df   :  { %v1760_v17 = vadd.f32 %v1759_v9, %v1750_v37  ;;  %v4575_v37 = vmov 1  }
 0x3e1   :  { %v1763_v47 = vpop.permute.xlu1 %1762 }
 0x3e2   :  { %v1769_v50 = vmul.f32 %v1768_v33, %v1763_v47  ;;  %v1843_v47 = vpop.permute.xlu0 %1842 }
 0x3e3   :  { %v1849_v41 = vmul.f32 %v1848_v28, %v1843_v47 }
 0x3e4   :  { %v1770_v27 = vadd.f32 %v1769_v50, %v1760_v17  ;;  %v3411_v50 = vld [vmem:[%s3702_s25] ss:$8 sps:$4 sm:$0xff]   ;;  %v3422_v17 = vld [vmem:[%s3702_s25 + $0x34] ss:$8 sps:$4 sm:$0xff]  }
 0x3e6   :  { %v1773_v35 = vpop.permute.xlu1 %1772  ;;  %v1873_v51 = vpop.permute.xlu0 %1872 }
 0x3e7   :  { %v1779_v32 = vmul.f32 %v1778_v24, %v1773_v35 }
 0x3e8   :  { %v4437_v54 = vpop.f32.mrb[16].mxu0 }
 0x3e9   :  { %v2616_v10 = vpop.f32.mrb[17].mxu0  ;;  %v1780_v44 = vadd.f32 %v1779_v32, %v1770_v27 }
 0x3ea   :  { %v2617_v62 = vpop.f32.mrb[18].mxu0  ;;  %v1858_v10 = vrot.slane %v1720_v30, %v3758_v23 }
 0x3eb   :  { %v2618_v52 = vpop.f32.mrb[19].mxu0  ;;  %v1783_v61 = vpop.permute.xlu1 %1782 }
 0x3ec   :  { %v1789_v56 = vmul.f32 %v1788_v6, %v1783_v61  ;;  %v1868_v61 = vrot.slane %v1720_v30, %v3740_v14  ;;  %v3414_v6 = vld [vmem:[%s3702_s25 + $0x10] ss:$8 sps:$4 sm:$0xff]  }
 0x3ee   :  { %v1790_v42 = vadd.f32 %v1789_v56, %v1780_v44 }
 0x3f0   :  { %v1793_v59 = vpop.permute.xlu1 %1792 }
 0x3f1   :  { %v1799_v18 = vmul.f32 %v1798_v43, %v1793_v59  ;;  %v1879_v59 = vmul.f32 %v1878_v7, %v1873_v51  ;;  %v2398_v43 = vld [vmem:[%s4576_s26] sm:$0xff] }
 0x3f3   :  { %v1800_v25 = vadd.f32 %v1799_v18, %v1790_v42  ;;  %v2426_v18 = vrot.slane %v2398_v43, %v3733_v11 }
 0x3f5   :  { %v1803_v13 = vpop.permute.xlu1 %1802 }
 0x3f6   :  { %v1809_v3 = vmul.f32 %v1808_v63, %v1803_v13  ;;  %v3417_v13 = vld [vmem:[%s3702_s25 + $0x20] ss:$8 sps:$4 sm:$0xff]   ;;  %v2407_v63 = vrot.slane %v2398_v43, %v3728_v8 }
 0x3f8   :  { %v1810_v55 = vadd.f32 %v1809_v3, %v1800_v25  ;;  %v2436_v25 = vrot.slane %v2398_v43, %v3744_v16 }
 0x3fa   :  { %v1813_v22 = vpop.permute.xlu1 %1812 }
 0x3fb   :  { %v1819_v48 = vmul.f32 %v1818_v40, %v1813_v22  ;;  %v2416_v22 = vrot.slane %v2398_v43, %v3736_v12 }
 0x3fd   :  { %v1820_v38 = vadd.f32 %v1819_v48, %v1810_v55 }
 0x3ff   :  { %v1823_v49 = vpop.permute.xlu1 %1822 }
 0x400   :  { %v1829_v60 = vmul.f32 %v1828_v36, %v1823_v49 }
 0x402   :  { %v1830_v26 = vadd.f32 %v1829_v60, %v1820_v38 }
 0x404   :  { %v1833_v29 = vpop.permute.xlu1 %1832 }
 0x405   :  { %v1839_v20 = vmul.f32 %v1838_v4, %v1833_v29  ;;  %v2446_v4 = vrot.slane %v2398_v43, %v3749_v19  ;;  %v2456_v29 = vrot.slane %v2398_v43, %v3758_v23  ;;  %v2476_v19 = vrot.slane %v2398_v43, %v3754_v21  ;;  %v2822_v21 = vld [vmem:[%s3707_s14] sm:$0x3] }
 0x407   :  { %v1840_v35 = vadd.f32 %v1839_v20, %v1830_v26 }
 0x409   :  { %v1853_v62 = vpop.permute.xlu1 %1852  ;;  %v1850_v57 = vadd.f32 %v1849_v41, %v1840_v35  ;;  %v2466_v35 = vrot.slane %v2398_v43, %v3740_v14  ;;  %v3153_v14 = vld [vmem:[%s3697_s6] ss:$0 sm:$0xff] }
 0x40a   :  { %v1859_v52 = vmul.f32 %v1858_v10, %v1853_v62 }
 0x40c   :  { %v1860_v2 = vadd.f32 %v1859_v52, %v1850_v57 }
 0x40e   :  { %v1863_v53 = vpop.permute.xlu1 %1862 }
 0x40f   :  { %v1869_v46 = vmul.f32 %v1868_v61, %v1863_v53 }
 0x411   :  { %v1870_v31 = vadd.f32 %v1869_v46, %v1860_v2 }
 0x413   :  { %v1880_v33 = vadd.f32 %v1879_v59, %v1870_v31  ;;  %v4577_v31 = vld [vmem:[#allocation27_spill] sm:$0xff] }
 0x415   :  { %v1888_v58 = vadd.f32 %v3121_v0, %v1880_v33 }
 0x417   :  { %vm1889_vm14 = vcmp.gt.f32.partialorder %v1888_v58, 0.0  ;;  %v1890_v9 = vmul.f32 0.01, %v1888_v58 }
 0x419   :  { %v1891_v24 = vsel %vm1889_vm14, %v1888_v58, %v1890_v9 }
 0x41a   :  { %2420 = vperm.xlu0 %3288, %v1891_v24   ;;  %2401 = vperm.xlu1 %3286, %v1891_v24  }
 0x41e   :  { %3291 = vset.pattern.permute.xlu0 %v3503_v34  ;;  %3287 = vset.pattern.permute.xlu1 %v4575_v37  ;;  %v3413_v34 = vld [vmem:[%s3702_s25 + $0x4] ss:$8 sps:$4 sm:$0xff]   ;;  %v2827_v37 = vrot.slane %v2822_v21, %v3728_v8 }
 0x41f   :  { %2450 = vperm.xlu0 %3291, %v1891_v24   ;;  %2410 = vperm.xlu1 %3287, %v1891_v24  }
 0x420   :  { %2877 = vmatprep.subr.bf16.mxu1 %v3413_v34  ;;  %v3512_v34 = vmov 1983009808  }
 0x421   :  { %2878 = vmatpush1.bf16.msra.mxu1 %v3411_v50  ;;  %v2928_v50 = vunpack.c.l.s4 %v3512_v34 }
 0x423   :  { %3289 = vset.pattern.permute.xlu1 %v3501_v15  ;;  %3294 = vset.pattern.permute.xlu0 %v3505_v39  ;;  %v3416_v15 = vld [vmem:[%s3702_s25 + $0x14] ss:$8 sps:$4 sm:$0xff]  }
 0x424   :  { %2430 = vperm.xlu1 %3289, %v1891_v24   ;;  %2879 = vmatprep.subr.bf16.mxu1 %v3416_v15  ;;  %v2831_v15 = vrot.slane %v2822_v21, %v3736_v12 }
 0x425   :  { %2880 = vmatpush1.bf16.msra.mxu1 %v3414_v6 }
 0x428   :  { %3290 = vset.pattern.permute.xlu1 %v3502_v1  ;;  %v3419_v1 = vld [vmem:[%s3702_s25 + $0x24] ss:$8 sps:$4 sm:$0xff]  }
 0x429   :  { %2440 = vperm.xlu1 %3290, %v1891_v24   ;;  %2881 = vmatprep.subr.bf16.mxu1 %v3419_v1  ;;  %v2929_v1 = vunpack.c.0.s8 %v2928_v50 }
 0x42a   :  { %2882 = vmatpush1.bf16.msra.mxu1 %v3417_v13 }
 0x42b   :  { %2883 = vmatprep.subr.bf16.mxu1 %v3422_v17 }
 0x42d   :  { %3292 = vset.pattern.permute.xlu1 %v3504_v45  ;;  %v3420_v45 = vld [vmem:[%s3702_s25 + $0x30] ss:$8 sps:$4 sm:$0xff]   ;;  %s3513_s25 = smov [#allocation2]  }
 0x42e   :  { %2460 = vperm.xlu1 %3292, %v1891_v24   ;;  %2884 = vmatpush1.bf16.msra.mxu1 %v3420_v45  ;;  %s2945_s14 = sshll.u32 %s3513_s25, 4  ;;  %s2946_s14 = int_to_ptr.vmem [resolvable:$true] %s2945_s14 }
 0x42f   :  { %s3431_s6 = scalar_lea.vmem %s2946_s14, 64  ;;  %p3436_p1 = scmp.lt.s32.totalorder %s2946_s14, %s2946_s14 }
 0x430   :  { %p3432_p0 = scmp.ne.s32.totalorder %s2946_s14, %s3431_s6  ;;  %p3437_p2 = scmp.lt.s32.totalorder %s3431_s6, %s3431_s6 }
 0x432   :  { %3293 = vset.pattern.permute.xlu1 %v3505_v39  ;;  %p3438_p3 = por %p3437_p2, %p3436_p1 }
 0x433   :  { %2470 = vperm.xlu1 %3293, %v1891_v24  }
 0x434   :  { %p3439_p4 = pnand %p3438_p3, %p3432_p0 }
 0x497   :  { %v2698_v32 = vpop.f32.mrb[16].mxu1 }
 0x498   :  { %v3183_v39 = vpop.f32.mrb[17].mxu1 }
 0x499   :  { %v2701_v30 = vpop.f32.mrb[18].mxu1  ;;  %v2402_v27 = vpop.permute.xlu1 %2401 }
 0x49a   :  { %v3184_v56 = vpop.f32.mrb[19].mxu1  ;;  %v2408_v40 = vmul.f32 %v2407_v63, %v2402_v27  ;;  %v2421_v3 = vpop.permute.xlu0 %2420  ;;  %v2932_v27 = vsub.s32 %v2929_v1, %v3719_v5 }
 0x49b   :  { %v2427_v48 = vmul.f32 %v2426_v18, %v2421_v3 }
 0x49e   :  { %v2411_v44 = vpop.permute.xlu1 %2410  ;;  %v2451_v20 = vpop.permute.xlu0 %2450 }
 0x49f   :  { %v2417_v42 = vmul.f32 %v2416_v22, %v2411_v44  ;;  %v2457_v41 = vmul.f32 %v2456_v29, %v2451_v20 }
 0x4a1   :  { %v2418_v36 = vadd.f32 %v2417_v42, %v2408_v40 }
 0x4a3   :  { %v2431_v49 = vpop.permute.xlu1 %2430  ;;  %v2428_v55 = vadd.f32 %v2427_v48, %v2418_v36 }
 0x4a4   :  { %v2437_v60 = vmul.f32 %v2436_v25, %v2431_v49 }
 0x4a6   :  { %v2438_v28 = vadd.f32 %v2437_v60, %v2428_v55 }
 0x4a8   :  { %v2441_v38 = vpop.permute.xlu1 %2440 }
 0x4a9   :  { %v2447_v26 = vmul.f32 %v2446_v4, %v2441_v38 }
 0x4ab   :  { %v2448_v47 = vadd.f32 %v2447_v26, %v2438_v28  ;;  %v2782_v11 = vpop.f32.mrb[20].mxu1 }
 0x4ac   :  { %v3195_v10 = vpop.f32.mrb[21].mxu1 }
 0x4ad   :  { %v2785_v16 = vpop.f32.mrb[22].mxu1  ;;  %v2461_v62 = vpop.permute.xlu1 %2460  ;;  %v2458_v52 = vadd.f32 %v2457_v41, %v2448_v47 }
 0x4ae   :  { %v3196_v57 = vpop.f32.mrb[23].mxu1  ;;  %v2467_v61 = vmul.f32 %v2466_v35, %v2461_v62 }
 0x4b0   :  { %v2468_v23 = vadd.f32 %v2467_v61, %v2458_v52 }
 0x4b2   :  { %v2471_v7 = vpop.permute.xlu1 %2470 }
 0x4b3   :  { %v2477_v51 = vmul.f32 %v2476_v19, %v2471_v7 }
 0x4b5   :  { %v2478_v53 = vadd.f32 %v2477_v51, %v2468_v23 }
 0x4b7   :  { %v2620_v2 = vadd.f32 %v4437_v54, %v2478_v53 }
 0x4b9   :  { %v2704_v46 = vadd.f32 %v2698_v32, %v2620_v2 }
 0x4bb   :  { %v2788_v59 = vadd.f32 %v2782_v11, %v2704_v46 }
 0x4bd   :  { %v2801_v0 = vadd.f32 %v4577_v31, %v2788_v59 }
 0x4bf   :  { %v2809_v33 = vadd.f32 %v3153_v14, %v2801_v0 }
 0x4c1   :  { %vm2810_vm15 = vcmp.gt.f32.partialorder %v2809_v33, 0.0  ;;  %v2811_v58 = vmul.f32 0.01, %v2809_v33 }
 0x4c3   :  { %v2812_v9 = vsel %vm2810_vm15, %v2809_v33, %v2811_v58 }
 0x4c4   :  { %v2813_v24 = vpack.c.bf16 %v2812_v9, %v2812_v9 }
 0x4c6   :  { %3162 = vmatmul.mubr.msk.bf16.vlgmr.msra.gmra.mrb[24].mxu1 %vm941_vm7, %v2813_v24 }
 0x599   :  { %v2911_v54 = vpop.f32.mrb[24].mxu1 }
 0x59a   :  { %v2912_v6 = vadd.f32 %v2911_v54, %v2827_v37  ;;  %v2913_v13 = vpop.f32.mrb[25].mxu1 }
 0x59b   :  { %v2914_v17 = vadd.f32 %v2913_v13, %v2831_v15  ;;  %v2915_v45 = vpop.f32.mrb[26].mxu1 }
 0x59c   :  { %vm2918_vm0 = vcmp.gt.f32.partialorder %v2912_v6, 0.0  ;;  %v2920_v32 = vmul.f32 0.01, %v2912_v6  ;;  %v2916_v39 = vpop.f32.mrb[27].mxu1 }
 0x59d   :  { %vm2919_vm1 = vcmp.gt.f32.partialorder %v2914_v17, 0.0  ;;  %v2921_v43 = vmul.f32 0.01, %v2914_v17 }
 0x59e   :  { %v2922_v30 = vsel %vm2918_vm0, %v2912_v6, %v2920_v32 }
 0x59f   :  { %v2923_v8 = vsel %vm2919_vm1, %v2914_v17, %v2921_v43 }
 0x5a0   :  { %v2926_v12 = vcombine.low %v2922_v30, %v2923_v8 }
 0x5a2   :  { %v2933_v56 = vrot.slane %v2926_v12, %v2932_v27 }
 0x5a4   :  { %2938 = vst.msk [vmem:[#allocation2] sm:$0xf] %vm2937_vm4, %v2933_v56 }
 0x5a5   :  { %3442 = shalt.err (!%p3439_p4)
}
 0x5a6   :  { %s3443_s28 = scalar_lea.hbm %s3712_s12, 64 }
 0x5a7   :  { %p3444_p5 = scmp.ne.s32.totalorder %s3712_s12, %s3443_s28  ;;  %p3447_p6 = scmp.lt.u32.totalorder %s3443_s28, %s3712_s12 }
 0x5a9   :  { %p3449_p7 = pnand %p3447_p6, %p3444_p5 }
 0x5ab   :  { %3452 = shalt.err (!%p3449_p7)
}
 0x5ac   :  { %2948 = dma.vmem_to_hbm [thread:$0]  %s2946_s14, 64, %s3712_s12, [#allocation3]  }
 0x5ad   :  { %3453 = dma.done.wait [#allocation3], 64  }
 0x5ae   :  { %3454 = vsyncadd [#allocation3], 4294967232 }
 0x5af   :  { %2952 = vsyncpa [#allocation3], 1 }

</bundles_post_ra>
